<compile_context>
chip_gen: v7x
topology: tpu7x:2x2x1
jax: 0.10.0
libtpu: 0.0.40
codegen_flags: <defaults>
</compile_context>

<pallas_src>
import numpy as np
import jax
import jax.numpy as jnp
from jax import lax
from jax.experimental import pallas as pl
from jax.experimental.pallas import tpu as pltpu

L_IN = 8         # input feature length implied by Linear(128, 14) after 3 pools
N_CLASSES = 14


def cnn_kernel(x_ref,
               w1_ref, b1_ref,
               w2_ref, b2_ref,
               w3_ref, b3_ref,
               fw_ref, fb_ref,
               o_ref):
    cdt = w2_ref.dtype                        # matmul compute dtype (bf16)

    x = x_ref[...].astype(cdt)                # (TB, 8)

    # conv1 (+bn1 folded): one block-banded matmul emitting all 8 positions.
    # Columns: [pos0,2,4,6 | pos1,3,5,7] x 32 lanes (24 channels + 8 zero pad).
    y1 = jnp.dot(x, w1_ref[...], preferred_element_type=jnp.float32) + b1_ref[...]
    # pool1 = max of the two 128-lane halves -> 4 pooled positions x 32 lanes.
    h1 = jnp.maximum(y1[:, :128], y1[:, 128:]).astype(cdt)        # (TB, 128)

    # conv2 (+'same' padding baked in): columns [pos0,pos2 | pos1,pos3] x 64.
    y2 = jnp.dot(h1, w2_ref[...], preferred_element_type=jnp.float32) + b2_ref[...]
    # dropout1 = identity (eval); pool2; relu1.
    h2 = jnp.maximum(y2[:, :128], y2[:, 128:])                    # (TB, 128)
    h2 = jnp.maximum(h2, 0.0).astype(cdt)

    # conv3: columns [pos0 | pos1] x 128.
    y3 = jnp.dot(h2, w3_ref[...], preferred_element_type=jnp.float32) + b3_ref[...]
    # pool3 -> (TB, 128) = flattened feature (channel order matches flatten()).
    feat = jnp.maximum(y3[:, :128], y3[:, 128:]).astype(cdt)

    # dropout2 / bn2 / dropout2 / flatten: identity or folded into the FC.
    # FC weight is lane-padded to 128 for a dense matmul; store only 14 cols.
    logits = jnp.dot(feat, fw_ref[...], preferred_element_type=jnp.float32) + fb_ref[...]
    o_ref[...] = logits[:, :N_CLASSES]


def cnn_forward(x, params, *, tb=1024):
    B, L = x.shape
    assert L == L_IN
    assert B % tb == 0 and tb % 8 == 0
    grid = B // tb
    # >= 2 so both v7x TensorCores get work; >= 4 preferred (2 steps / core).
    assert grid >= 2, "use a smaller tb (or larger B) so grid >= 2"

    plist = [params[k] for k in ("w1", "b1", "w2", "b2", "w3", "b3", "fw", "fb")]

    def full_spec(shape):
        nd = len(shape)
        return pl.BlockSpec(shape, lambda i, _nd=nd: (0,) * _nd)

    in_specs = [pl.BlockSpec((tb, L), lambda i: (i, 0))]
    in_specs += [full_spec(p.shape) for p in plist]
    out_specs = pl.BlockSpec((tb, N_CLASSES), lambda i: (i, 0))

    return pl.pallas_call(
        cnn_kernel,
        out_shape=jax.ShapeDtypeStruct((B, N_CLASSES), jnp.float32),
        grid_spec=pltpu.PrefetchScalarGridSpec(
            num_scalar_prefetch=0,
            grid=(grid,),
            in_specs=in_specs,
            out_specs=out_specs,
        ),
        compiler_params=pltpu.CompilerParams(
            dimension_semantics=("parallel",),
            vmem_limit_bytes=32 * 1024 * 1024,   # safe on v5e/v6e/v7x at tb<=2048
        ),
    )(x, *plist)


def init_params(key, compute_dtype=jnp.bfloat16):
    ks = jax.random.split(key, 12)
    f32 = jnp.float32
    # PyTorch-shaped weights, then folded / re-laid-out for the kernel.
    w1_pt = 0.1 * jax.random.normal(ks[0], (24, 1, 3), f32)     # (Cout, Cin, K)
    b1_pt = 0.1 * jax.random.normal(ks[1], (24,), f32)
    g1 = 1.0 + 0.1 * jax.random.normal(ks[2], (24,), f32)       # bn1 gamma
    be1 = 0.1 * jax.random.normal(ks[3], (24,), f32)            # bn1 beta
    w2_pt = 0.1 * jax.random.normal(ks[4], (64, 24, 3), f32)
    b2_pt = 0.1 * jax.random.normal(ks[5], (64,), f32)
    w3_pt = 0.1 * jax.random.normal(ks[6], (128, 64, 3), f32)
    b3_pt = 0.1 * jax.random.normal(ks[7], (128,), f32)
    g2 = 1.0 + 0.1 * jax.random.normal(ks[8], (128,), f32)      # bn2 gamma
    be2 = 0.1 * jax.random.normal(ks[9], (128,), f32)           # bn2 beta
    fw_pt = 0.1 * jax.random.normal(ks[10], (14, 128), f32)     # Linear (out, in)
    fb_pt = 0.1 * jax.random.normal(ks[11], (14,), f32)

    eps = 1e-5
    # TODO(synk): for a trained checkpoint fold the real BN running_mean /
    # running_var here; fresh-module defaults (mean=0, var=1) are assumed.
    s1 = g1 / jnp.sqrt(1.0 + eps); t1 = be1
    s2 = g2 / jnp.sqrt(1.0 + eps); t2 = be2

    # ---- conv1 + bn1 fold, then block-banded fused weight (8, 256).
    # Output columns: position order [0,2,4,6 | 1,3,5,7], 32 lanes/pos
    # (24 real channels + 8 zero pad) so pool1 = max of the two 128-lane halves.
    w1f = np.asarray(w1_pt * s1[:, None, None])                  # (24, 1, 3)
    b1f = np.asarray(b1_pt * s1 + t1)                            # (24,)
    PERM1 = (0, 2, 4, 6, 1, 3, 5, 7)
    W1 = np.zeros((L_IN, 8 * 32), np.float32)
    B1 = np.zeros((1, 8 * 32), np.float32)
    for j, p in enumerate(PERM1):
        for t in range(3):
            i = p + t - 1                                        # 'same' padding
            if 0 <= i < L_IN:
                W1[i, j * 32:j * 32 + 24] = w1f[:, 0, t]
        B1[0, j * 32:j * 32 + 24] = b1f

    # ---- conv2 block-banded fused weight (128, 256).
    # Rows: 4 pooled positions x 32 (24 real + 8 zero-pad rows).
    # Columns: position order [0,2 | 1,3], 64 lanes/pos (pool2 = max of halves).
    w2np = np.asarray(w2_pt)                                     # (64, 24, 3)
    b2np = np.asarray(b2_pt)
    PERM2 = (0, 2, 1, 3)
    W2 = np.zeros((4 * 32, 4 * 64), np.float32)
    B2 = np.zeros((1, 4 * 64), np.float32)
    for j, p in enumerate(PERM2):
        for t in range(3):
            q = p + t - 1
            if 0 <= q < 4:
                W2[q * 32:q * 32 + 24, j * 64:(j + 1) * 64] = w2np[:, :, t].T
        B2[0, j * 64:(j + 1) * 64] = b2np

    # ---- conv3 block-banded fused weight (128, 256).
    # Rows: 2 pooled positions x 64. Columns: [pos0 | pos1] x 128.
    w3np = np.asarray(w3_pt)                                     # (128, 64, 3)
    b3np = np.asarray(b3_pt)
    W3 = np.zeros((2 * 64, 2 * 128), np.float32)
    B3 = np.zeros((1, 2 * 128), np.float32)
    for p in range(2):
        for t in range(3):
            q = p + t - 1
            if 0 <= q < 2:
                W3[q * 64:(q + 1) * 64, p * 128:(p + 1) * 128] = w3np[:, :, t].T
        B3[0, p * 128:(p + 1) * 128] = b3np

    # ---- fold bn2 into the FC; pad weight lanes to 128 (dense matmul), the
    # kernel stores only the first 14 output columns.
    fw_fold = np.asarray(fw_pt.T * s2[:, None])                  # (128, 14)
    fb_fold = np.asarray(fb_pt + t2 @ fw_pt.T)                   # (14,)
    FW = np.zeros((128, 128), np.float32); FW[:, :N_CLASSES] = fw_fold
    FB = np.zeros((1, 128), np.float32);   FB[0, :N_CLASSES] = fb_fold

    cdt = compute_dtype
    kernel_params = {
        "w1": jnp.asarray(W1, cdt), "b1": jnp.asarray(B1),
        "w2": jnp.asarray(W2, cdt), "b2": jnp.asarray(B2),
        "w3": jnp.asarray(W3, cdt), "b3": jnp.asarray(B3),
        "fw": jnp.asarray(FW, cdt), "fb": jnp.asarray(FB),
    }
    pt_params = dict(w1=w1_pt, b1=b1_pt, w2=w2_pt, b2=b2_pt, w3=w3_pt, b3=b3_pt,
                     s1=s1, t1=t1, s2=s2, t2=t2, fw=fw_pt, fb=fb_pt)
    return kernel_params, pt_params


def ref_forward(x, p):
    """Pure-JAX f32 reference mirroring the PyTorch forward (NCW layout)."""
    def conv1d_same(h, w, b):
        y = lax.conv_general_dilated(h, w, window_strides=(1,), padding="SAME",
                                     dimension_numbers=("NCH", "OIH", "NCH"))
        return y + b[None, :, None]

    def maxpool2(h):
        B, C, L = h.shape
        return h.reshape(B, C, L // 2, 2).max(axis=-1)

    h = x[:, None, :]                                   # unsqueeze(1)
    h = conv1d_same(h, p["w1"], p["b1"])
    h = h * p["s1"][None, :, None] + p["t1"][None, :, None]
    h = maxpool2(h)
    h = conv1d_same(h, p["w2"], p["b2"])
    h = maxpool2(h)
    h = jnp.maximum(h, 0.0)
    h = conv1d_same(h, p["w3"], p["b3"])
    h = maxpool2(h)
    h = h * p["s2"][None, :, None] + p["t2"][None, :, None]
    h = h.reshape(h.shape[0], -1)                       # flatten
    return h @ p["fw"].T + p["fb"]


if __name__ == "__main__":
    key = jax.random.PRNGKey(0)
    k_x, k_p = jax.random.split(key)
    B, TB = 4096, 1024                                  # grid = 4 (2 steps / v7x core)
    x = jax.random.normal(k_x, (B, L_IN), jnp.float32)

    kernel_params, pt_params = init_params(k_p)

    out = cnn_forward(x, kernel_params, tb=TB)
    out = jax.block_until_ready(out)

    ref = ref_forward(x, pt_params)
    assert out.shape == (B, N_CLASSES)
    err = jnp.max(jnp.abs(out - ref))
    # bf16 matmul operands (f32 accumulation) -> loose-but-safe tolerance.
    assert jnp.allclose(out, ref, atol=3e-2, rtol=3e-2), f"max abs err {err}"

    print("KERNEL_OK")
</pallas_src>

<mosaic_0001>
module attributes {stable_mosaic.version = 11 : i64} {
  func.func @cnn_kernel(%arg0: i32, %arg1: memref<1024x8xf32, #tpu.memory_space<vmem>>, %arg2: memref<8x256xbf16, #tpu.memory_space<vmem>>, %arg3: memref<1x256xf32, #tpu.memory_space<vmem>>, %arg4: memref<128x256xbf16, #tpu.memory_space<vmem>>, %arg5: memref<1x256xf32, #tpu.memory_space<vmem>>, %arg6: memref<128x256xbf16, #tpu.memory_space<vmem>>, %arg7: memref<1x256xf32, #tpu.memory_space<vmem>>, %arg8: memref<128x128xbf16, #tpu.memory_space<vmem>>, %arg9: memref<1x128xf32, #tpu.memory_space<vmem>>, %arg10: memref<1024x14xf32, #tpu.memory_space<vmem>>) attributes {dimension_semantics = [#tpu.dimension_semantics<parallel>], iteration_bounds = array<i64: 4>, scalar_prefetch = 0 : i64, scratch_operands = 0 : i64, tpu.core_type = #tpu.core_type<tc>, window_params = [{transform_indices = @transform_0, window_bounds = array<i64: 1024, 8>}, {pipeline_mode = #tpu.pipeline_mode<synchronous>, transform_indices = @transform_1, window_bounds = array<i64: 8, 256>}, {pipeline_mode = #tpu.pipeline_mode<synchronous>, transform_indices = @transform_2, window_bounds = array<i64: 1, 256>}, {pipeline_mode = #tpu.pipeline_mode<synchronous>, transform_indices = @transform_3, window_bounds = array<i64: 128, 256>}, {pipeline_mode = #tpu.pipeline_mode<synchronous>, transform_indices = @transform_4, window_bounds = array<i64: 1, 256>}, {pipeline_mode = #tpu.pipeline_mode<synchronous>, transform_indices = @transform_5, window_bounds = array<i64: 128, 256>}, {pipeline_mode = #tpu.pipeline_mode<synchronous>, transform_indices = @transform_6, window_bounds = array<i64: 1, 256>}, {pipeline_mode = #tpu.pipeline_mode<synchronous>, transform_indices = @transform_7, window_bounds = array<i64: 128, 128>}, {pipeline_mode = #tpu.pipeline_mode<synchronous>, transform_indices = @transform_8, window_bounds = array<i64: 1, 128>}, {transform_indices = @transform_9, window_bounds = array<i64: 1024, 14>}]} {
    %c0 = arith.constant 0 : index
    %c0_0 = arith.constant 0 : index
    %0 = vector.load %arg1[%c0, %c0_0] : memref<1024x8xf32, #tpu.memory_space<vmem>>, vector<1024x8xf32>
    %1 = arith.truncf %0 : vector<1024x8xf32> to vector<1024x8xbf16>
    %c0_1 = arith.constant 0 : index
    %c0_2 = arith.constant 0 : index
    %2 = vector.load %arg2[%c0_1, %c0_2] : memref<8x256xbf16, #tpu.memory_space<vmem>>, vector<8x256xbf16>
    %cst = arith.constant dense<0.000000e+00> : vector<1024x256xf32>
    %3 = tpu.matmul %1, %2, %cst {dimension_numbers = #tpu.dot_dimension_numbers<[1], [0], [0], [1], [0, 0, 1, 1], [], []>} : vector<1024x8xbf16>, vector<8x256xbf16>, vector<1024x256xf32> -> vector<1024x256xf32>
    %c0_3 = arith.constant 0 : index
    %c0_4 = arith.constant 0 : index
    %4 = vector.load %arg3[%c0_3, %c0_4] : memref<1x256xf32, #tpu.memory_space<vmem>>, vector<1x256xf32>
    %5 = vector.broadcast %4 : vector<1x256xf32> to vector<1024x256xf32>
    %6 = arith.addf %3, %5 : vector<1024x256xf32>
    %7 = vector.extract_strided_slice %6 {offsets = [0, 0], sizes = [1024, 128], strides = [1, 1]} : vector<1024x256xf32> to vector<1024x128xf32>
    %8 = vector.extract_strided_slice %6 {offsets = [0, 128], sizes = [1024, 128], strides = [1, 1]} : vector<1024x256xf32> to vector<1024x128xf32>
    %9 = arith.maximumf %7, %8 : vector<1024x128xf32>
    %10 = arith.truncf %9 : vector<1024x128xf32> to vector<1024x128xbf16>
    %c0_5 = arith.constant 0 : index
    %c0_6 = arith.constant 0 : index
    %11 = vector.load %arg4[%c0_5, %c0_6] : memref<128x256xbf16, #tpu.memory_space<vmem>>, vector<128x256xbf16>
    %cst_7 = arith.constant dense<0.000000e+00> : vector<1024x256xf32>
    %12 = tpu.matmul %10, %11, %cst_7 {dimension_numbers = #tpu.dot_dimension_numbers<[1], [0], [0], [1], [0, 0, 1, 1], [], []>} : vector<1024x128xbf16>, vector<128x256xbf16>, vector<1024x256xf32> -> vector<1024x256xf32>
    %c0_8 = arith.constant 0 : index
    %c0_9 = arith.constant 0 : index
    %13 = vector.load %arg5[%c0_8, %c0_9] : memref<1x256xf32, #tpu.memory_space<vmem>>, vector<1x256xf32>
    %14 = vector.broadcast %13 : vector<1x256xf32> to vector<1024x256xf32>
    %15 = arith.addf %12, %14 : vector<1024x256xf32>
    %16 = vector.extract_strided_slice %15 {offsets = [0, 0], sizes = [1024, 128], strides = [1, 1]} : vector<1024x256xf32> to vector<1024x128xf32>
    %17 = vector.extract_strided_slice %15 {offsets = [0, 128], sizes = [1024, 128], strides = [1, 1]} : vector<1024x256xf32> to vector<1024x128xf32>
    %18 = arith.maximumf %16, %17 : vector<1024x128xf32>
    %cst_10 = arith.constant 0.000000e+00 : f32
    %19 = vector.broadcast %cst_10 : f32 to vector<1024x128xf32>
    %20 = arith.maximumf %18, %19 : vector<1024x128xf32>
    %21 = arith.truncf %20 : vector<1024x128xf32> to vector<1024x128xbf16>
    %c0_11 = arith.constant 0 : index
    %c0_12 = arith.constant 0 : index
    %22 = vector.load %arg6[%c0_11, %c0_12] : memref<128x256xbf16, #tpu.memory_space<vmem>>, vector<128x256xbf16>
    %cst_13 = arith.constant dense<0.000000e+00> : vector<1024x256xf32>
    %23 = tpu.matmul %21, %22, %cst_13 {dimension_numbers = #tpu.dot_dimension_numbers<[1], [0], [0], [1], [0, 0, 1, 1], [], []>} : vector<1024x128xbf16>, vector<128x256xbf16>, vector<1024x256xf32> -> vector<1024x256xf32>
    %c0_14 = arith.constant 0 : index
    %c0_15 = arith.constant 0 : index
    %24 = vector.load %arg7[%c0_14, %c0_15] : memref<1x256xf32, #tpu.memory_space<vmem>>, vector<1x256xf32>
    %25 = vector.broadcast %24 : vector<1x256xf32> to vector<1024x256xf32>
    %26 = arith.addf %23, %25 : vector<1024x256xf32>
    %27 = vector.extract_strided_slice %26 {offsets = [0, 0], sizes = [1024, 128], strides = [1, 1]} : vector<1024x256xf32> to vector<1024x128xf32>
    %28 = vector.extract_strided_slice %26 {offsets = [0, 128], sizes = [1024, 128], strides = [1, 1]} : vector<1024x256xf32> to vector<1024x128xf32>
    %29 = arith.maximumf %27, %28 : vector<1024x128xf32>
    %30 = arith.truncf %29 : vector<1024x128xf32> to vector<1024x128xbf16>
    %c0_16 = arith.constant 0 : index
    %c0_17 = arith.constant 0 : index
    %31 = vector.load %arg8[%c0_16, %c0_17] : memref<128x128xbf16, #tpu.memory_space<vmem>>, vector<128x128xbf16>
    %cst_18 = arith.constant dense<0.000000e+00> : vector<1024x128xf32>
    %32 = tpu.matmul %30, %31, %cst_18 {dimension_numbers = #tpu.dot_dimension_numbers<[1], [0], [0], [1], [0, 0, 1, 1], [], []>} : vector<1024x128xbf16>, vector<128x128xbf16>, vector<1024x128xf32> -> vector<1024x128xf32>
    %c0_19 = arith.constant 0 : index
    %c0_20 = arith.constant 0 : index
    %33 = vector.load %arg9[%c0_19, %c0_20] : memref<1x128xf32, #tpu.memory_space<vmem>>, vector<1x128xf32>
    %34 = vector.broadcast %33 : vector<1x128xf32> to vector<1024x128xf32>
    %35 = arith.addf %32, %34 : vector<1024x128xf32>
    %36 = vector.extract_strided_slice %35 {offsets = [0, 0], sizes = [1024, 14], strides = [1, 1]} : vector<1024x128xf32> to vector<1024x14xf32>
    %c0_21 = arith.constant 0 : index
    %c0_22 = arith.constant 0 : index
    %37 = vector.load %arg10[%c0_21, %c0_22] : memref<1024x14xf32, #tpu.memory_space<vmem>>, vector<1024x14xf32>
    tpu.vector_store %arg10[%c0_21, %c0_22], %36 {strides = array<i32>} : memref<1024x14xf32, #tpu.memory_space<vmem>>, vector<1024x14xf32>,
    return
  }
  func.func @transform_0(%arg0: i32) -> (i32, i32) {
    %c0_i32 = arith.constant 0 : i32
    %c0_i32_0 = arith.constant 0 : i32
    return %arg0, %c0_i32 : i32, i32
  }
  func.func @transform_1(%arg0: i32) -> (i32, i32) {
    %c0_i32 = arith.constant 0 : i32
    %c0_i32_0 = arith.constant 0 : i32
    %c0_i32_1 = arith.constant 0 : i32
    return %c0_i32, %c0_i32_0 : i32, i32
  }
  func.func @transform_2(%arg0: i32) -> (i32, i32) {
    %c0_i32 = arith.constant 0 : i32
    %c0_i32_0 = arith.constant 0 : i32
    %c0_i32_1 = arith.constant 0 : i32
    return %c0_i32, %c0_i32_0 : i32, i32
  }
  func.func @transform_3(%arg0: i32) -> (i32, i32) {
    %c0_i32 = arith.constant 0 : i32
    %c0_i32_0 = arith.constant 0 : i32
    %c0_i32_1 = arith.constant 0 : i32
    return %c0_i32, %c0_i32_0 : i32, i32
  }
  func.func @transform_4(%arg0: i32) -> (i32, i32) {
    %c0_i32 = arith.constant 0 : i32
    %c0_i32_0 = arith.constant 0 : i32
    %c0_i32_1 = arith.constant 0 : i32
    return %c0_i32, %c0_i32_0 : i32, i32
  }
  func.func @transform_5(%arg0: i32) -> (i32, i32) {
    %c0_i32 = arith.constant 0 : i32
    %c0_i32_0 = arith.constant 0 : i32
    %c0_i32_1 = arith.constant 0 : i32
    return %c0_i32, %c0_i32_0 : i32, i32
  }
  func.func @transform_6(%arg0: i32) -> (i32, i32) {
    %c0_i32 = arith.constant 0 : i32
    %c0_i32_0 = arith.constant 0 : i32
    %c0_i32_1 = arith.constant 0 : i32
    return %c0_i32, %c0_i32_0 : i32, i32
  }
  func.func @transform_7(%arg0: i32) -> (i32, i32) {
    %c0_i32 = arith.constant 0 : i32
    %c0_i32_0 = arith.constant 0 : i32
    %c0_i32_1 = arith.constant 0 : i32
    return %c0_i32, %c0_i32_0 : i32, i32
  }
  func.func @transform_8(%arg0: i32) -> (i32, i32) {
    %c0_i32 = arith.constant 0 : i32
    %c0_i32_0 = arith.constant 0 : i32
    %c0_i32_1 = arith.constant 0 : i32
    return %c0_i32, %c0_i32_0 : i32, i32
  }
  func.func @transform_9(%arg0: i32) -> (i32, i32) {
    %c0_i32 = arith.constant 0 : i32
    %c0_i32_0 = arith.constant 0 : i32
    return %arg0, %c0_i32 : i32, i32
  }
}

</mosaic_0001>

<bundles_post_ra>
// kernel: tpu_custom_call.1
= control target key start
LH: loop header
LB: loop body
LE: loop exit
PB: predicated region body
PF: predicated region fallthrough
CT: control target
= control target key end

     0   :  { %s4951_s30 = smov 0   ;;  %s6763_s0 = inlined_call_operand.vmem [shape: f32[4096,8], index: 0, kind: input, shape index: {}]   ;;  %s6764_s1 = inlined_call_operand.vmem [shape: bf16[8,256], index: 1, kind: input, shape index: {}]   ;;  %s6765_s2 = inlined_call_operand.vmem [shape: f32[1,256], index: 2, kind: input, shape index: {}]   ;;  %s6766_s3 = inlined_call_operand.vmem [shape: bf16[128,256], index: 3, kind: input, shape index: {}]   ;;  %s6767_s4 = inlined_call_operand.vmem [shape: f32[1,256], index: 4, kind: input, shape index: {}]   ;;  %s6768_s5 = inlined_call_operand.vmem [shape: bf16[128,256], index: 5, kind: input, shape index: {}]   ;;  %s6769_s6 = inlined_call_operand.vmem [shape: f32[1,256], index: 6, kind: input, shape index: {}]   ;;  %s6770_s7 = inlined_call_operand.vmem [shape: bf16[128,128], index: 7, kind: input, shape index: {}]   ;;  %s6771_s8 = inlined_call_operand.vmem [shape: f32[1,128], index: 8, kind: input, shape index: {}]   ;;  %s6772_s9 = inlined_call_operand.vmem [shape: f32[4096,14], index: 9, kind: output, shape index: {}]  }
   0x1 LB: > { %s4487_s10 = sadd.s32 4294967295, %s4898_s30   ;;  %p4491_p0 = scmp.ge.s32.totalorder %s4898_s30, 1  ;;  %s4898_s30 = sphi %s4951_s30, %s19_s30  }
   0x2   : > { %p288_p1 = scmp.lt.s32.totalorder %s4898_s30, 5 }
   0x4   : > { %p289_p2 = pnand %p4491_p0, %p288_p1 }
   0x5   : > { %v529_v0 = vld [vmem:[%s6764_s1] sm:$0xff] (!%p289_p2)  ;;  %vm740_vm0 = vcmask (!%p289_p2), 1043456   ;;  %s4492_s13 = sshll.u32 (!%p289_p2), %s4487_s10, 7  ;;  %v4900_v3 = vmov (!%p289_p2), 0   ;;  %vm547_vm1 = vcmask (!%p289_p2), 64512   ;;  %vm4302_vm2 = vcmask (!%p289_p2), 113664  }
   0x6   : > { %292 = sbr.rel (%p289_p2) target bundleno = 1406 (0x57e), region = 56  ;;  %v4497_v1 = vcombine.high (!%p289_p2), %v529_v0, %v529_v0  ;;  %v4496_v2 = vcombine.low (!%p289_p2), %v529_v0, %v529_v0  ;;  %779 = vmatprep.mubr.bf16.mxu0 (!%p289_p2), %v4900_v3  ;;  %p325_p3 = scmp.lt.s32.totalorder (!%p289_p2), %s4492_s13, 511  ;;  %v4837_v4 = vld [vmem:[%s6768_s5 + $0x4] ss:$8 sps:$4 sm:$0xff] (!%p289_p2)   ;;  %1259 = vmatprep.mubr.bf16.mxu1 (!%p289_p2), %v4900_v3  ;;  %v4835_v9 = vld [vmem:[%s6768_s5] ss:$8 sps:$4 sm:$0xff] (!%p289_p2)  }
   0x7   : > { %v4840_v6 = vld [vmem:[%s6766_s3 + $0x4] ss:$8 sps:$4 sm:$0xff] (!%p289_p2)   ;;  %v4843_v11 = vld [vmem:[%s6768_s5 + $0x14] ss:$8 sps:$4 sm:$0xff] (!%p289_p2)   ;;  %v4841_v14 = vld [vmem:[%s6768_s5 + $0x10] ss:$8 sps:$4 sm:$0xff] (!%p289_p2)  }
   0x8   : > { %4498 = vmatprep.subr.msk.bf16.mxu0 (!%p289_p2), %vm740_vm0, %v4497_v1  ;;  %v742_v5 = vsel (!%p289_p2), %vm740_vm0, %v4496_v2, 0  ;;  %4822 = vmatprep.subr.msk.bf16.mxu1 (!%p289_p2), %vm740_vm0, %v4497_v1  ;;  %v4838_v18 = vld [vmem:[%s6766_s3] ss:$8 sps:$4 sm:$0xff] (!%p289_p2)   ;;  %v4846_v20 = vld [vmem:[%s6766_s3 + $0x14] ss:$8 sps:$4 sm:$0xff] (!%p289_p2)  }
   0x9   : > { %748 = vmatpush1.bf16.msra.mxu0 (!%p289_p2), %v742_v5  ;;  %4823 = vmatpush1.bf16.msra.mxu1 (!%p289_p2), %v742_v5  ;;  %v4844_v22 = vld [vmem:[%s6766_s3 + $0x10] ss:$8 sps:$4 sm:$0xff] (!%p289_p2)   ;;  %v4849_v26 = vld [vmem:[%s6766_s3 + $0x24] ss:$8 sps:$4 sm:$0xff] (!%p289_p2)   ;;  %v4847_v29 = vld [vmem:[%s6766_s3 + $0x20] ss:$8 sps:$4 sm:$0xff] (!%p289_p2)  }
   0xa   : > { %2821 = vmatprep.subr.bf16.mxu0 (!%p289_p2), %v4837_v4  ;;  %1720 = vmatprep.subr.bf16.mxu1 (!%p289_p2), %v4840_v6  ;;  %v4852_v31 = vld [vmem:[%s6766_s3 + $0x34] ss:$8 sps:$4 sm:$0xff] (!%p289_p2)   ;;  %v4850_v35 = vld [vmem:[%s6766_s3 + $0x30] ss:$8 sps:$4 sm:$0xff] (!%p289_p2)   ;;  %v4853_v40 = vld [vmem:[%s6768_s5 + $0x20] ss:$8 sps:$4 sm:$0xff] (!%p289_p2)  }
   0xb   : > { %v4855_v41 = vld [vmem:[%s6768_s5 + $0x24] ss:$8 sps:$4 sm:$0xff] (!%p289_p2)   ;;  %v4856_v42 = vld [vmem:[%s6766_s3 + $0x40] ss:$8 sps:$4 sm:$0xff] (!%p289_p2)   ;;  %v4859_v55 = vld [vmem:[%s6766_s3 + $0x50] ss:$8 sps:$4 sm:$0xff] (!%p289_p2)  }
   0xc   : > { %v4858_v45 = vld [vmem:[%s6766_s3 + $0x44] ss:$8 sps:$4 sm:$0xff] (!%p289_p2)   ;;  %v4861_v56 = vld [vmem:[%s6766_s3 + $0x54] ss:$8 sps:$4 sm:$0xff] (!%p289_p2)   ;;  %v4862_v6 = vld [vmem:[%s6766_s3 + $0x60] ss:$8 sps:$4 sm:$0xff] (!%p289_p2)  }
   0xd   : > { %s6774_s13 = smov (!%p325_p3, %s4492_s13), 511 }
   0xe   : > { %s4493_s18 = sshll.u32 %s6774_s13, 3 }
   0xf   : > { %s4978_s21 = scalar_lea.vmem %s6763_s0, %s4493_s18  ;;  %s6258_s20 = scalar_lea.vmem %s6772_s9, %s4493_s18 }
  0x10   : > { %v337_v7 = vld [vmem:[%s4978_s21] sm:$0xff]  ;;  %v338_v8 = vld [vmem:[%s4978_s21 + $0x8] sm:$0xff]  ;;  %v339_v12 = vld [vmem:[%s4978_s21 + $0x10] sm:$0xff] }
  0x11   : > { %v465_v10 = vpack.c.bf16 %v338_v8, %v337_v7  ;;  %v340_v13 = vld [vmem:[%s4978_s21 + $0x18] sm:$0xff]  ;;  %v433_v16 = vld [vmem:[%s4978_s21 + $0x300] sm:$0xff]  ;;  %v434_v17 = vld [vmem:[%s4978_s21 + $0x308] sm:$0xff] }
  0x12   : > { %v466_v15 = vpack.c.bf16 %v340_v13, %v339_v12  ;;  %v513_v19 = vpack.c.bf16 %v434_v17, %v433_v16  ;;  %v341_v21 = vld [vmem:[%s4978_s21 + $0x20] sm:$0xff]  ;;  %v342_v23 = vld [vmem:[%s4978_s21 + $0x28] sm:$0xff]  ;;  %v435_v24 = vld [vmem:[%s4978_s21 + $0x310] sm:$0xff] }
  0x13   : > { %4499 = vmatmul.mubr.msk.bf16.vlgmr.msra.gmra.mrb[0].mxu0 %vm547_vm1, %v465_v10  ;;  %v436_v25 = vld [vmem:[%s4978_s21 + $0x318] sm:$0xff]  ;;  %v467_v27 = vpack.c.bf16 %v342_v23, %v341_v21  ;;  %v343_v30 = vld [vmem:[%s4978_s21 + $0x30] sm:$0xff]  ;;  %v437_v33 = vld [vmem:[%s4978_s21 + $0x320] sm:$0xff] }
  0x14   : > { %789 = vmatprep.mubr.bf16.mxu0 %v4900_v3  ;;  %2822 = vmatpush1.bf16.msra.mxu0 %v4835_v9  ;;  %v514_v28 = vpack.c.bf16 %v436_v25, %v435_v24  ;;  %v344_v32 = vld [vmem:[%s4978_s21 + $0x38] sm:$0xff]  ;;  %v438_v34 = vld [vmem:[%s4978_s21 + $0x328] sm:$0xff]  ;;  %v345_v38 = vld [vmem:[%s4978_s21 + $0x40] sm:$0xff] }
  0x15   : > { %2823 = vmatprep.subr.bf16.mxu0 %v4843_v11  ;;  %4547 = vmatmul.mubr.msk.bf16.vlgmr.msra.gmra.mrb[0].mxu1 %vm547_vm1, %v513_v19  ;;  %v468_v36 = vpack.c.bf16 %v344_v32, %v343_v30  ;;  %v515_v37 = vpack.c.bf16 %v438_v34, %v437_v33  ;;  %v346_v39 = vld [vmem:[%s4978_s21 + $0x48] sm:$0xff]  ;;  %v439_v43 = vld [vmem:[%s4978_s21 + $0x330] sm:$0xff]  ;;  %v440_v44 = vld [vmem:[%s4978_s21 + $0x338] sm:$0xff] }
  0x16   : > { %1721 = vmatpush1.bf16.msra.mxu1 %v4838_v18  ;;  %1269 = vmatprep.mubr.bf16.mxu1 %v4900_v3  ;;  %v469_v46 = vpack.c.bf16 %v346_v39, %v345_v38  ;;  %v516_v47 = vpack.c.bf16 %v440_v44, %v439_v43  ;;  %v347_v48 = vld [vmem:[%s4978_s21 + $0x50] sm:$0xff]  ;;  %v348_v49 = vld [vmem:[%s4978_s21 + $0x58] sm:$0xff]  ;;  %v441_v50 = vld [vmem:[%s4978_s21 + $0x340] sm:$0xff] }
  0x17   : > { %1722 = vmatprep.subr.bf16.mxu1 %v4846_v20  ;;  %v442_v51 = vld [vmem:[%s4978_s21 + $0x348] sm:$0xff]  ;;  %v470_v52 = vpack.c.bf16 %v348_v49, %v347_v48  ;;  %v349_v54 = vld [vmem:[%s4978_s21 + $0x60] sm:$0xff]  ;;  %v443_v58 = vld [vmem:[%s4978_s21 + $0x350] sm:$0xff] }
  0x18   : > { %2824 = vmatpush1.bf16.msra.mxu0 %v4841_v14  ;;  %v517_v53 = vpack.c.bf16 %v442_v51, %v441_v50  ;;  %v350_v57 = vld [vmem:[%s4978_s21 + $0x68] sm:$0xff]  ;;  %v444_v59 = vld [vmem:[%s4978_s21 + $0x358] sm:$0xff]  ;;  %v351_v62 = vld [vmem:[%s4978_s21 + $0x70] sm:$0xff] }
  0x19   : > { %2825 = vmatprep.subr.bf16.mxu0 %v4855_v41  ;;  %v471_v60 = vpack.c.bf16 %v350_v57, %v349_v54  ;;  %v518_v61 = vpack.c.bf16 %v444_v59, %v443_v58  ;;  %v352_v63 = vld [vmem:[%s4978_s21 + $0x78] sm:$0xff]  ;;  %v445_v0 = vld [vmem:[%s4978_s21 + $0x360] sm:$0xff]  ;;  %v446_v1 = vld [vmem:[%s4978_s21 + $0x368] sm:$0xff] }
  0x1a   : > { %1723 = vmatpush1.bf16.msra.mxu1 %v4844_v22  ;;  %v472_v2 = vpack.c.bf16 %v352_v63, %v351_v62  ;;  %v519_v4 = vpack.c.bf16 %v446_v1, %v445_v0  ;;  %v353_v5 = vld [vmem:[%s4978_s21 + $0x80] sm:$0xff]  ;;  %v354_v8 = vld [vmem:[%s4978_s21 + $0x88] sm:$0xff]  ;;  %v447_v9 = vld [vmem:[%s4978_s21 + $0x370] sm:$0xff] }
  0x1b   : > { %4500 = vmatmul.mubr.msk.bf16.gmra.mrb[4].mxu0 %vm547_vm1, %v466_v15  ;;  %1724 = vmatprep.subr.bf16.mxu1 %v4849_v26  ;;  %v4864_v7 = vld [vmem:[%s6766_s3 + $0x64] ss:$8 sps:$4 sm:$0xff]   ;;  %v448_v10 = vld [vmem:[%s4978_s21 + $0x378] sm:$0xff]  ;;  %v473_v11 = vpack.c.bf16 %v354_v8, %v353_v5  ;;  %v355_v13 = vld [vmem:[%s4978_s21 + $0x90] sm:$0xff] }
  0x1c   : > { %799 = vmatprep.mubr.bf16.mxu0 %v4900_v3  ;;  %2826 = vmatpush1.bf16.msra.mxu0 %v4853_v40  ;;  %v520_v12 = vpack.c.bf16 %v448_v10, %v447_v9  ;;  %v356_v14 = vld [vmem:[%s4978_s21 + $0x98] sm:$0xff]  ;;  %v449_v15 = vld [vmem:[%s4978_s21 + $0x380] sm:$0xff]  ;;  %v450_v16 = vld [vmem:[%s4978_s21 + $0x388] sm:$0xff] }
  0x1d   : > { %4548 = vmatmul.mubr.msk.bf16.gmra.mrb[4].mxu1 %vm547_vm1, %v514_v28  ;;  %v474_v17 = vpack.c.bf16 %v356_v14, %v355_v13  ;;  %v521_v18 = vpack.c.bf16 %v450_v16, %v449_v15  ;;  %v357_v19 = vld [vmem:[%s4978_s21 + $0xa0] sm:$0xff]  ;;  %v358_v20 = vld [vmem:[%s4978_s21 + $0xa8] sm:$0xff]  ;;  %v4865_v21 = vld [vmem:[%s6768_s5 + $0x30] ss:$8 sps:$4 sm:$0xff]  }
  0x1e   : > { %1279 = vmatprep.mubr.bf16.mxu1 %v4900_v3  ;;  %1725 = vmatpush1.bf16.msra.mxu1 %v4847_v29  ;;  %v4867_v22 = vld [vmem:[%s6768_s5 + $0x34] ss:$8 sps:$4 sm:$0xff]   ;;  %v4868_v23 = vld [vmem:[%s6766_s3 + $0x70] ss:$8 sps:$4 sm:$0xff]   ;;  %v454_v32 = vld [vmem:[%s4978_s21 + $0x3a8] sm:$0xff] }
  0x1f   : > { %1726 = vmatprep.subr.bf16.mxu1 %v4852_v31  ;;  %v451_v24 = vld [vmem:[%s4978_s21 + $0x390] sm:$0xff]  ;;  %v452_v25 = vld [vmem:[%s4978_s21 + $0x398] sm:$0xff]  ;;  %2827 = vmatprep.subr.bf16.mxu0 %v4867_v22  ;;  %v453_v31 = vld [vmem:[%s4978_s21 + $0x3a0] sm:$0xff] }
  0x20   : > { %v4870_v26 = vld [vmem:[%s6766_s3 + $0x74] ss:$8 sps:$4 sm:$0xff]   ;;  %2828 = vmatpush1.bf16.msra.mxu0 %v4865_v21  ;;  %v522_v28 = vpack.c.bf16 %v452_v25, %v451_v24  ;;  %v523_v34 = vpack.c.bf16 %v454_v32, %v453_v31  ;;  %v457_v43 = vld [vmem:[%s4978_s21 + $0x3c0] sm:$0xff]  ;;  %v458_v44 = vld [vmem:[%s4978_s21 + $0x3c8] sm:$0xff] }
  0x21   : > { %v359_v29 = vld [vmem:[%s4978_s21 + $0xb0] sm:$0xff]  ;;  %v360_v30 = vld [vmem:[%s4978_s21 + $0xb8] sm:$0xff]  ;;  %v366_v48 = vld [vmem:[%s4978_s21 + $0xe8] sm:$0xff] }
  0x22   : > { %1727 = vmatpush1.bf16.msra.mxu1 %v4850_v35  ;;  %v476_v33 = vpack.c.bf16 %v360_v30, %v359_v29  ;;  %v361_v35 = vld [vmem:[%s4978_s21 + $0xc0] sm:$0xff]  ;;  %v456_v38 = vld [vmem:[%s4978_s21 + $0x3b8] sm:$0xff]  ;;  %v363_v41 = vld [vmem:[%s4978_s21 + $0xd0] sm:$0xff] }
  0x23   : > { %4501 = vmatmul.mubr.msk.bf16.gmra.mrb[8].mxu0 %vm547_vm1, %v467_v27  ;;  %1728 = vmatprep.subr.bf16.mxu1 %v4858_v45  ;;  %v475_v27 = vpack.c.bf16 %v358_v20, %v357_v19  ;;  %v459_v49 = vld [vmem:[%s4978_s21 + $0x3d0] sm:$0xff]  ;;  %v460_v50 = vld [vmem:[%s4978_s21 + $0x3d8] sm:$0xff]  ;;  %v369_v59 = vld [vmem:[%s4978_s21 + $0x100] sm:$0xff] }
  0x24   : > { %809 = vmatprep.mubr.bf16.mxu0 %v4900_v3  ;;  %v368_v54 = vld [vmem:[%s4978_s21 + $0xf8] sm:$0xff]  ;;  %v4871_v1 = vld [vmem:[%s6768_s5 + $0x40] ss:$8 sps:$4 sm:$0xff]   ;;  %v375_v10 = vld [vmem:[%s4978_s21 + $0x130] sm:$0xff] }
  0x25   : > { %4549 = vmatmul.mubr.msk.bf16.gmra.mrb[8].mxu1 %vm547_vm1, %v515_v37  ;;  %v455_v37 = vld [vmem:[%s4978_s21 + $0x3b0] sm:$0xff]  ;;  %v464_v62 = vld [vmem:[%s4978_s21 + $0x3f8] sm:$0xff]  ;;  %v374_v8 = vld [vmem:[%s4978_s21 + $0x128] sm:$0xff] }
  0x26   : > { %1289 = vmatprep.mubr.bf16.mxu1 %v4900_v3  ;;  %1729 = vmatpush1.bf16.msra.mxu1 %v4856_v42  ;;  %v524_v40 = vpack.c.bf16 %v456_v38, %v455_v37  ;;  %v364_v42 = vld [vmem:[%s4978_s21 + $0xd8] sm:$0xff]  ;;  %v377_v13 = vld [vmem:[%s4978_s21 + $0x140] sm:$0xff]  ;;  %v378_v14 = vld [vmem:[%s4978_s21 + $0x148] sm:$0xff] }
  0x27   : > { %1730 = vmatprep.subr.bf16.mxu1 %v4861_v56  ;;  %v478_v45 = vpack.c.bf16 %v364_v42, %v363_v41  ;;  %v462_v56 = vld [vmem:[%s4978_s21 + $0x3e8] sm:$0xff]  ;;  %v372_v5 = vld [vmem:[%s4978_s21 + $0x118] sm:$0xff]  ;;  %v485_v15 = vpack.c.bf16 %v378_v14, %v377_v13  ;;  %v379_v16 = vld [vmem:[%s4978_s21 + $0x150] sm:$0xff] }
  0x28   : > { %v381_v19 = vld [vmem:[%s4978_s21 + $0x160] sm:$0xff]  ;;  %v382_v20 = vld [vmem:[%s4978_s21 + $0x168] sm:$0xff]  ;;  %v4874_v22 = vld [vmem:[%s6768_s5 + $0x50] ss:$8 sps:$4 sm:$0xff]  }
  0x29   : > { %v487_v21 = vpack.c.bf16 %v382_v20, %v381_v19  ;;  %v383_v24 = vld [vmem:[%s4978_s21 + $0x170] sm:$0xff]  ;;  %v384_v25 = vld [vmem:[%s4978_s21 + $0x178] sm:$0xff] }
  0x2a   : > { %1731 = vmatpush1.bf16.msra.mxu1 %v4859_v55  ;;  %v461_v55 = vld [vmem:[%s4978_s21 + $0x3e0] sm:$0xff]  ;;  %v387_v30 = vld [vmem:[%s4978_s21 + $0x190] sm:$0xff]  ;;  %v388_v31 = vld [vmem:[%s4978_s21 + $0x198] sm:$0xff] }
  0x2b   : > { %4502 = vmatmul.mubr.msk.bf16.gmra.mrb[12].mxu0 %vm547_vm1, %v468_v36  ;;  %1732 = vmatprep.subr.bf16.mxu1 %v4864_v7  ;;  %v362_v36 = vld [vmem:[%s4978_s21 + $0xc8] sm:$0xff]  ;;  %v527_v58 = vpack.c.bf16 %v462_v56, %v461_v55  ;;  %v373_v7 = vld [vmem:[%s4978_s21 + $0x120] sm:$0xff]  ;;  %v490_v32 = vpack.c.bf16 %v388_v31, %v387_v30  ;;  %v396_v19 = vld [vmem:[%s4978_s21 + $0x1d8] sm:$0xff] }
  0x2c   : > { %819 = vmatprep.mubr.bf16.mxu0 %v4900_v3  ;;  %v477_v39 = vpack.c.bf16 %v362_v36, %v361_v35  ;;  %v483_v9 = vpack.c.bf16 %v374_v8, %v373_v7  ;;  %v389_v35 = vld [vmem:[%s4978_s21 + $0x1a0] sm:$0xff]  ;;  %v390_v36 = vld [vmem:[%s4978_s21 + $0x1a8] sm:$0xff] }
  0x2d   : > { %4550 = vmatmul.mubr.msk.bf16.gmra.mrb[12].mxu1 %vm547_vm1, %v516_v47  ;;  %v365_v47 = vld [vmem:[%s4978_s21 + $0xe0] sm:$0xff]  ;;  %v491_v37 = vpack.c.bf16 %v390_v36, %v389_v35 }
  0x2e   : > { %1299 = vmatprep.mubr.bf16.mxu1 %v4900_v3  ;;  %1733 = vmatpush1.bf16.msra.mxu1 %v4862_v6  ;;  %v479_v51 = vpack.c.bf16 %v366_v48, %v365_v47  ;;  %v393_v56 = vld [vmem:[%s4978_s21 + $0x1c0] sm:$0xff] }
  0x2f   : > { %1734 = vmatprep.subr.bf16.mxu1 %v4870_v26  ;;  %v488_v26 = vpack.c.bf16 %v384_v25, %v383_v24 }
  0x32   : > { %1735 = vmatpush1.bf16.msra.mxu1 %v4868_v23  ;;  %v4876_v23 = vld [vmem:[%s6768_s5 + $0x54] ss:$8 sps:$4 sm:$0xff]  }
  0x33   : > { %4503 = vmatmul.mubr.msk.bf16.gmra.mrb[16].mxu0 %vm547_vm1, %v469_v46  ;;  %v525_v46 = vpack.c.bf16 %v458_v44, %v457_v43  ;;  %v391_v43 = vld [vmem:[%s4978_s21 + $0x1b0] sm:$0xff]  ;;  %v392_v44 = vld [vmem:[%s4978_s21 + $0x1b8] sm:$0xff] }
  0x34   : > { %829 = vmatprep.mubr.bf16.mxu0 %v4900_v3  ;;  %v492_v48 = vpack.c.bf16 %v392_v44, %v391_v43 }
  0x35   : > { %4551 = vmatmul.mubr.msk.bf16.gmra.mrb[16].mxu1 %vm547_vm1, %v517_v53  ;;  %v367_v53 = vld [vmem:[%s4978_s21 + $0xf0] sm:$0xff] }
  0x36   : > { %1309 = vmatprep.mubr.bf16.mxu1 %v4900_v3  ;;  %v480_v57 = vpack.c.bf16 %v368_v54, %v367_v53 }
  0x3b   : > { %4504 = vmatmul.mubr.msk.bf16.gmra.mrb[20].mxu0 %vm547_vm1, %v470_v52  ;;  %v526_v52 = vpack.c.bf16 %v460_v50, %v459_v49 }
  0x3c   : > { %839 = vmatprep.mubr.bf16.mxu0 %v4900_v3 }
  0x3d   : > { %4552 = vmatmul.mubr.msk.bf16.gmra.mrb[20].mxu1 %vm547_vm1, %v518_v61  ;;  %v463_v61 = vld [vmem:[%s4978_s21 + $0x3f0] sm:$0xff] }
  0x3e   : > { %1319 = vmatprep.mubr.bf16.mxu1 %v4900_v3  ;;  %v528_v0 = vpack.c.bf16 %v464_v62, %v463_v61 }
  0x43   : > { %4505 = vmatmul.mubr.msk.bf16.gmra.mrb[24].mxu0 %vm547_vm1, %v471_v60  ;;  %v370_v60 = vld [vmem:[%s4978_s21 + $0x108] sm:$0xff] }
  0x44   : > { %849 = vmatprep.mubr.bf16.mxu0 %v4900_v3  ;;  %v481_v63 = vpack.c.bf16 %v370_v60, %v369_v59 }
  0x45   : > { %4553 = vmatmul.mubr.msk.bf16.gmra.mrb[24].mxu1 %vm547_vm1, %v519_v4  ;;  %v371_v4 = vld [vmem:[%s4978_s21 + $0x110] sm:$0xff] }
  0x46   : > { %1329 = vmatprep.mubr.bf16.mxu1 %v4900_v3  ;;  %v482_v6 = vpack.c.bf16 %v372_v5, %v371_v4  ;;  %v4879_v4 = vld [vmem:[%s6768_s5 + $0x64] ss:$8 sps:$4 sm:$0xff]  }
  0x4b   : > { %4506 = vmatmul.mubr.msk.bf16.gmra.mrb[28].mxu0 %vm547_vm1, %v472_v2  ;;  %v4873_v2 = vld [vmem:[%s6768_s5 + $0x44] ss:$8 sps:$4 sm:$0xff]  }
  0x4c   : > { %859 = vmatprep.mubr.bf16.mxu0 %v4900_v3  ;;  %2829 = vmatprep.subr.bf16.mxu0 %v4873_v2  ;;  %v4877_v2 = vld [vmem:[%s6768_s5 + $0x60] ss:$8 sps:$4 sm:$0xff]  }
  0x4d   : > { %4554 = vmatmul.mubr.msk.bf16.gmra.mrb[28].mxu1 %vm547_vm1, %v520_v12  ;;  %2830 = vmatpush1.bf16.msra.mxu0 %v4871_v1 }
  0x4e   : > { %1339 = vmatprep.mubr.bf16.mxu1 %v4900_v3  ;;  %2831 = vmatprep.subr.bf16.mxu0 %v4876_v23 }
  0x51   : > { %2832 = vmatpush1.bf16.msra.mxu0 %v4874_v22 }
  0x52   : > { %2833 = vmatprep.subr.bf16.mxu0 %v4879_v4 }
  0x53   : > { %4507 = vmatmul.mubr.msk.bf16.gmra.mrb[32].mxu0 %vm547_vm1, %v473_v11  ;;  %v376_v11 = vld [vmem:[%s4978_s21 + $0x138] sm:$0xff] }
  0x54   : > { %869 = vmatprep.mubr.bf16.mxu0 %v4900_v3  ;;  %v484_v12 = vpack.c.bf16 %v376_v11, %v375_v10 }
  0x55   : > { %4555 = vmatmul.mubr.msk.bf16.gmra.mrb[32].mxu1 %vm547_vm1, %v521_v18  ;;  %2834 = vmatpush1.bf16.msra.mxu0 %v4877_v2 }
  0x56   : > { %1349 = vmatprep.mubr.bf16.mxu1 %v4900_v3 }
  0x5b   : > { %4508 = vmatmul.mubr.msk.bf16.gmra.mrb[36].mxu0 %vm547_vm1, %v474_v17  ;;  %v380_v17 = vld [vmem:[%s4978_s21 + $0x158] sm:$0xff] }
  0x5c   : > { %879 = vmatprep.mubr.bf16.mxu0 %v4900_v3  ;;  %v486_v18 = vpack.c.bf16 %v380_v17, %v379_v16 }
  0x5d   : > { %4556 = vmatmul.mubr.msk.bf16.gmra.mrb[36].mxu1 %vm547_vm1, %v522_v28  ;;  %v386_v28 = vld [vmem:[%s4978_s21 + $0x188] sm:$0xff] }
  0x5e   : > { %1359 = vmatprep.mubr.bf16.mxu1 %v4900_v3 }
  0x63   : > { %4509 = vmatmul.mubr.msk.bf16.gmra.mrb[40].mxu0 %vm547_vm1, %v475_v27  ;;  %v385_v27 = vld [vmem:[%s4978_s21 + $0x180] sm:$0xff] }
  0x64   : > { %889 = vmatprep.mubr.bf16.mxu0 %v4900_v3  ;;  %v489_v29 = vpack.c.bf16 %v386_v28, %v385_v27 }
  0x65   : > { %4557 = vmatmul.mubr.msk.bf16.gmra.mrb[40].mxu1 %vm547_vm1, %v523_v34 }
  0x66   : > { %1369 = vmatprep.mubr.bf16.mxu1 %v4900_v3 }
  0x6b   : > { %4510 = vmatmul.mubr.msk.bf16.gmra.mrb[44].mxu0 %vm547_vm1, %v476_v33  ;;  %v532_v33 = vlaneseq }
  0x6c   : > { %899 = vmatprep.mubr.bf16.mxu0 %v4900_v3 }
  0x6d   : > { %4558 = vmatmul.mubr.msk.bf16.gmra.mrb[44].mxu1 %vm547_vm1, %v524_v40  ;;  %v533_v34 = vshrl.u32 %v532_v33, 7 }
  0x6e   : > { %1379 = vmatprep.mubr.bf16.mxu1 %v4900_v3 }
  0x6f   : > { %v5228_v38 = vsub.s32 0, %v533_v34  ;;  %v5233_v40 = vsub.s32 1, %v533_v34 }
  0x73   : > { %4511 = vmatmul.mubr.msk.bf16.gmra.mrb[48].mxu0 %vm547_vm1, %v477_v39  ;;  %v530_v39 = vld [vmem:[%s6765_s2] sm:$0x3] }
  0x74   : > { %909 = vmatprep.mubr.bf16.mxu0 %v4900_v3  ;;  %v5237_v41 = vrot.slane %v530_v39, %v5228_v38  ;;  %v5240_v42 = vrot.slane %v530_v39, %v5233_v40 }
  0x75   : > { %4559 = vmatmul.mubr.msk.bf16.gmra.mrb[48].mxu1 %vm547_vm1, %v525_v46 }
  0x76   : > { %1389 = vmatprep.mubr.bf16.mxu1 %v4900_v3 }
  0x7b   : > { %4512 = vmatmul.mubr.msk.bf16.gmra.mrb[52].mxu0 %vm547_vm1, %v478_v45 }
  0x7c   : > { %919 = vmatprep.mubr.bf16.mxu0 %v4900_v3 }
  0x7d   : > { %4560 = vmatmul.mubr.msk.bf16.gmra.mrb[52].mxu1 %vm547_vm1, %v526_v52 }
  0x7e   : > { %1399 = vmatprep.mubr.bf16.mxu1 %v4900_v3 }
  0x83   : > { %4513 = vmatmul.mubr.msk.bf16.gmra.mrb[56].mxu0 %vm547_vm1, %v479_v51 }
  0x84   : > { %929 = vmatprep.mubr.bf16.mxu0 %v4900_v3 }
  0x85   : > { %4561 = vmatmul.mubr.msk.bf16.gmra.mrb[56].mxu1 %vm547_vm1, %v527_v58 }
  0x86   : > { %1409 = vmatprep.mubr.bf16.mxu1 %v4900_v3 }
  0x8b   : > { %4514 = vmatmul.mubr.msk.bf16.gmra.mrb[60].mxu0 %vm547_vm1, %v480_v57  ;;  %v394_v57 = vld [vmem:[%s4978_s21 + $0x1c8] sm:$0xff] }
  0x8c   : > { %939 = vmatprep.mubr.bf16.mxu0 %v4900_v3 }
  0x8d   : > { %4562 = vmatmul.mubr.msk.bf16.gmra.mrb[60].mxu1 %vm547_vm1, %v528_v0 }
  0x8e   : > { %1752 = vmatprep.mubr.bf16.mxu1 %v4900_v3 }
  0x93   : > { %4515 = vmatmul.mubr.msk.bf16.gmra.mrb[64].mxu0 %vm547_vm1, %v481_v63  ;;  %v493_v63 = vpack.c.bf16 %v394_v57, %v393_v56 }
  0x94   : > { %949 = vmatprep.mubr.bf16.mxu0 %v4900_v3 }
  0x9b   : > { %4516 = vmatmul.mubr.msk.bf16.gmra.mrb[68].mxu0 %vm547_vm1, %v482_v6 }
  0x9c   : > { %959 = vmatprep.mubr.bf16.mxu0 %v4900_v3 }
  0xa3   : > { %4517 = vmatmul.mubr.msk.bf16.gmra.mrb[72].mxu0 %vm547_vm1, %v483_v9 }
  0xa4   : > { %969 = vmatprep.mubr.bf16.mxu0 %v4900_v3 }
  0xab   : > { %4518 = vmatmul.mubr.msk.bf16.gmra.mrb[76].mxu0 %vm547_vm1, %v484_v12 }
  0xac   : > { %979 = vmatprep.mubr.bf16.mxu0 %v4900_v3 }
  0xb3   : > { %4519 = vmatmul.mubr.msk.bf16.gmra.mrb[80].mxu0 %vm547_vm1, %v485_v15 }
  0xb4   : > { %989 = vmatprep.mubr.bf16.mxu0 %v4900_v3 }
  0xbb   : > { %4520 = vmatmul.mubr.msk.bf16.gmra.mrb[84].mxu0 %vm547_vm1, %v486_v18  ;;  %v395_v18 = vld [vmem:[%s4978_s21 + $0x1d0] sm:$0xff] }
  0xbc   : > { %999 = vmatprep.mubr.bf16.mxu0 %v4900_v3  ;;  %v494_v27 = vpack.c.bf16 %v396_v19, %v395_v18 }
  0xc3   : > { %4521 = vmatmul.mubr.msk.bf16.gmra.mrb[88].mxu0 %vm547_vm1, %v487_v21 }
  0xc4   : > { %1009 = vmatprep.mubr.bf16.mxu0 %v4900_v3 }
  0xcb   : > { %4522 = vmatmul.mubr.msk.bf16.gmra.mrb[92].mxu0 %vm547_vm1, %v488_v26 }
  0xcc   : > { %1019 = vmatprep.mubr.bf16.mxu0 %v4900_v3 }
  0xd3   : > { %4523 = vmatmul.mubr.msk.bf16.gmra.mrb[96].mxu0 %vm547_vm1, %v489_v29 }
  0xd4   : > { %1029 = vmatprep.mubr.bf16.mxu0 %v4900_v3 }
  0xdb   : > { %4524 = vmatmul.mubr.msk.bf16.gmra.mrb[100].mxu0 %vm547_vm1, %v490_v32 }
  0xdc   : > { %1039 = vmatprep.mubr.bf16.mxu0 %v4900_v3 }
  0xe3   : > { %4525 = vmatmul.mubr.msk.bf16.gmra.mrb[104].mxu0 %vm547_vm1, %v491_v37 }
  0xe4   : > { %1049 = vmatprep.mubr.bf16.mxu0 %v4900_v3 }
  0xe6   : > { %v781_v45 = vpop.f32.mrb[0].mxu0 }
  0xe7   : > { %v782_v46 = vadd.f32 %v781_v45, %v5237_v41  ;;  %v783_v47 = vpop.f32.mrb[1].mxu0 }
  0xe8   : > { %v784_v49 = vadd.f32 %v783_v47, %v5240_v42  ;;  %v785_v50 = vpop.f32.mrb[2].mxu0  ;;  %v1261_v60 = vpop.f32.mrb[0].mxu1  ;;  %v397_v47 = vld [vmem:[%s4978_s21 + $0x1e0] sm:$0xff] }
  0xe9   : > { %v786_v51 = vadd.f32 %v785_v50, %v5237_v41  ;;  %v787_v52 = vpop.f32.mrb[3].mxu0  ;;  %v1262_v0 = vadd.f32 %v1261_v60, %v5237_v41  ;;  %v1263_v1 = vpop.f32.mrb[1].mxu1 }
  0xea   : > { %v1420_v53 = vmax.f32 %v782_v46, %v784_v49  ;;  %v788_v54 = vadd.f32 %v787_v52, %v5240_v42  ;;  %v1264_v7 = vadd.f32 %v1263_v1, %v5240_v42  ;;  %v1265_v8 = vpop.f32.mrb[2].mxu1 }
  0xeb   : > { %4526 = vmatmul.mubr.msk.bf16.gmra.mrb[108].mxu0 %vm547_vm1, %v492_v48  ;;  %v1266_v11 = vadd.f32 %v1265_v8, %v5237_v41  ;;  %v1267_v12 = vpop.f32.mrb[3].mxu1  ;;  %v398_v48 = vld [vmem:[%s4978_s21 + $0x1e8] sm:$0xff] }
  0xec   : > { %v1421_v55 = vmax.f32 %v786_v51, %v788_v54  ;;  %1059 = vmatprep.mubr.bf16.mxu0 %v4900_v3  ;;  %v1516_v15 = vmax.f32 %v1262_v0, %v1264_v7  ;;  %v1268_v16 = vadd.f32 %v1267_v12, %v5240_v42  ;;  %v495_v56 = vpack.c.bf16 %v398_v48, %v397_v47 }
  0xee   : > { %v1548_v58 = vpack.c.bf16 %v1421_v55, %v1420_v53  ;;  %v791_v59 = vpop.f32.mrb[4].mxu0  ;;  %v1517_v20 = vmax.f32 %v1266_v11, %v1268_v16 }
  0xef   : > { %v792_v61 = vadd.f32 %v791_v59, %v5237_v41  ;;  %v793_v62 = vpop.f32.mrb[5].mxu0 }
  0xf0   : > { %v794_v5 = vadd.f32 %v793_v62, %v5240_v42  ;;  %v795_v6 = vpop.f32.mrb[6].mxu0  ;;  %1753 = vmatmul.mubr.bf16.vlgmr.msra.gmra.mrb[64].mxu1 %v1548_v58  ;;  %v5272_v23 = vpack.c.bf16 %v1517_v20, %v1516_v15  ;;  %v1271_v24 = vpop.f32.mrb[4].mxu1 }
  0xf1   : > { %v796_v9 = vadd.f32 %v795_v6, %v5237_v41  ;;  %v797_v10 = vpop.f32.mrb[7].mxu0  ;;  %1762 = vmatprep.mubr.bf16.mxu1 %v4900_v3  ;;  %v1272_v28 = vadd.f32 %v1271_v24, %v5237_v41  ;;  %v1273_v29 = vpop.f32.mrb[5].mxu1 }
  0xf2   : > { %v1422_v13 = vmax.f32 %v792_v61, %v794_v5  ;;  %v798_v14 = vadd.f32 %v797_v10, %v5240_v42  ;;  %v1274_v32 = vadd.f32 %v1273_v29, %v5240_v42  ;;  %v1275_v33 = vpop.f32.mrb[6].mxu1  ;;  %v400_v10 = vld [vmem:[%s4978_s21 + $0x1f8] sm:$0xff] }
  0xf3   : > { %4527 = vmatmul.mubr.msk.bf16.gmra.mrb[112].mxu0 %vm547_vm1, %v493_v63  ;;  %v1276_v36 = vadd.f32 %v1275_v33, %v5237_v41  ;;  %v1277_v37 = vpop.f32.mrb[7].mxu1 }
  0xf4   : > { %v1423_v17 = vmax.f32 %v796_v9, %v798_v14  ;;  %1069 = vmatprep.mubr.bf16.mxu0 %v4900_v3  ;;  %v1518_v44 = vmax.f32 %v1272_v28, %v1274_v32  ;;  %v1278_v45 = vadd.f32 %v1277_v37, %v5240_v42  ;;  %v399_v9 = vld [vmem:[%s4978_s21 + $0x1f0] sm:$0xff] }
  0xf5   : > { %v496_v18 = vpack.c.bf16 %v400_v10, %v399_v9 }
  0xf6   : > { %v801_v21 = vpop.f32.mrb[8].mxu0  ;;  %v1549_v22 = vpack.c.bf16 %v1423_v17, %v1422_v13  ;;  %v1519_v49 = vmax.f32 %v1276_v36, %v1278_v45  ;;  %v402_v36 = vld [vmem:[%s4978_s21 + $0x208] sm:$0xff] }
  0xf7   : > { %v802_v25 = vadd.f32 %v801_v21, %v5237_v41  ;;  %v803_v26 = vpop.f32.mrb[9].mxu0 }
  0xf8   : > { %v804_v30 = vadd.f32 %v803_v26, %v5240_v42  ;;  %v805_v31 = vpop.f32.mrb[10].mxu0  ;;  %1763 = vmatmul.mubr.bf16.gmra.mrb[68].mxu1 %v1549_v22  ;;  %v5287_v52 = vpack.c.bf16 %v1519_v49, %v1518_v44  ;;  %v1281_v53 = vpop.f32.mrb[8].mxu1 }
  0xf9   : > { %v806_v34 = vadd.f32 %v805_v31, %v5237_v41  ;;  %v807_v35 = vpop.f32.mrb[11].mxu0  ;;  %1772 = vmatprep.mubr.bf16.mxu1 %v4900_v3  ;;  %v1282_v57 = vadd.f32 %v1281_v53, %v5237_v41  ;;  %v1283_v58 = vpop.f32.mrb[9].mxu1 }
  0xfa   : > { %v1424_v39 = vmax.f32 %v802_v25, %v804_v30  ;;  %v808_v43 = vadd.f32 %v807_v35, %v5240_v42  ;;  %v1284_v61 = vadd.f32 %v1283_v58, %v5240_v42  ;;  %v1285_v62 = vpop.f32.mrb[10].mxu1  ;;  %v401_v35 = vld [vmem:[%s4978_s21 + $0x200] sm:$0xff] }
  0xfb   : > { %4528 = vmatmul.mubr.msk.bf16.gmra.mrb[116].mxu0 %vm547_vm1, %v494_v27  ;;  %v1286_v1 = vadd.f32 %v1285_v62, %v5237_v41  ;;  %v1287_v2 = vpop.f32.mrb[11].mxu1  ;;  %v497_v48 = vpack.c.bf16 %v402_v36, %v401_v35 }
  0xfc   : > { %v1425_v46 = vmax.f32 %v806_v34, %v808_v43  ;;  %1079 = vmatprep.mubr.bf16.mxu0 %v4900_v3  ;;  %v1520_v6 = vmax.f32 %v1282_v57, %v1284_v61  ;;  %v1288_v7 = vadd.f32 %v1287_v2, %v5240_v42  ;;  %v404_v2 = vld [vmem:[%s4978_s21 + $0x218] sm:$0xff] }
  0xfe   : > { %v811_v50 = vpop.f32.mrb[12].mxu0  ;;  %v1550_v51 = vpack.c.bf16 %v1425_v46, %v1424_v39  ;;  %v1521_v11 = vmax.f32 %v1286_v1, %v1288_v7  ;;  %v403_v1 = vld [vmem:[%s4978_s21 + $0x210] sm:$0xff] }
  0xff   : > { %v812_v54 = vadd.f32 %v811_v50, %v5237_v41  ;;  %v813_v55 = vpop.f32.mrb[13].mxu0 }
 0x100   : > { %v814_v59 = vadd.f32 %v813_v55, %v5240_v42  ;;  %v815_v60 = vpop.f32.mrb[14].mxu0  ;;  %1773 = vmatmul.mubr.bf16.gmra.mrb[72].mxu1 %v1550_v51  ;;  %v5302_v14 = vpack.c.bf16 %v1521_v11, %v1520_v6  ;;  %v1291_v15 = vpop.f32.mrb[12].mxu1  ;;  %v498_v11 = vpack.c.bf16 %v404_v2, %v403_v1 }
 0x101   : > { %v816_v63 = vadd.f32 %v815_v60, %v5237_v41  ;;  %v817_v0 = vpop.f32.mrb[15].mxu0  ;;  %1782 = vmatprep.mubr.bf16.mxu1 %v4900_v3  ;;  %v1292_v19 = vadd.f32 %v1291_v15, %v5237_v41  ;;  %v1293_v20 = vpop.f32.mrb[13].mxu1 }
 0x102   : > { %v1426_v4 = vmax.f32 %v812_v54, %v814_v59  ;;  %v818_v5 = vadd.f32 %v817_v0, %v5240_v42  ;;  %v1294_v24 = vadd.f32 %v1293_v20, %v5240_v42  ;;  %v1295_v25 = vpop.f32.mrb[14].mxu1 }
 0x103   : > { %4529 = vmatmul.mubr.msk.bf16.gmra.mrb[120].mxu0 %vm547_vm1, %v495_v56  ;;  %v1296_v28 = vadd.f32 %v1295_v25, %v5237_v41  ;;  %v1297_v29 = vpop.f32.mrb[15].mxu1 }
 0x104   : > { %v1427_v8 = vmax.f32 %v816_v63, %v818_v5  ;;  %1089 = vmatprep.mubr.bf16.mxu0 %v4900_v3  ;;  %v1522_v32 = vmax.f32 %v1292_v19, %v1294_v24  ;;  %v1298_v33 = vadd.f32 %v1297_v29, %v5240_v42  ;;  %v405_v29 = vld [vmem:[%s4978_s21 + $0x220] sm:$0xff] }
 0x106   : > { %v821_v12 = vpop.f32.mrb[16].mxu0  ;;  %v1551_v13 = vpack.c.bf16 %v1427_v8, %v1426_v4  ;;  %v1523_v37 = vmax.f32 %v1296_v28, %v1298_v33 }
 0x107   : > { %v822_v16 = vadd.f32 %v821_v12, %v5237_v41  ;;  %v823_v17 = vpop.f32.mrb[17].mxu0 }
 0x108   : > { %v824_v21 = vadd.f32 %v823_v17, %v5240_v42  ;;  %v825_v22 = vpop.f32.mrb[18].mxu0  ;;  %1783 = vmatmul.mubr.bf16.gmra.mrb[76].mxu1 %v1551_v13  ;;  %v5317_v44 = vpack.c.bf16 %v1523_v37, %v1522_v32  ;;  %v1301_v45 = vpop.f32.mrb[16].mxu1 }
 0x109   : > { %v826_v26 = vadd.f32 %v825_v22, %v5237_v41  ;;  %v827_v27 = vpop.f32.mrb[19].mxu0  ;;  %1792 = vmatprep.mubr.bf16.mxu1 %v4900_v3  ;;  %v1302_v49 = vadd.f32 %v1301_v45, %v5237_v41  ;;  %v1303_v50 = vpop.f32.mrb[17].mxu1 }
 0x10a   : > { %v1428_v30 = vmax.f32 %v822_v16, %v824_v21  ;;  %v828_v31 = vadd.f32 %v827_v27, %v5240_v42  ;;  %v1304_v54 = vadd.f32 %v1303_v50, %v5240_v42  ;;  %v1305_v55 = vpop.f32.mrb[18].mxu1 }
 0x10b   : > { %4530 = vmatmul.mubr.msk.bf16.gmra.mrb[124].mxu0 %vm547_vm1, %v496_v18  ;;  %v1306_v58 = vadd.f32 %v1305_v55, %v5237_v41  ;;  %v1307_v59 = vpop.f32.mrb[19].mxu1 }
 0x10c   : > { %v1429_v34 = vmax.f32 %v826_v26, %v828_v31  ;;  %1099 = vmatprep.mubr.bf16.mxu0 %v4900_v3  ;;  %v1524_v62 = vmax.f32 %v1302_v49, %v1304_v54  ;;  %v1308_v63 = vadd.f32 %v1307_v59, %v5240_v42 }
 0x10e   : > { %v831_v39 = vpop.f32.mrb[20].mxu0  ;;  %v1552_v43 = vpack.c.bf16 %v1429_v34, %v1428_v30  ;;  %v1525_v4 = vmax.f32 %v1306_v58, %v1308_v63  ;;  %v406_v30 = vld [vmem:[%s4978_s21 + $0x228] sm:$0xff]  ;;  %v408_v63 = vld [vmem:[%s4978_s21 + $0x238] sm:$0xff] }
 0x10f   : > { %v832_v46 = vadd.f32 %v831_v39, %v5237_v41  ;;  %v833_v47 = vpop.f32.mrb[21].mxu0  ;;  %v499_v39 = vpack.c.bf16 %v406_v30, %v405_v29  ;;  %v4883_v30 = vld [vmem:[%s6770_s7] sm:$0xff]  }
 0x110   : > { %v834_v51 = vadd.f32 %v833_v47, %v5240_v42  ;;  %v835_v53 = vpop.f32.mrb[22].mxu0  ;;  %1793 = vmatmul.mubr.bf16.gmra.mrb[80].mxu1 %v1552_v43  ;;  %v5332_v7 = vpack.c.bf16 %v1525_v4, %v1524_v62  ;;  %v1311_v8 = vpop.f32.mrb[20].mxu1  ;;  %v4882_v47 = vld [vmem:[%s6768_s5 + $0x74] ss:$8 sps:$4 sm:$0xff]   ;;  %4678 = vmatprep.subr.bf16.mxu1 %v4883_v30 }
 0x111   : > { %v836_v56 = vadd.f32 %v835_v53, %v5237_v41  ;;  %v837_v57 = vpop.f32.mrb[23].mxu0  ;;  %1802 = vmatprep.mubr.bf16.mxu1 %v4900_v3  ;;  %v1312_v12 = vadd.f32 %v1311_v8, %v5237_v41  ;;  %v1313_v13 = vpop.f32.mrb[21].mxu1  ;;  %2835 = vmatprep.subr.bf16.mxu0 %v4882_v47  ;;  %v407_v62 = vld [vmem:[%s4978_s21 + $0x230] sm:$0xff] }
 0x112   : > { %v1430_v60 = vmax.f32 %v832_v46, %v834_v51  ;;  %v838_v61 = vadd.f32 %v837_v57, %v5240_v42  ;;  %v1314_v17 = vadd.f32 %v1313_v13, %v5240_v42  ;;  %v1315_v18 = vpop.f32.mrb[22].mxu1  ;;  %v4880_v46 = vld [vmem:[%s6768_s5 + $0x70] ss:$8 sps:$4 sm:$0xff]   ;;  %4679 = vmatpush3.bf16.msra.mxu1 %v4883_v30 }
 0x113   : > { %4531 = vmatmul.mubr.msk.bf16.gmra.mrb[128].mxu0 %vm547_vm1, %v497_v48  ;;  %v1316_v21 = vadd.f32 %v1315_v18, %v5237_v41  ;;  %v1317_v22 = vpop.f32.mrb[23].mxu1 }
 0x114   : > { %v1431_v0 = vmax.f32 %v836_v56, %v838_v61  ;;  %1109 = vmatprep.mubr.bf16.mxu0 %v4900_v3  ;;  %v1526_v26 = vmax.f32 %v1312_v12, %v1314_v17  ;;  %v1318_v27 = vadd.f32 %v1317_v22, %v5240_v42  ;;  %2836 = vmatpush1.bf16.msra.mxu0 %v4880_v46 }
 0x116   : > { %v841_v5 = vpop.f32.mrb[24].mxu0  ;;  %v1553_v6 = vpack.c.bf16 %v1431_v0, %v1430_v60  ;;  %v1527_v31 = vmax.f32 %v1316_v21, %v1318_v27  ;;  %v409_v27 = vld [vmem:[%s4978_s21 + $0x240] sm:$0xff] }
 0x117   : > { %v842_v9 = vadd.f32 %v841_v5, %v5237_v41  ;;  %v843_v10 = vpop.f32.mrb[25].mxu0 }
 0x118   : > { %v844_v15 = vadd.f32 %v843_v10, %v5240_v42  ;;  %v845_v16 = vpop.f32.mrb[26].mxu0  ;;  %1803 = vmatmul.mubr.bf16.gmra.mrb[84].mxu1 %v1553_v6  ;;  %v5347_v34 = vpack.c.bf16 %v1527_v31, %v1526_v26  ;;  %v1321_v35 = vpop.f32.mrb[24].mxu1 }
 0x119   : > { %v846_v19 = vadd.f32 %v845_v16, %v5237_v41  ;;  %v847_v20 = vpop.f32.mrb[27].mxu0  ;;  %1812 = vmatprep.mubr.bf16.mxu1 %v4900_v3  ;;  %v1322_v43 = vadd.f32 %v1321_v35, %v5237_v41  ;;  %v1323_v45 = vpop.f32.mrb[25].mxu1 }
 0x11a   : > { %v1432_v24 = vmax.f32 %v842_v9, %v844_v15  ;;  %v848_v25 = vadd.f32 %v847_v20, %v5240_v42  ;;  %v1324_v50 = vadd.f32 %v1323_v45, %v5240_v42  ;;  %v1325_v51 = vpop.f32.mrb[26].mxu1  ;;  %v500_v9 = vpack.c.bf16 %v408_v63, %v407_v62 }
 0x11b   : > { %4532 = vmatmul.mubr.msk.bf16.gmra.mrb[132].mxu0 %vm547_vm1, %v498_v11  ;;  %v1326_v55 = vadd.f32 %v1325_v51, %v5237_v41  ;;  %v1327_v56 = vpop.f32.mrb[27].mxu1 }
 0x11c   : > { %v1433_v28 = vmax.f32 %v846_v19, %v848_v25  ;;  %1119 = vmatprep.mubr.bf16.mxu0 %v4900_v3  ;;  %v1528_v59 = vmax.f32 %v1322_v43, %v1324_v50  ;;  %v1328_v60 = vadd.f32 %v1327_v56, %v5240_v42 }
 0x11e   : > { %v851_v32 = vpop.f32.mrb[28].mxu0  ;;  %v1554_v33 = vpack.c.bf16 %v1433_v28, %v1432_v24  ;;  %v1529_v0 = vmax.f32 %v1326_v55, %v1328_v60  ;;  %v410_v28 = vld [vmem:[%s4978_s21 + $0x248] sm:$0xff]  ;;  %v411_v60 = vld [vmem:[%s4978_s21 + $0x250] sm:$0xff] }
 0x11f   : > { %v852_v36 = vadd.f32 %v851_v32, %v5237_v41  ;;  %v853_v37 = vpop.f32.mrb[29].mxu0 }
 0x120   : > { %v854_v48 = vadd.f32 %v853_v37, %v5240_v42  ;;  %v855_v49 = vpop.f32.mrb[30].mxu0  ;;  %1813 = vmatmul.mubr.bf16.gmra.mrb[88].mxu1 %v1554_v33  ;;  %v5368_v4 = vpack.c.bf16 %v1529_v0, %v1528_v59  ;;  %v1331_v5 = vpop.f32.mrb[28].mxu1 }
 0x121   : > { %v856_v53 = vadd.f32 %v855_v49, %v5237_v41  ;;  %v857_v54 = vpop.f32.mrb[31].mxu0  ;;  %1822 = vmatprep.mubr.bf16.mxu1 %v4900_v3  ;;  %v1332_v10 = vadd.f32 %v1331_v5, %v5237_v41  ;;  %v1333_v11 = vpop.f32.mrb[29].mxu1 }
 0x122   : > { %v1434_v57 = vmax.f32 %v852_v36, %v854_v48  ;;  %v858_v58 = vadd.f32 %v857_v54, %v5240_v42  ;;  %v1334_v15 = vadd.f32 %v1333_v11, %v5240_v42  ;;  %v1335_v16 = vpop.f32.mrb[30].mxu1 }
 0x123   : > { %4533 = vmatmul.mubr.msk.bf16.gmra.mrb[136].mxu0 %vm547_vm1, %v499_v39  ;;  %v1336_v19 = vadd.f32 %v1335_v16, %v5237_v41  ;;  %v1337_v20 = vpop.f32.mrb[31].mxu1  ;;  %v501_v39 = vpack.c.bf16 %v410_v28, %v409_v27  ;;  %v414_v27 = vld [vmem:[%s4978_s21 + $0x268] sm:$0xff] }
 0x124   : > { %v1435_v61 = vmax.f32 %v856_v53, %v858_v58  ;;  %1129 = vmatprep.mubr.bf16.mxu0 %v4900_v3  ;;  %v1530_v24 = vmax.f32 %v1332_v10, %v1334_v15  ;;  %v1338_v25 = vadd.f32 %v1337_v20, %v5240_v42 }
 0x126   : > { %v861_v1 = vpop.f32.mrb[32].mxu0  ;;  %v1555_v2 = vpack.c.bf16 %v1435_v61, %v1434_v57  ;;  %v1531_v29 = vmax.f32 %v1336_v19, %v1338_v25  ;;  %v412_v61 = vld [vmem:[%s4978_s21 + $0x258] sm:$0xff] }
 0x127   : > { %v862_v6 = vadd.f32 %v861_v1, %v5237_v41  ;;  %v863_v8 = vpop.f32.mrb[33].mxu0 }
 0x128   : > { %v864_v12 = vadd.f32 %v863_v8, %v5240_v42  ;;  %v865_v13 = vpop.f32.mrb[34].mxu0  ;;  %1823 = vmatmul.mubr.bf16.gmra.mrb[92].mxu1 %v1555_v2  ;;  %v5386_v33 = vpack.c.bf16 %v1531_v29, %v1530_v24  ;;  %v1341_v35 = vpop.f32.mrb[32].mxu1  ;;  %v502_v8 = vpack.c.bf16 %v412_v61, %v411_v60  ;;  %v416_v60 = vld [vmem:[%s4978_s21 + $0x278] sm:$0xff] }
 0x129   : > { %v866_v17 = vadd.f32 %v865_v13, %v5237_v41  ;;  %v867_v18 = vpop.f32.mrb[35].mxu0  ;;  %1832 = vmatprep.mubr.bf16.mxu1 %v4900_v3  ;;  %v1342_v43 = vadd.f32 %v1341_v35, %v5237_v41  ;;  %v1343_v45 = vpop.f32.mrb[33].mxu1 }
 0x12a   : > { %v1436_v21 = vmax.f32 %v862_v6, %v864_v12  ;;  %v868_v22 = vadd.f32 %v867_v18, %v5240_v42  ;;  %v1344_v48 = vadd.f32 %v1343_v45, %v5240_v42  ;;  %v1345_v49 = vpop.f32.mrb[34].mxu1 }
 0x12b   : > { %4534 = vmatmul.mubr.msk.bf16.gmra.mrb[140].mxu0 %vm547_vm1, %v500_v9  ;;  %v1346_v53 = vadd.f32 %v1345_v49, %v5237_v41  ;;  %v1347_v54 = vpop.f32.mrb[35].mxu1 }
 0x12c   : > { %v1437_v26 = vmax.f32 %v866_v17, %v868_v22  ;;  %1139 = vmatprep.mubr.bf16.mxu0 %v4900_v3  ;;  %v1532_v57 = vmax.f32 %v1342_v43, %v1344_v48  ;;  %v1348_v58 = vadd.f32 %v1347_v54, %v5240_v42 }
 0x12e   : > { %v871_v31 = vpop.f32.mrb[36].mxu0  ;;  %v1556_v32 = vpack.c.bf16 %v1437_v26, %v1436_v21  ;;  %v1533_v62 = vmax.f32 %v1346_v53, %v1348_v58  ;;  %v413_v26 = vld [vmem:[%s4978_s21 + $0x260] sm:$0xff] }
 0x12f   : > { %v872_v36 = vadd.f32 %v871_v31, %v5237_v41  ;;  %v873_v37 = vpop.f32.mrb[37].mxu0 }
 0x130   : > { %v874_v46 = vadd.f32 %v873_v37, %v5240_v42  ;;  %v875_v47 = vpop.f32.mrb[38].mxu0  ;;  %1833 = vmatmul.mubr.bf16.gmra.mrb[96].mxu1 %v1556_v32  ;;  %v5401_v1 = vpack.c.bf16 %v1533_v62, %v1532_v57  ;;  %v1351_v2 = vpop.f32.mrb[36].mxu1  ;;  %v503_v37 = vpack.c.bf16 %v414_v27, %v413_v26  ;;  %v417_v26 = vld [vmem:[%s4978_s21 + $0x280] sm:$0xff]  ;;  %v418_v27 = vld [vmem:[%s4978_s21 + $0x288] sm:$0xff] }
 0x131   : > { %v876_v50 = vadd.f32 %v875_v47, %v5237_v41  ;;  %v877_v51 = vpop.f32.mrb[39].mxu0  ;;  %1842 = vmatprep.mubr.bf16.mxu1 %v4900_v3  ;;  %v1352_v9 = vadd.f32 %v1351_v2, %v5237_v41  ;;  %v1353_v10 = vpop.f32.mrb[37].mxu1 }
 0x132   : > { %v1438_v55 = vmax.f32 %v872_v36, %v874_v46  ;;  %v878_v56 = vadd.f32 %v877_v51, %v5240_v42  ;;  %v1354_v13 = vadd.f32 %v1353_v10, %v5240_v42  ;;  %v1355_v15 = vpop.f32.mrb[38].mxu1 }
 0x133   : > { %4535 = vmatmul.mubr.msk.bf16.gmra.mrb[144].mxu0 %vm547_vm1, %v501_v39  ;;  %v1356_v18 = vadd.f32 %v1355_v15, %v5237_v41  ;;  %v1357_v19 = vpop.f32.mrb[39].mxu1 }
 0x134   : > { %v1439_v59 = vmax.f32 %v876_v50, %v878_v56  ;;  %1149 = vmatprep.mubr.bf16.mxu0 %v4900_v3  ;;  %v1534_v22 = vmax.f32 %v1352_v9, %v1354_v13  ;;  %v1358_v24 = vadd.f32 %v1357_v19, %v5240_v42 }
 0x136   : > { %v881_v63 = vpop.f32.mrb[40].mxu0  ;;  %v1557_v0 = vpack.c.bf16 %v1439_v59, %v1438_v55  ;;  %v1535_v28 = vmax.f32 %v1356_v18, %v1358_v24  ;;  %v415_v59 = vld [vmem:[%s4978_s21 + $0x270] sm:$0xff] }
 0x137   : > { %v882_v5 = vadd.f32 %v881_v63, %v5237_v41  ;;  %v883_v6 = vpop.f32.mrb[41].mxu0 }
 0x138   : > { %v884_v11 = vadd.f32 %v883_v6, %v5240_v42  ;;  %v885_v12 = vpop.f32.mrb[42].mxu0  ;;  %1843 = vmatmul.mubr.bf16.gmra.mrb[100].mxu1 %v1557_v0  ;;  %v5416_v31 = vpack.c.bf16 %v1535_v28, %v1534_v22  ;;  %v1361_v32 = vpop.f32.mrb[40].mxu1 }
 0x139   : > { %v886_v16 = vadd.f32 %v885_v12, %v5237_v41  ;;  %v887_v17 = vpop.f32.mrb[43].mxu0  ;;  %1852 = vmatprep.mubr.bf16.mxu1 %v4900_v3  ;;  %v1362_v39 = vadd.f32 %v1361_v32, %v5237_v41  ;;  %v1363_v43 = vpop.f32.mrb[41].mxu1 }
 0x13a   : > { %v1440_v20 = vmax.f32 %v882_v5, %v884_v11  ;;  %v888_v21 = vadd.f32 %v887_v17, %v5240_v42  ;;  %v1364_v47 = vadd.f32 %v1363_v43, %v5240_v42  ;;  %v1365_v48 = vpop.f32.mrb[42].mxu1 }
 0x13b   : > { %4536 = vmatmul.mubr.msk.bf16.gmra.mrb[148].mxu0 %vm547_vm1, %v502_v8  ;;  %v1366_v51 = vadd.f32 %v1365_v48, %v5237_v41  ;;  %v1367_v53 = vpop.f32.mrb[43].mxu1  ;;  %v504_v8 = vpack.c.bf16 %v416_v60, %v415_v59  ;;  %v419_v60 = vld [vmem:[%s4978_s21 + $0x290] sm:$0xff] }
 0x13c   : > { %v1441_v25 = vmax.f32 %v886_v16, %v888_v21  ;;  %1159 = vmatprep.mubr.bf16.mxu0 %v4900_v3  ;;  %v1536_v56 = vmax.f32 %v1362_v39, %v1364_v47  ;;  %v1368_v57 = vadd.f32 %v1367_v53, %v5240_v42  ;;  %v505_v39 = vpack.c.bf16 %v418_v27, %v417_v26 }
 0x13e   : > { %v891_v29 = vpop.f32.mrb[44].mxu0  ;;  %v1558_v30 = vpack.c.bf16 %v1441_v25, %v1440_v20  ;;  %v1537_v61 = vmax.f32 %v1366_v51, %v1368_v57 }
 0x13f   : > { %v892_v35 = vadd.f32 %v891_v29, %v5237_v41  ;;  %v893_v36 = vpop.f32.mrb[45].mxu0 }
 0x140   : > { %v894_v45 = vadd.f32 %v893_v36, %v5240_v42  ;;  %v895_v46 = vpop.f32.mrb[46].mxu0  ;;  %1853 = vmatmul.mubr.bf16.gmra.mrb[104].mxu1 %v1558_v30  ;;  %v5431_v0 = vpack.c.bf16 %v1537_v61, %v1536_v56  ;;  %v1371_v2 = vpop.f32.mrb[44].mxu1  ;;  %v420_v61 = vld [vmem:[%s4978_s21 + $0x298] sm:$0xff] }
 0x141   : > { %v896_v49 = vadd.f32 %v895_v46, %v5237_v41  ;;  %v897_v50 = vpop.f32.mrb[47].mxu0  ;;  %1862 = vmatprep.mubr.bf16.mxu1 %v4900_v3  ;;  %v1372_v9 = vadd.f32 %v1371_v2, %v5237_v41  ;;  %v1373_v10 = vpop.f32.mrb[45].mxu1 }
 0x142   : > { %v1442_v54 = vmax.f32 %v892_v35, %v894_v45  ;;  %v898_v55 = vadd.f32 %v897_v50, %v5240_v42  ;;  %v1374_v13 = vadd.f32 %v1373_v10, %v5240_v42  ;;  %v1375_v15 = vpop.f32.mrb[46].mxu1  ;;  %v506_v10 = vpack.c.bf16 %v420_v61, %v419_v60 }
 0x143   : > { %4537 = vmatmul.mubr.msk.bf16.gmra.mrb[152].mxu0 %vm547_vm1, %v503_v37  ;;  %v1376_v18 = vadd.f32 %v1375_v15, %v5237_v41  ;;  %v1377_v19 = vpop.f32.mrb[47].mxu1 }
 0x144   : > { %v1443_v58 = vmax.f32 %v896_v49, %v898_v55  ;;  %1169 = vmatprep.mubr.bf16.mxu0 %v4900_v3  ;;  %v1538_v22 = vmax.f32 %v1372_v9, %v1374_v13  ;;  %v1378_v24 = vadd.f32 %v1377_v19, %v5240_v42 }
 0x146   : > { %v901_v62 = vpop.f32.mrb[48].mxu0  ;;  %v1559_v63 = vpack.c.bf16 %v1443_v58, %v1442_v54  ;;  %v1539_v28 = vmax.f32 %v1376_v18, %v1378_v24 }
 0x147   : > { %v902_v5 = vadd.f32 %v901_v62, %v5237_v41  ;;  %v903_v6 = vpop.f32.mrb[49].mxu0 }
 0x148   : > { %v904_v11 = vadd.f32 %v903_v6, %v5240_v42  ;;  %v905_v12 = vpop.f32.mrb[50].mxu0  ;;  %1863 = vmatmul.mubr.bf16.gmra.mrb[108].mxu1 %v1559_v63  ;;  %v5446_v32 = vpack.c.bf16 %v1539_v28, %v1538_v22  ;;  %v1381_v35 = vpop.f32.mrb[48].mxu1  ;;  %v421_v28 = vld [vmem:[%s4978_s21 + $0x2a0] sm:$0xff] }
 0x149   : > { %v906_v16 = vadd.f32 %v905_v12, %v5237_v41  ;;  %v907_v17 = vpop.f32.mrb[51].mxu0  ;;  %1872 = vmatprep.mubr.bf16.mxu1 %v4900_v3  ;;  %v1382_v43 = vadd.f32 %v1381_v35, %v5237_v41  ;;  %v1383_v45 = vpop.f32.mrb[49].mxu1 }
 0x14a   : > { %v1444_v20 = vmax.f32 %v902_v5, %v904_v11  ;;  %v908_v21 = vadd.f32 %v907_v17, %v5240_v42  ;;  %v1384_v48 = vadd.f32 %v1383_v45, %v5240_v42  ;;  %v1385_v49 = vpop.f32.mrb[50].mxu1 }
 0x14b   : > { %4538 = vmatmul.mubr.msk.bf16.gmra.mrb[156].mxu0 %vm547_vm1, %v504_v8  ;;  %v1386_v53 = vadd.f32 %v1385_v49, %v5237_v41  ;;  %v1387_v54 = vpop.f32.mrb[51].mxu1 }
 0x14c   : > { %v1445_v25 = vmax.f32 %v906_v16, %v908_v21  ;;  %1179 = vmatprep.mubr.bf16.mxu0 %v4900_v3  ;;  %v1540_v57 = vmax.f32 %v1382_v43, %v1384_v48  ;;  %v1388_v58 = vadd.f32 %v1387_v54, %v5240_v42 }
 0x14e   : > { %v911_v29 = vpop.f32.mrb[52].mxu0  ;;  %v1560_v30 = vpack.c.bf16 %v1445_v25, %v1444_v20  ;;  %v1541_v62 = vmax.f32 %v1386_v53, %v1388_v58 }
 0x14f   : > { %v912_v36 = vadd.f32 %v911_v29, %v5237_v41  ;;  %v913_v37 = vpop.f32.mrb[53].mxu0  ;;  %v422_v29 = vld [vmem:[%s4978_s21 + $0x2a8] sm:$0xff] }
 0x150   : > { %v914_v46 = vadd.f32 %v913_v37, %v5240_v42  ;;  %v915_v47 = vpop.f32.mrb[54].mxu0  ;;  %1873 = vmatmul.mubr.bf16.gmra.mrb[112].mxu1 %v1560_v30  ;;  %v5461_v5 = vpack.c.bf16 %v1541_v62, %v1540_v57  ;;  %v1391_v6 = vpop.f32.mrb[52].mxu1 }
 0x151   : > { %v916_v50 = vadd.f32 %v915_v47, %v5237_v41  ;;  %v917_v51 = vpop.f32.mrb[55].mxu0  ;;  %1882 = vmatprep.mubr.bf16.mxu1 %v4900_v3  ;;  %v1392_v11 = vadd.f32 %v1391_v6, %v5237_v41  ;;  %v1393_v12 = vpop.f32.mrb[53].mxu1 }
 0x152   : > { %v1446_v55 = vmax.f32 %v912_v36, %v914_v46  ;;  %v918_v56 = vadd.f32 %v917_v51, %v5240_v42  ;;  %v1394_v16 = vadd.f32 %v1393_v12, %v5240_v42  ;;  %v1395_v17 = vpop.f32.mrb[54].mxu1  ;;  %v507_v46 = vpack.c.bf16 %v422_v29, %v421_v28 }
 0x153   : > { %4539 = vmatmul.mubr.msk.bf16.gmra.mrb[160].mxu0 %vm547_vm1, %v505_v39  ;;  %v1396_v20 = vadd.f32 %v1395_v17, %v5237_v41  ;;  %v1397_v21 = vpop.f32.mrb[55].mxu1 }
 0x154   : > { %v1447_v59 = vmax.f32 %v916_v50, %v918_v56  ;;  %1189 = vmatprep.mubr.bf16.mxu0 %v4900_v3  ;;  %v1542_v25 = vmax.f32 %v1392_v11, %v1394_v16  ;;  %v1398_v26 = vadd.f32 %v1397_v21, %v5240_v42 }
 0x156   : > { %v921_v63 = vpop.f32.mrb[56].mxu0  ;;  %v1561_v2 = vpack.c.bf16 %v1447_v59, %v1446_v55  ;;  %v1543_v30 = vmax.f32 %v1396_v20, %v1398_v26 }
 0x157   : > { %v922_v8 = vadd.f32 %v921_v63, %v5237_v41  ;;  %v923_v9 = vpop.f32.mrb[57].mxu0  ;;  %v423_v63 = vld [vmem:[%s4978_s21 + $0x2b0] sm:$0xff] }
 0x158   : > { %v924_v13 = vadd.f32 %v923_v9, %v5240_v42  ;;  %v925_v15 = vpop.f32.mrb[58].mxu0  ;;  %1883 = vmatmul.mubr.bf16.gmra.mrb[116].mxu1 %v1561_v2  ;;  %v5476_v37 = vpack.c.bf16 %v1543_v30, %v1542_v25  ;;  %v1401_v39 = vpop.f32.mrb[56].mxu1  ;;  %v424_v2 = vld [vmem:[%s4978_s21 + $0x2b8] sm:$0xff] }
 0x159   : > { %v926_v18 = vadd.f32 %v925_v15, %v5237_v41  ;;  %v927_v19 = vpop.f32.mrb[59].mxu0  ;;  %1892 = vmatprep.mubr.bf16.mxu1 %v4900_v3  ;;  %v1402_v47 = vadd.f32 %v1401_v39, %v5237_v41  ;;  %v1403_v48 = vpop.f32.mrb[57].mxu1  ;;  %v508_v15 = vpack.c.bf16 %v424_v2, %v423_v63  ;;  %v426_v39 = vld [vmem:[%s4978_s21 + $0x2c8] sm:$0xff] }
 0x15a   : > { %v1448_v22 = vmax.f32 %v922_v8, %v924_v13  ;;  %v928_v24 = vadd.f32 %v927_v19, %v5240_v42  ;;  %v1404_v51 = vadd.f32 %v1403_v48, %v5240_v42  ;;  %v1405_v53 = vpop.f32.mrb[58].mxu1 }
 0x15b   : > { %4540 = vmatmul.mubr.msk.bf16.gmra.mrb[164].mxu0 %vm547_vm1, %v506_v10  ;;  %v1406_v56 = vadd.f32 %v1405_v53, %v5237_v41  ;;  %v1407_v57 = vpop.f32.mrb[59].mxu1 }
 0x15c   : > { %v1449_v27 = vmax.f32 %v926_v18, %v928_v24  ;;  %1199 = vmatprep.mubr.bf16.mxu0 %v4900_v3  ;;  %v1544_v60 = vmax.f32 %v1402_v47, %v1404_v51  ;;  %v1408_v61 = vadd.f32 %v1407_v57, %v5240_v42 }
 0x15e   : > { %v931_v35 = vpop.f32.mrb[60].mxu0  ;;  %v1562_v36 = vpack.c.bf16 %v1449_v27, %v1448_v22  ;;  %v1545_v6 = vmax.f32 %v1406_v56, %v1408_v61  ;;  %v428_v61 = vld [vmem:[%s4978_s21 + $0x2d8] sm:$0xff] }
 0x15f   : > { %v932_v43 = vadd.f32 %v931_v35, %v5237_v41  ;;  %v933_v45 = vpop.f32.mrb[61].mxu0 }
 0x160   : > { %v934_v49 = vadd.f32 %v933_v45, %v5240_v42  ;;  %v935_v50 = vpop.f32.mrb[62].mxu0  ;;  %1893 = vmatmul.mubr.bf16.gmra.mrb[120].mxu1 %v1562_v36  ;;  %v5491_v10 = vpack.c.bf16 %v1545_v6, %v1544_v60  ;;  %v1411_v11 = vpop.f32.mrb[60].mxu1  ;;  %v425_v36 = vld [vmem:[%s4978_s21 + $0x2c0] sm:$0xff]  ;;  %v4884_v45 = vld [vmem:[%s6770_s7 + $0x8] sm:$0xff]   ;;  %v427_v60 = vld [vmem:[%s4978_s21 + $0x2d0] sm:$0xff] }
 0x161   : > { %v936_v54 = vadd.f32 %v935_v50, %v5237_v41  ;;  %v937_v55 = vpop.f32.mrb[63].mxu0  ;;  %1902 = vmatprep.mubr.bf16.mxu1 %v4900_v3  ;;  %v1412_v16 = vadd.f32 %v1411_v11, %v5237_v41  ;;  %v1413_v17 = vpop.f32.mrb[61].mxu1  ;;  %4680 = vmatprep.subr.bf16.mxu1 %v4884_v45  ;;  %v509_v51 = vpack.c.bf16 %v426_v39, %v425_v36  ;;  %v431_v39 = vld [vmem:[%s4978_s21 + $0x2f0] sm:$0xff] }
 0x162   : > { %v1450_v58 = vmax.f32 %v932_v43, %v934_v49  ;;  %v938_v59 = vadd.f32 %v937_v55, %v5240_v42  ;;  %v1414_v20 = vadd.f32 %v1413_v17, %v5240_v42  ;;  %v1415_v21 = vpop.f32.mrb[62].mxu1  ;;  %4681 = vmatpush3.bf16.msra.mxu1 %v4884_v45 }
 0x163   : > { %4541 = vmatmul.mubr.msk.bf16.gmra.mrb[168].mxu0 %vm547_vm1, %v507_v46  ;;  %v1416_v25 = vadd.f32 %v1415_v21, %v5237_v41  ;;  %v1417_v26 = vpop.f32.mrb[63].mxu1 }
 0x164   : > { %v1451_v62 = vmax.f32 %v936_v54, %v938_v59  ;;  %1209 = vmatprep.mubr.bf16.mxu0 %v4900_v3  ;;  %v1546_v29 = vmax.f32 %v1412_v16, %v1414_v20  ;;  %v1418_v30 = vadd.f32 %v1417_v26, %v5240_v42 }
 0x166   : > { %v941_v8 = vpop.f32.mrb[64].mxu0  ;;  %v1563_v9 = vpack.c.bf16 %v1451_v62, %v1450_v58  ;;  %v1547_v43 = vmax.f32 %v1416_v25, %v1418_v30 }
 0x167   : > { %v942_v12 = vadd.f32 %v941_v8, %v5237_v41  ;;  %v943_v13 = vpop.f32.mrb[65].mxu0  ;;  %v510_v8 = vpack.c.bf16 %v428_v61, %v427_v60 }
 0x168   : > { %v944_v18 = vadd.f32 %v943_v13, %v5240_v42  ;;  %v945_v19 = vpop.f32.mrb[66].mxu0  ;;  %1903 = vmatmul.mubr.bf16.gmra.mrb[124].mxu1 %v1563_v9  ;;  %v5509_v48 = vpack.c.bf16 %v1547_v43, %v1546_v29  ;;  %v432_v43 = vld [vmem:[%s4978_s21 + $0x2f8] sm:$0xff] }
 0x169   : > { %v946_v22 = vadd.f32 %v945_v19, %v5237_v41  ;;  %v947_v24 = vpop.f32.mrb[67].mxu0  ;;  %1912 = vmatprep.mubr.bf16.mxu1 %v4900_v3  ;;  %v430_v19 = vld [vmem:[%s4978_s21 + $0x2e8] sm:$0xff] }
 0x16a   : > { %v1452_v27 = vmax.f32 %v942_v12, %v944_v18  ;;  %v948_v28 = vadd.f32 %v947_v24, %v5240_v42  ;;  %v429_v18 = vld [vmem:[%s4978_s21 + $0x2e0] sm:$0xff] }
 0x16b   : > { %4542 = vmatmul.mubr.msk.bf16.gmra.mrb[172].mxu0 %vm547_vm1, %v508_v15  ;;  %v511_v25 = vpack.c.bf16 %v430_v19, %v429_v18 }
 0x16c   : > { %v1453_v35 = vmax.f32 %v946_v22, %v948_v28  ;;  %1219 = vmatprep.mubr.bf16.mxu0 %v4900_v3 }
 0x16e   : > { %v951_v46 = vpop.f32.mrb[68].mxu0  ;;  %v1564_v47 = vpack.c.bf16 %v1453_v35, %v1452_v27 }
 0x16f   : > { %v952_v49 = vadd.f32 %v951_v46, %v5237_v41  ;;  %v953_v50 = vpop.f32.mrb[69].mxu0 }
 0x170   : > { %v954_v53 = vadd.f32 %v953_v50, %v5240_v42  ;;  %v955_v54 = vpop.f32.mrb[70].mxu0  ;;  %1913 = vmatmul.mubr.bf16.gmra.mrb[128].mxu1 %v1564_v47  ;;  %v512_v50 = vpack.c.bf16 %v432_v43, %v431_v39 }
 0x171   : > { %v956_v55 = vadd.f32 %v955_v54, %v5237_v41  ;;  %v957_v56 = vpop.f32.mrb[71].mxu0  ;;  %1922 = vmatprep.mubr.bf16.mxu1 %v4900_v3 }
 0x172   : > { %v1454_v57 = vmax.f32 %v952_v49, %v954_v53  ;;  %v958_v58 = vadd.f32 %v957_v56, %v5240_v42 }
 0x173   : > { %4543 = vmatmul.mubr.msk.bf16.gmra.mrb[176].mxu0 %vm547_vm1, %v509_v51 }
 0x174   : > { %v1455_v59 = vmax.f32 %v956_v55, %v958_v58  ;;  %1229 = vmatprep.mubr.bf16.mxu0 %v4900_v3 }
 0x176   : > { %v961_v62 = vpop.f32.mrb[72].mxu0  ;;  %v1565_v63 = vpack.c.bf16 %v1455_v59, %v1454_v57 }
 0x177   : > { %v962_v2 = vadd.f32 %v961_v62, %v5237_v41  ;;  %v963_v6 = vpop.f32.mrb[73].mxu0 }
 0x178   : > { %v964_v9 = vadd.f32 %v963_v6, %v5240_v42  ;;  %v965_v11 = vpop.f32.mrb[74].mxu0  ;;  %1923 = vmatmul.mubr.bf16.gmra.mrb[132].mxu1 %v1565_v63 }
 0x179   : > { %v966_v12 = vadd.f32 %v965_v11, %v5237_v41  ;;  %v967_v13 = vpop.f32.mrb[75].mxu0  ;;  %1932 = vmatprep.mubr.bf16.mxu1 %v4900_v3 }
 0x17a   : > { %v1456_v15 = vmax.f32 %v962_v2, %v964_v9  ;;  %v968_v16 = vadd.f32 %v967_v13, %v5240_v42 }
 0x17b   : > { %4544 = vmatmul.mubr.msk.bf16.gmra.mrb[180].mxu0 %vm547_vm1, %v510_v8 }
 0x17c   : > { %v1457_v17 = vmax.f32 %v966_v12, %v968_v16  ;;  %1239 = vmatprep.mubr.bf16.mxu0 %v4900_v3 }
 0x17e   : > { %v971_v20 = vpop.f32.mrb[76].mxu0  ;;  %v1566_v21 = vpack.c.bf16 %v1457_v17, %v1456_v15 }
 0x17f   : > { %v972_v22 = vadd.f32 %v971_v20, %v5237_v41  ;;  %v973_v24 = vpop.f32.mrb[77].mxu0 }
 0x180   : > { %v974_v26 = vadd.f32 %v973_v24, %v5240_v42  ;;  %v975_v27 = vpop.f32.mrb[78].mxu0  ;;  %1933 = vmatmul.mubr.bf16.gmra.mrb[136].mxu1 %v1566_v21 }
 0x181   : > { %v976_v28 = vadd.f32 %v975_v27, %v5237_v41  ;;  %v977_v29 = vpop.f32.mrb[79].mxu0  ;;  %1942 = vmatprep.mubr.bf16.mxu1 %v4900_v3 }
 0x182   : > { %v1458_v30 = vmax.f32 %v972_v22, %v974_v26  ;;  %v978_v35 = vadd.f32 %v977_v29, %v5240_v42 }
 0x183   : > { %4545 = vmatmul.mubr.msk.bf16.gmra.mrb[184].mxu0 %vm547_vm1, %v511_v25 }
 0x184   : > { %v1459_v36 = vmax.f32 %v976_v28, %v978_v35  ;;  %1249 = vmatprep.mubr.bf16.mxu0 %v4900_v3 }
 0x186   : > { %v981_v45 = vpop.f32.mrb[80].mxu0  ;;  %v1567_v46 = vpack.c.bf16 %v1459_v36, %v1458_v30 }
 0x187   : > { %v982_v47 = vadd.f32 %v981_v45, %v5237_v41  ;;  %v983_v49 = vpop.f32.mrb[81].mxu0 }
 0x188   : > { %v984_v51 = vadd.f32 %v983_v49, %v5240_v42  ;;  %v985_v53 = vpop.f32.mrb[82].mxu0  ;;  %1943 = vmatmul.mubr.bf16.gmra.mrb[140].mxu1 %v1567_v46 }
 0x189   : > { %v986_v54 = vadd.f32 %v985_v53, %v5237_v41  ;;  %v987_v55 = vpop.f32.mrb[83].mxu0  ;;  %1952 = vmatprep.mubr.bf16.mxu1 %v4900_v3 }
 0x18a   : > { %v1460_v56 = vmax.f32 %v982_v47, %v984_v51  ;;  %v988_v57 = vadd.f32 %v987_v55, %v5240_v42 }
 0x18b   : > { %4546 = vmatmul.mubr.msk.bf16.gmra.mrb[188].mxu0 %vm547_vm1, %v512_v50 }
 0x18c   : > { %v1461_v58 = vmax.f32 %v986_v54, %v988_v57  ;;  %2853 = vmatprep.mubr.bf16.mxu0 %v4900_v3 }
 0x18e   : > { %v991_v59 = vpop.f32.mrb[84].mxu0  ;;  %v1568_v60 = vpack.c.bf16 %v1461_v58, %v1460_v56 }
 0x18f   : > { %v992_v61 = vadd.f32 %v991_v59, %v5237_v41  ;;  %v993_v62 = vpop.f32.mrb[85].mxu0 }
 0x190   : > { %v994_v63 = vadd.f32 %v993_v62, %v5240_v42  ;;  %v995_v2 = vpop.f32.mrb[86].mxu0  ;;  %1953 = vmatmul.mubr.bf16.gmra.mrb[144].mxu1 %v1568_v60  ;;  %v4885_v60 = vld [vmem:[%s6770_s7 + $0x10] sm:$0xff]  }
 0x191   : > { %v996_v6 = vadd.f32 %v995_v2, %v5237_v41  ;;  %v997_v8 = vpop.f32.mrb[87].mxu0  ;;  %1962 = vmatprep.mubr.bf16.mxu1 %v4900_v3  ;;  %4682 = vmatprep.subr.bf16.mxu1 %v4885_v60 }
 0x192   : > { %v1462_v9 = vmax.f32 %v992_v61, %v994_v63  ;;  %v998_v11 = vadd.f32 %v997_v8, %v5240_v42  ;;  %4683 = vmatpush3.bf16.msra.mxu1 %v4885_v60 }
 0x194   : > { %v1463_v12 = vmax.f32 %v996_v6, %v998_v11 }
 0x196   : > { %v1001_v13 = vpop.f32.mrb[88].mxu0  ;;  %v1569_v15 = vpack.c.bf16 %v1463_v12, %v1462_v9 }
 0x197   : > { %v1002_v16 = vadd.f32 %v1001_v13, %v5237_v41  ;;  %v1003_v17 = vpop.f32.mrb[89].mxu0 }
 0x198   : > { %v1004_v18 = vadd.f32 %v1003_v17, %v5240_v42  ;;  %v1005_v19 = vpop.f32.mrb[90].mxu0  ;;  %1963 = vmatmul.mubr.bf16.gmra.mrb[148].mxu1 %v1569_v15 }
 0x199   : > { %v1006_v20 = vadd.f32 %v1005_v19, %v5237_v41  ;;  %v1007_v21 = vpop.f32.mrb[91].mxu0  ;;  %1972 = vmatprep.mubr.bf16.mxu1 %v4900_v3 }
 0x19a   : > { %v1464_v22 = vmax.f32 %v1002_v16, %v1004_v18  ;;  %v1008_v24 = vadd.f32 %v1007_v21, %v5240_v42 }
 0x19c   : > { %v1465_v25 = vmax.f32 %v1006_v20, %v1008_v24 }
 0x19e   : > { %v1011_v26 = vpop.f32.mrb[92].mxu0  ;;  %v1570_v27 = vpack.c.bf16 %v1465_v25, %v1464_v22 }
 0x19f   : > { %v1012_v28 = vadd.f32 %v1011_v26, %v5237_v41  ;;  %v1013_v29 = vpop.f32.mrb[93].mxu0 }
 0x1a0   : > { %v1014_v30 = vadd.f32 %v1013_v29, %v5240_v42  ;;  %v1015_v35 = vpop.f32.mrb[94].mxu0  ;;  %1973 = vmatmul.mubr.bf16.gmra.mrb[152].mxu1 %v1570_v27 }
 0x1a1   : > { %v1016_v36 = vadd.f32 %v1015_v35, %v5237_v41  ;;  %v1017_v39 = vpop.f32.mrb[95].mxu0  ;;  %1982 = vmatprep.mubr.bf16.mxu1 %v4900_v3 }
 0x1a2   : > { %v1466_v43 = vmax.f32 %v1012_v28, %v1014_v30  ;;  %v1018_v45 = vadd.f32 %v1017_v39, %v5240_v42  ;;  %v1628_v28 = vld [vmem:[%s6767_s4] sm:$0x3] }
 0x1a4   : > { %v1467_v46 = vmax.f32 %v1016_v36, %v1018_v45  ;;  %v5584_v45 = vrot.slane %v1628_v28, %v5228_v38 }
 0x1a6   : > { %v1021_v47 = vpop.f32.mrb[96].mxu0  ;;  %v1571_v49 = vpack.c.bf16 %v1467_v46, %v1466_v43 }
 0x1a7   : > { %v1022_v50 = vadd.f32 %v1021_v47, %v5237_v41  ;;  %v1023_v51 = vpop.f32.mrb[97].mxu0 }
 0x1a8   : > { %v1024_v53 = vadd.f32 %v1023_v51, %v5240_v42  ;;  %v1025_v54 = vpop.f32.mrb[98].mxu0  ;;  %1983 = vmatmul.mubr.bf16.gmra.mrb[156].mxu1 %v1571_v49  ;;  %v5588_v49 = vrot.slane %v1628_v28, %v5233_v40 }
 0x1a9   : > { %v1026_v55 = vadd.f32 %v1025_v54, %v5237_v41  ;;  %v1027_v56 = vpop.f32.mrb[99].mxu0  ;;  %1992 = vmatprep.mubr.bf16.mxu1 %v4900_v3 }
 0x1aa   : > { %v1468_v57 = vmax.f32 %v1022_v50, %v1024_v53  ;;  %v1028_v58 = vadd.f32 %v1027_v56, %v5240_v42 }
 0x1ac   : > { %v1469_v59 = vmax.f32 %v1026_v55, %v1028_v58 }
 0x1ae   : > { %v1031_v61 = vpop.f32.mrb[100].mxu0  ;;  %v1572_v62 = vpack.c.bf16 %v1469_v59, %v1468_v57 }
 0x1af   : > { %v1032_v63 = vadd.f32 %v1031_v61, %v5237_v41  ;;  %v1033_v2 = vpop.f32.mrb[101].mxu0 }
 0x1b0   : > { %v1034_v6 = vadd.f32 %v1033_v2, %v5240_v42  ;;  %v1035_v8 = vpop.f32.mrb[102].mxu0  ;;  %1993 = vmatmul.mubr.bf16.gmra.mrb[160].mxu1 %v1572_v62 }
 0x1b1   : > { %v1036_v9 = vadd.f32 %v1035_v8, %v5237_v41  ;;  %v1037_v11 = vpop.f32.mrb[103].mxu0  ;;  %2002 = vmatprep.mubr.bf16.mxu1 %v4900_v3 }
 0x1b2   : > { %v1470_v12 = vmax.f32 %v1032_v63, %v1034_v6  ;;  %v1038_v13 = vadd.f32 %v1037_v11, %v5240_v42 }
 0x1b4   : > { %v1471_v15 = vmax.f32 %v1036_v9, %v1038_v13 }
 0x1b6   : > { %v1041_v16 = vpop.f32.mrb[104].mxu0  ;;  %v1573_v17 = vpack.c.bf16 %v1471_v15, %v1470_v12 }
 0x1b7   : > { %v1042_v18 = vadd.f32 %v1041_v16, %v5237_v41  ;;  %v1043_v19 = vpop.f32.mrb[105].mxu0 }
 0x1b8   : > { %v1044_v20 = vadd.f32 %v1043_v19, %v5240_v42  ;;  %v1045_v21 = vpop.f32.mrb[106].mxu0  ;;  %2003 = vmatmul.mubr.bf16.gmra.mrb[164].mxu1 %v1573_v17 }
 0x1b9   : > { %v1046_v22 = vadd.f32 %v1045_v21, %v5237_v41  ;;  %v1047_v24 = vpop.f32.mrb[107].mxu0  ;;  %2012 = vmatprep.mubr.bf16.mxu1 %v4900_v3 }
 0x1ba   : > { %v1472_v25 = vmax.f32 %v1042_v18, %v1044_v20  ;;  %v1048_v26 = vadd.f32 %v1047_v24, %v5240_v42 }
 0x1bc   : > { %v1473_v27 = vmax.f32 %v1046_v22, %v1048_v26 }
 0x1be   : > { %v1051_v29 = vpop.f32.mrb[108].mxu0  ;;  %v1574_v30 = vpack.c.bf16 %v1473_v27, %v1472_v25 }
 0x1bf   : > { %v1052_v35 = vadd.f32 %v1051_v29, %v5237_v41  ;;  %v1053_v36 = vpop.f32.mrb[109].mxu0 }
 0x1c0   : > { %v1054_v39 = vadd.f32 %v1053_v36, %v5240_v42  ;;  %v1055_v43 = vpop.f32.mrb[110].mxu0  ;;  %2013 = vmatmul.mubr.bf16.gmra.mrb[168].mxu1 %v1574_v30 }
 0x1c1   : > { %v1056_v46 = vadd.f32 %v1055_v43, %v5237_v41  ;;  %v1057_v47 = vpop.f32.mrb[111].mxu0  ;;  %2022 = vmatprep.mubr.bf16.mxu1 %v4900_v3 }
 0x1c2   : > { %v1474_v50 = vmax.f32 %v1052_v35, %v1054_v39  ;;  %v1058_v51 = vadd.f32 %v1057_v47, %v5240_v42 }
 0x1c3   : > { %v1754_v53 = vpop.f32.mrb[64].mxu1 }
 0x1c4   : > { %v1475_v54 = vmax.f32 %v1056_v46, %v1058_v51  ;;  %v1755_v55 = vadd.f32 %v1754_v53, %v5584_v45  ;;  %v1756_v56 = vpop.f32.mrb[65].mxu1 }
 0x1c5   : > { %v1757_v57 = vadd.f32 %v1756_v56, %v5588_v49  ;;  %v1758_v58 = vpop.f32.mrb[66].mxu1 }
 0x1c6   : > { %v1759_v59 = vadd.f32 %v1758_v58, %v5584_v45  ;;  %v1061_v60 = vpop.f32.mrb[112].mxu0  ;;  %v1760_v61 = vpop.f32.mrb[67].mxu1  ;;  %v1575_v62 = vpack.c.bf16 %v1475_v54, %v1474_v50 }
 0x1c7   : > { %v2393_v63 = vmax.f32 %v1755_v55, %v1757_v57  ;;  %v1062_v2 = vadd.f32 %v1061_v60, %v5237_v41  ;;  %v1761_v6 = vadd.f32 %v1760_v61, %v5588_v49  ;;  %v1063_v8 = vpop.f32.mrb[113].mxu0 }
 0x1c8   : > { %v1064_v9 = vadd.f32 %v1063_v8, %v5240_v42  ;;  %v1065_v11 = vpop.f32.mrb[114].mxu0  ;;  %2023 = vmatmul.mubr.bf16.gmra.mrb[172].mxu1 %v1575_v62 }
 0x1c9   : > { %v2394_v12 = vmax.f32 %v1759_v59, %v1761_v6  ;;  %v1066_v13 = vadd.f32 %v1065_v11, %v5237_v41  ;;  %v1067_v15 = vpop.f32.mrb[115].mxu0  ;;  %2032 = vmatprep.mubr.bf16.mxu1 %v4900_v3  ;;  %v2521_v18 = vmax.f32 %v2393_v63, 0.0 }
 0x1ca   : > { %v1476_v16 = vmax.f32 %v1062_v2, %v1064_v9  ;;  %v1068_v17 = vadd.f32 %v1067_v15, %v5240_v42 }
 0x1cb   : > { %v2522_v19 = vmax.f32 %v2394_v12, 0.0  ;;  %v1764_v20 = vpop.f32.mrb[68].mxu1 }
 0x1cc   : > { %v1477_v21 = vmax.f32 %v1066_v13, %v1068_v17  ;;  %v1765_v22 = vadd.f32 %v1764_v20, %v5584_v45  ;;  %v1766_v24 = vpop.f32.mrb[69].mxu1 }
 0x1cd   : > { %v2649_v25 = vpack.c.bf16 %v2522_v19, %v2521_v18  ;;  %v1767_v26 = vadd.f32 %v1766_v24, %v5588_v49  ;;  %v1768_v27 = vpop.f32.mrb[70].mxu1 }
 0x1ce   : > { %v1769_v28 = vadd.f32 %v1768_v27, %v5584_v45  ;;  %v1071_v29 = vpop.f32.mrb[116].mxu0  ;;  %v1770_v30 = vpop.f32.mrb[71].mxu1  ;;  %v1576_v35 = vpack.c.bf16 %v1477_v21, %v1476_v16 }
 0x1cf   : > { %v2395_v36 = vmax.f32 %v1765_v22, %v1767_v26  ;;  %v1072_v39 = vadd.f32 %v1071_v29, %v5237_v41  ;;  %v1771_v43 = vadd.f32 %v1770_v30, %v5588_v49  ;;  %v1073_v46 = vpop.f32.mrb[117].mxu0  ;;  %2854 = vmatmul.mubr.bf16.vlgmr.msra.gmra.mrb[192].mxu0 %v2649_v25 }
 0x1d0   : > { %v1074_v47 = vadd.f32 %v1073_v46, %v5240_v42  ;;  %v1075_v50 = vpop.f32.mrb[118].mxu0  ;;  %2033 = vmatmul.mubr.bf16.gmra.mrb[176].mxu1 %v1576_v35  ;;  %2863 = vmatprep.mubr.bf16.mxu0 %v4900_v3 }
 0x1d1   : > { %v2396_v51 = vmax.f32 %v1769_v28, %v1771_v43  ;;  %v1076_v53 = vadd.f32 %v1075_v50, %v5237_v41  ;;  %v1077_v54 = vpop.f32.mrb[119].mxu0  ;;  %2042 = vmatprep.mubr.bf16.mxu1 %v4900_v3  ;;  %v2523_v58 = vmax.f32 %v2395_v36, 0.0 }
 0x1d2   : > { %v1478_v55 = vmax.f32 %v1072_v39, %v1074_v47  ;;  %v1078_v56 = vadd.f32 %v1077_v54, %v5240_v42 }
 0x1d3   : > { %v1774_v57 = vpop.f32.mrb[72].mxu1  ;;  %v2524_v59 = vmax.f32 %v2396_v51, 0.0 }
 0x1d4   : > { %v1479_v60 = vmax.f32 %v1076_v53, %v1078_v56  ;;  %v1775_v61 = vadd.f32 %v1774_v57, %v5584_v45  ;;  %v1776_v62 = vpop.f32.mrb[73].mxu1 }
 0x1d5   : > { %v1777_v63 = vadd.f32 %v1776_v62, %v5588_v49  ;;  %v1778_v2 = vpop.f32.mrb[74].mxu1  ;;  %v2650_v6 = vpack.c.bf16 %v2524_v59, %v2523_v58 }
 0x1d6   : > { %v1779_v8 = vadd.f32 %v1778_v2, %v5584_v45  ;;  %v1081_v9 = vpop.f32.mrb[120].mxu0  ;;  %v1780_v11 = vpop.f32.mrb[75].mxu1  ;;  %v1577_v12 = vpack.c.bf16 %v1479_v60, %v1478_v55 }
 0x1d7   : > { %v2397_v13 = vmax.f32 %v1775_v61, %v1777_v63  ;;  %v1082_v15 = vadd.f32 %v1081_v9, %v5237_v41  ;;  %v1781_v16 = vadd.f32 %v1780_v11, %v5588_v49  ;;  %v1083_v17 = vpop.f32.mrb[121].mxu0  ;;  %2864 = vmatmul.mubr.bf16.gmra.mrb[196].mxu0 %v2650_v6 }
 0x1d8   : > { %v1084_v18 = vadd.f32 %v1083_v17, %v5240_v42  ;;  %v1085_v19 = vpop.f32.mrb[122].mxu0  ;;  %2043 = vmatmul.mubr.bf16.gmra.mrb[180].mxu1 %v1577_v12  ;;  %2873 = vmatprep.mubr.bf16.mxu0 %v4900_v3 }
 0x1d9   : > { %v2398_v20 = vmax.f32 %v1779_v8, %v1781_v16  ;;  %v1086_v21 = vadd.f32 %v1085_v19, %v5237_v41  ;;  %v1087_v22 = vpop.f32.mrb[123].mxu0  ;;  %2052 = vmatprep.mubr.bf16.mxu1 %v4900_v3  ;;  %v2525_v27 = vmax.f32 %v2397_v13, 0.0 }
 0x1da   : > { %v1480_v24 = vmax.f32 %v1082_v15, %v1084_v18  ;;  %v1088_v25 = vadd.f32 %v1087_v22, %v5240_v42 }
 0x1db   : > { %v1784_v26 = vpop.f32.mrb[76].mxu1  ;;  %v2526_v28 = vmax.f32 %v2398_v20, 0.0 }
 0x1dc   : > { %v1481_v29 = vmax.f32 %v1086_v21, %v1088_v25  ;;  %v1785_v30 = vadd.f32 %v1784_v26, %v5584_v45  ;;  %v1786_v35 = vpop.f32.mrb[77].mxu1 }
 0x1dd   : > { %v1787_v36 = vadd.f32 %v1786_v35, %v5588_v49  ;;  %v1788_v39 = vpop.f32.mrb[78].mxu1  ;;  %v2651_v43 = vpack.c.bf16 %v2526_v28, %v2525_v27 }
 0x1de   : > { %v1789_v46 = vadd.f32 %v1788_v39, %v5584_v45  ;;  %v1091_v47 = vpop.f32.mrb[124].mxu0  ;;  %v1790_v50 = vpop.f32.mrb[79].mxu1  ;;  %v1578_v51 = vpack.c.bf16 %v1481_v29, %v1480_v24 }
 0x1df   : > { %v2399_v53 = vmax.f32 %v1785_v30, %v1787_v36  ;;  %v1092_v54 = vadd.f32 %v1091_v47, %v5237_v41  ;;  %v1791_v55 = vadd.f32 %v1790_v50, %v5588_v49  ;;  %v1093_v56 = vpop.f32.mrb[125].mxu0  ;;  %2874 = vmatmul.mubr.bf16.gmra.mrb[200].mxu0 %v2651_v43 }
 0x1e0   : > { %v1094_v57 = vadd.f32 %v1093_v56, %v5240_v42  ;;  %v1095_v58 = vpop.f32.mrb[126].mxu0  ;;  %2053 = vmatmul.mubr.bf16.gmra.mrb[184].mxu1 %v1578_v51  ;;  %2883 = vmatprep.mubr.bf16.mxu0 %v4900_v3  ;;  %v4886_v56 = vld [vmem:[%s6770_s7 + $0x18] sm:$0xff]  }
 0x1e1   : > { %v2400_v59 = vmax.f32 %v1789_v46, %v1791_v55  ;;  %v1096_v60 = vadd.f32 %v1095_v58, %v5237_v41  ;;  %v1097_v61 = vpop.f32.mrb[127].mxu0  ;;  %2062 = vmatprep.mubr.bf16.mxu1 %v4900_v3  ;;  %v2527_v6 = vmax.f32 %v2399_v53, 0.0  ;;  %4684 = vmatprep.subr.bf16.mxu1 %v4886_v56 }
 0x1e2   : > { %v1482_v62 = vmax.f32 %v1092_v54, %v1094_v57  ;;  %v1098_v63 = vadd.f32 %v1097_v61, %v5240_v42  ;;  %4685 = vmatpush3.bf16.msra.mxu1 %v4886_v56 }
 0x1e3   : > { %v1794_v2 = vpop.f32.mrb[80].mxu1  ;;  %v2528_v8 = vmax.f32 %v2400_v59, 0.0 }
 0x1e4   : > { %v1483_v9 = vmax.f32 %v1096_v60, %v1098_v63  ;;  %v1795_v11 = vadd.f32 %v1794_v2, %v5584_v45  ;;  %v1796_v12 = vpop.f32.mrb[81].mxu1 }
 0x1e5   : > { %v1797_v13 = vadd.f32 %v1796_v12, %v5588_v49  ;;  %v1798_v15 = vpop.f32.mrb[82].mxu1  ;;  %v2652_v16 = vpack.c.bf16 %v2528_v8, %v2527_v6 }
 0x1e6   : > { %v1799_v17 = vadd.f32 %v1798_v15, %v5584_v45  ;;  %v1101_v18 = vpop.f32.mrb[128].mxu0  ;;  %v1800_v19 = vpop.f32.mrb[83].mxu1  ;;  %v1579_v20 = vpack.c.bf16 %v1483_v9, %v1482_v62 }
 0x1e7   : > { %v2401_v21 = vmax.f32 %v1795_v11, %v1797_v13  ;;  %v1102_v22 = vadd.f32 %v1101_v18, %v5237_v41  ;;  %v1801_v24 = vadd.f32 %v1800_v19, %v5588_v49  ;;  %v1103_v25 = vpop.f32.mrb[129].mxu0  ;;  %2884 = vmatmul.mubr.bf16.gmra.mrb[204].mxu0 %v2652_v16 }
 0x1e8   : > { %v1104_v26 = vadd.f32 %v1103_v25, %v5240_v42  ;;  %v1105_v27 = vpop.f32.mrb[130].mxu0  ;;  %2063 = vmatmul.mubr.bf16.gmra.mrb[188].mxu1 %v1579_v20  ;;  %2893 = vmatprep.mubr.bf16.mxu0 %v4900_v3 }
 0x1e9   : > { %v2402_v28 = vmax.f32 %v1799_v17, %v1801_v24  ;;  %v1106_v29 = vadd.f32 %v1105_v27, %v5237_v41  ;;  %v1107_v30 = vpop.f32.mrb[131].mxu0  ;;  %2072 = vmatprep.mubr.bf16.mxu1 %v4900_v3  ;;  %v2529_v43 = vmax.f32 %v2401_v21, 0.0 }
 0x1ea   : > { %v1484_v35 = vmax.f32 %v1102_v22, %v1104_v26  ;;  %v1108_v36 = vadd.f32 %v1107_v30, %v5240_v42 }
 0x1eb   : > { %v1804_v39 = vpop.f32.mrb[84].mxu1  ;;  %v2530_v46 = vmax.f32 %v2402_v28, 0.0 }
 0x1ec   : > { %v1485_v47 = vmax.f32 %v1106_v29, %v1108_v36  ;;  %v1805_v50 = vadd.f32 %v1804_v39, %v5584_v45  ;;  %v1806_v51 = vpop.f32.mrb[85].mxu1 }
 0x1ed   : > { %v1807_v53 = vadd.f32 %v1806_v51, %v5588_v49  ;;  %v1808_v54 = vpop.f32.mrb[86].mxu1  ;;  %v2653_v55 = vpack.c.bf16 %v2530_v46, %v2529_v43 }
 0x1ee   : > { %v1809_v57 = vadd.f32 %v1808_v54, %v5584_v45  ;;  %v1111_v58 = vpop.f32.mrb[132].mxu0  ;;  %v1810_v59 = vpop.f32.mrb[87].mxu1  ;;  %v1580_v60 = vpack.c.bf16 %v1485_v47, %v1484_v35 }
 0x1ef   : > { %v2403_v61 = vmax.f32 %v1805_v50, %v1807_v53  ;;  %v1112_v62 = vadd.f32 %v1111_v58, %v5237_v41  ;;  %v1811_v63 = vadd.f32 %v1810_v59, %v5588_v49  ;;  %v1113_v2 = vpop.f32.mrb[133].mxu0  ;;  %2894 = vmatmul.mubr.bf16.gmra.mrb[208].mxu0 %v2653_v55 }
 0x1f0   : > { %v1114_v6 = vadd.f32 %v1113_v2, %v5240_v42  ;;  %v1115_v8 = vpop.f32.mrb[134].mxu0  ;;  %2073 = vmatmul.mubr.bf16.gmra.mrb[192].mxu1 %v1580_v60  ;;  %2903 = vmatprep.mubr.bf16.mxu0 %v4900_v3 }
 0x1f1   : > { %v2404_v9 = vmax.f32 %v1809_v57, %v1811_v63  ;;  %v1116_v11 = vadd.f32 %v1115_v8, %v5237_v41  ;;  %v1117_v12 = vpop.f32.mrb[135].mxu0  ;;  %2082 = vmatprep.mubr.bf16.mxu1 %v4900_v3  ;;  %v2531_v17 = vmax.f32 %v2403_v61, 0.0 }
 0x1f2   : > { %v1486_v13 = vmax.f32 %v1112_v62, %v1114_v6  ;;  %v1118_v15 = vadd.f32 %v1117_v12, %v5240_v42 }
 0x1f3   : > { %v1814_v16 = vpop.f32.mrb[88].mxu1  ;;  %v2532_v18 = vmax.f32 %v2404_v9, 0.0 }
 0x1f4   : > { %v1487_v19 = vmax.f32 %v1116_v11, %v1118_v15  ;;  %v1815_v20 = vadd.f32 %v1814_v16, %v5584_v45  ;;  %v1816_v21 = vpop.f32.mrb[89].mxu1 }
 0x1f5   : > { %v1817_v22 = vadd.f32 %v1816_v21, %v5588_v49  ;;  %v1818_v24 = vpop.f32.mrb[90].mxu1  ;;  %v2654_v25 = vpack.c.bf16 %v2532_v18, %v2531_v17 }
 0x1f6   : > { %v1819_v26 = vadd.f32 %v1818_v24, %v5584_v45  ;;  %v1121_v27 = vpop.f32.mrb[136].mxu0  ;;  %v1820_v28 = vpop.f32.mrb[91].mxu1  ;;  %v1581_v29 = vpack.c.bf16 %v1487_v19, %v1486_v13 }
 0x1f7   : > { %v2405_v30 = vmax.f32 %v1815_v20, %v1817_v22  ;;  %v1122_v35 = vadd.f32 %v1121_v27, %v5237_v41  ;;  %v1821_v36 = vadd.f32 %v1820_v28, %v5588_v49  ;;  %v1123_v39 = vpop.f32.mrb[137].mxu0  ;;  %2904 = vmatmul.mubr.bf16.gmra.mrb[212].mxu0 %v2654_v25 }
 0x1f8   : > { %v1124_v43 = vadd.f32 %v1123_v39, %v5240_v42  ;;  %v1125_v46 = vpop.f32.mrb[138].mxu0  ;;  %2083 = vmatmul.mubr.bf16.gmra.mrb[196].mxu1 %v1581_v29  ;;  %2913 = vmatprep.mubr.bf16.mxu0 %v4900_v3 }
 0x1f9   : > { %v2406_v47 = vmax.f32 %v1819_v26, %v1821_v36  ;;  %v1126_v50 = vadd.f32 %v1125_v46, %v5237_v41  ;;  %v1127_v51 = vpop.f32.mrb[139].mxu0  ;;  %2092 = vmatprep.mubr.bf16.mxu1 %v4900_v3  ;;  %v2533_v56 = vmax.f32 %v2405_v30, 0.0 }
 0x1fa   : > { %v1488_v53 = vmax.f32 %v1122_v35, %v1124_v43  ;;  %v1128_v54 = vadd.f32 %v1127_v51, %v5240_v42 }
 0x1fb   : > { %v1824_v55 = vpop.f32.mrb[92].mxu1  ;;  %v2534_v57 = vmax.f32 %v2406_v47, 0.0 }
 0x1fc   : > { %v1489_v58 = vmax.f32 %v1126_v50, %v1128_v54  ;;  %v1825_v59 = vadd.f32 %v1824_v55, %v5584_v45  ;;  %v1826_v60 = vpop.f32.mrb[93].mxu1 }
 0x1fd   : > { %v1827_v61 = vadd.f32 %v1826_v60, %v5588_v49  ;;  %v1828_v62 = vpop.f32.mrb[94].mxu1  ;;  %v2655_v63 = vpack.c.bf16 %v2534_v57, %v2533_v56 }
 0x1fe   : > { %v1829_v2 = vadd.f32 %v1828_v62, %v5584_v45  ;;  %v1131_v6 = vpop.f32.mrb[140].mxu0  ;;  %v1830_v8 = vpop.f32.mrb[95].mxu1  ;;  %v1582_v9 = vpack.c.bf16 %v1489_v58, %v1488_v53 }
 0x1ff   : > { %v2407_v11 = vmax.f32 %v1825_v59, %v1827_v61  ;;  %v1132_v12 = vadd.f32 %v1131_v6, %v5237_v41  ;;  %v1831_v13 = vadd.f32 %v1830_v8, %v5588_v49  ;;  %v1133_v15 = vpop.f32.mrb[141].mxu0  ;;  %2914 = vmatmul.mubr.bf16.gmra.mrb[216].mxu0 %v2655_v63 }
 0x200   : > { %v1134_v16 = vadd.f32 %v1133_v15, %v5240_v42  ;;  %v1135_v17 = vpop.f32.mrb[142].mxu0  ;;  %2093 = vmatmul.mubr.bf16.gmra.mrb[200].mxu1 %v1582_v9  ;;  %2923 = vmatprep.mubr.bf16.mxu0 %v4900_v3 }
 0x201   : > { %v2408_v18 = vmax.f32 %v1829_v2, %v1831_v13  ;;  %v1136_v19 = vadd.f32 %v1135_v17, %v5237_v41  ;;  %v1137_v20 = vpop.f32.mrb[143].mxu0  ;;  %2102 = vmatprep.mubr.bf16.mxu1 %v4900_v3  ;;  %v2535_v25 = vmax.f32 %v2407_v11, 0.0 }
 0x202   : > { %v1490_v21 = vmax.f32 %v1132_v12, %v1134_v16  ;;  %v1138_v22 = vadd.f32 %v1137_v20, %v5240_v42 }
 0x203   : > { %v1834_v24 = vpop.f32.mrb[96].mxu1  ;;  %v2536_v26 = vmax.f32 %v2408_v18, 0.0 }
 0x204   : > { %v1491_v27 = vmax.f32 %v1136_v19, %v1138_v22  ;;  %v1835_v28 = vadd.f32 %v1834_v24, %v5584_v45  ;;  %v1836_v29 = vpop.f32.mrb[97].mxu1 }
 0x205   : > { %v1837_v30 = vadd.f32 %v1836_v29, %v5588_v49  ;;  %v1838_v35 = vpop.f32.mrb[98].mxu1  ;;  %v2656_v36 = vpack.c.bf16 %v2536_v26, %v2535_v25 }
 0x206   : > { %v1839_v39 = vadd.f32 %v1838_v35, %v5584_v45  ;;  %v1141_v43 = vpop.f32.mrb[144].mxu0  ;;  %v1840_v46 = vpop.f32.mrb[99].mxu1  ;;  %v1583_v47 = vpack.c.bf16 %v1491_v27, %v1490_v21 }
 0x207   : > { %v2409_v50 = vmax.f32 %v1835_v28, %v1837_v30  ;;  %v1142_v51 = vadd.f32 %v1141_v43, %v5237_v41  ;;  %v1841_v53 = vadd.f32 %v1840_v46, %v5588_v49  ;;  %v1143_v54 = vpop.f32.mrb[145].mxu0  ;;  %2924 = vmatmul.mubr.bf16.gmra.mrb[220].mxu0 %v2656_v36 }
 0x208   : > { %v1144_v55 = vadd.f32 %v1143_v54, %v5240_v42  ;;  %v1145_v56 = vpop.f32.mrb[146].mxu0  ;;  %2103 = vmatmul.mubr.bf16.gmra.mrb[204].mxu1 %v1583_v47  ;;  %2933 = vmatprep.mubr.bf16.mxu0 %v4900_v3 }
 0x209   : > { %v2410_v57 = vmax.f32 %v1839_v39, %v1841_v53  ;;  %v1146_v58 = vadd.f32 %v1145_v56, %v5237_v41  ;;  %v1147_v59 = vpop.f32.mrb[147].mxu0  ;;  %2112 = vmatprep.mubr.bf16.mxu1 %v4900_v3  ;;  %v2537_v63 = vmax.f32 %v2409_v50, 0.0 }
 0x20a   : > { %v1492_v60 = vmax.f32 %v1142_v51, %v1144_v55  ;;  %v1148_v61 = vadd.f32 %v1147_v59, %v5240_v42 }
 0x20b   : > { %v1844_v62 = vpop.f32.mrb[100].mxu1  ;;  %v2538_v2 = vmax.f32 %v2410_v57, 0.0 }
 0x20c   : > { %v1493_v6 = vmax.f32 %v1146_v58, %v1148_v61  ;;  %v1845_v8 = vadd.f32 %v1844_v62, %v5584_v45  ;;  %v1846_v9 = vpop.f32.mrb[101].mxu1 }
 0x20d   : > { %v1847_v11 = vadd.f32 %v1846_v9, %v5588_v49  ;;  %v1848_v12 = vpop.f32.mrb[102].mxu1  ;;  %v2657_v13 = vpack.c.bf16 %v2538_v2, %v2537_v63 }
 0x20e   : > { %v1849_v15 = vadd.f32 %v1848_v12, %v5584_v45  ;;  %v1151_v16 = vpop.f32.mrb[148].mxu0  ;;  %v1850_v17 = vpop.f32.mrb[103].mxu1  ;;  %v1584_v18 = vpack.c.bf16 %v1493_v6, %v1492_v60 }
 0x20f   : > { %v2411_v19 = vmax.f32 %v1845_v8, %v1847_v11  ;;  %v1152_v20 = vadd.f32 %v1151_v16, %v5237_v41  ;;  %v1851_v21 = vadd.f32 %v1850_v17, %v5588_v49  ;;  %v1153_v22 = vpop.f32.mrb[149].mxu0  ;;  %2934 = vmatmul.mubr.bf16.gmra.mrb[224].mxu0 %v2657_v13 }
 0x210   : > { %v1154_v24 = vadd.f32 %v1153_v22, %v5240_v42  ;;  %v1155_v25 = vpop.f32.mrb[150].mxu0  ;;  %2113 = vmatmul.mubr.bf16.gmra.mrb[208].mxu1 %v1584_v18  ;;  %2943 = vmatprep.mubr.bf16.mxu0 %v4900_v3 }
 0x211   : > { %v2412_v26 = vmax.f32 %v1849_v15, %v1851_v21  ;;  %v1156_v27 = vadd.f32 %v1155_v25, %v5237_v41  ;;  %v1157_v28 = vpop.f32.mrb[151].mxu0  ;;  %2122 = vmatprep.mubr.bf16.mxu1 %v4900_v3  ;;  %v2539_v36 = vmax.f32 %v2411_v19, 0.0 }
 0x212   : > { %v1494_v29 = vmax.f32 %v1152_v20, %v1154_v24  ;;  %v1158_v30 = vadd.f32 %v1157_v28, %v5240_v42 }
 0x213   : > { %v1854_v35 = vpop.f32.mrb[104].mxu1  ;;  %v2540_v39 = vmax.f32 %v2412_v26, 0.0 }
 0x214   : > { %v1495_v43 = vmax.f32 %v1156_v27, %v1158_v30  ;;  %v1855_v46 = vadd.f32 %v1854_v35, %v5584_v45  ;;  %v1856_v47 = vpop.f32.mrb[105].mxu1 }
 0x215   : > { %v1857_v50 = vadd.f32 %v1856_v47, %v5588_v49  ;;  %v1858_v51 = vpop.f32.mrb[106].mxu1  ;;  %v2658_v53 = vpack.c.bf16 %v2540_v39, %v2539_v36 }
 0x216   : > { %v1859_v54 = vadd.f32 %v1858_v51, %v5584_v45  ;;  %v1161_v55 = vpop.f32.mrb[152].mxu0  ;;  %v1860_v56 = vpop.f32.mrb[107].mxu1  ;;  %v1585_v57 = vpack.c.bf16 %v1495_v43, %v1494_v29 }
 0x217   : > { %v2413_v58 = vmax.f32 %v1855_v46, %v1857_v50  ;;  %v1162_v59 = vadd.f32 %v1161_v55, %v5237_v41  ;;  %v1861_v60 = vadd.f32 %v1860_v56, %v5588_v49  ;;  %v1163_v61 = vpop.f32.mrb[153].mxu0  ;;  %2944 = vmatmul.mubr.bf16.gmra.mrb[228].mxu0 %v2658_v53 }
 0x218   : > { %v1164_v62 = vadd.f32 %v1163_v61, %v5240_v42  ;;  %v1165_v63 = vpop.f32.mrb[154].mxu0  ;;  %2123 = vmatmul.mubr.bf16.gmra.mrb[212].mxu1 %v1585_v57  ;;  %2953 = vmatprep.mubr.bf16.mxu0 %v4900_v3 }
 0x219   : > { %v2414_v2 = vmax.f32 %v1859_v54, %v1861_v60  ;;  %v1166_v6 = vadd.f32 %v1165_v63, %v5237_v41  ;;  %v1167_v8 = vpop.f32.mrb[155].mxu0  ;;  %2132 = vmatprep.mubr.bf16.mxu1 %v4900_v3  ;;  %v2541_v13 = vmax.f32 %v2413_v58, 0.0 }
 0x21a   : > { %v1496_v9 = vmax.f32 %v1162_v59, %v1164_v62  ;;  %v1168_v11 = vadd.f32 %v1167_v8, %v5240_v42 }
 0x21b   : > { %v1864_v12 = vpop.f32.mrb[108].mxu1  ;;  %v2542_v15 = vmax.f32 %v2414_v2, 0.0 }
 0x21c   : > { %v1497_v16 = vmax.f32 %v1166_v6, %v1168_v11  ;;  %v1865_v17 = vadd.f32 %v1864_v12, %v5584_v45  ;;  %v1866_v18 = vpop.f32.mrb[109].mxu1 }
 0x21d   : > { %v1867_v19 = vadd.f32 %v1866_v18, %v5588_v49  ;;  %v1868_v20 = vpop.f32.mrb[110].mxu1  ;;  %v2659_v21 = vpack.c.bf16 %v2542_v15, %v2541_v13 }
 0x21e   : > { %v1869_v22 = vadd.f32 %v1868_v20, %v5584_v45  ;;  %v1171_v24 = vpop.f32.mrb[156].mxu0  ;;  %v1870_v25 = vpop.f32.mrb[111].mxu1  ;;  %v1586_v26 = vpack.c.bf16 %v1497_v16, %v1496_v9 }
 0x21f   : > { %v2415_v27 = vmax.f32 %v1865_v17, %v1867_v19  ;;  %v1172_v28 = vadd.f32 %v1171_v24, %v5237_v41  ;;  %v1871_v29 = vadd.f32 %v1870_v25, %v5588_v49  ;;  %v1173_v30 = vpop.f32.mrb[157].mxu0  ;;  %2954 = vmatmul.mubr.bf16.gmra.mrb[232].mxu0 %v2659_v21 }
 0x220   : > { %v1174_v35 = vadd.f32 %v1173_v30, %v5240_v42  ;;  %v1175_v36 = vpop.f32.mrb[158].mxu0  ;;  %2133 = vmatmul.mubr.bf16.gmra.mrb[216].mxu1 %v1586_v26  ;;  %2963 = vmatprep.mubr.bf16.mxu0 %v4900_v3 }
 0x221   : > { %v2416_v39 = vmax.f32 %v1869_v22, %v1871_v29  ;;  %v1176_v43 = vadd.f32 %v1175_v36, %v5237_v41  ;;  %v1177_v46 = vpop.f32.mrb[159].mxu0  ;;  %2142 = vmatprep.mubr.bf16.mxu1 %v4900_v3  ;;  %v2543_v53 = vmax.f32 %v2415_v27, 0.0 }
 0x222   : > { %v1498_v47 = vmax.f32 %v1172_v28, %v1174_v35  ;;  %v1178_v50 = vadd.f32 %v1177_v46, %v5240_v42 }
 0x223   : > { %v1874_v51 = vpop.f32.mrb[112].mxu1  ;;  %v2544_v54 = vmax.f32 %v2416_v39, 0.0 }
 0x224   : > { %v1499_v55 = vmax.f32 %v1176_v43, %v1178_v50  ;;  %v1875_v56 = vadd.f32 %v1874_v51, %v5584_v45  ;;  %v1876_v57 = vpop.f32.mrb[113].mxu1  ;;  %v4887_v43 = vld [vmem:[%s6770_s7 + $0x20] sm:$0xff]  }
 0x225   : > { %v1877_v58 = vadd.f32 %v1876_v57, %v5588_v49  ;;  %v1878_v59 = vpop.f32.mrb[114].mxu1  ;;  %v2660_v60 = vpack.c.bf16 %v2544_v54, %v2543_v53  ;;  %4686 = vmatprep.subr.bf16.mxu1 %v4887_v43 }
 0x226   : > { %v1879_v61 = vadd.f32 %v1878_v59, %v5584_v45  ;;  %v1181_v62 = vpop.f32.mrb[160].mxu0  ;;  %v1880_v63 = vpop.f32.mrb[115].mxu1  ;;  %v1587_v2 = vpack.c.bf16 %v1499_v55, %v1498_v47  ;;  %4687 = vmatpush3.bf16.msra.mxu1 %v4887_v43 }
 0x227   : > { %v2417_v6 = vmax.f32 %v1875_v56, %v1877_v58  ;;  %v1182_v8 = vadd.f32 %v1181_v62, %v5237_v41  ;;  %v1881_v9 = vadd.f32 %v1880_v63, %v5588_v49  ;;  %v1183_v11 = vpop.f32.mrb[161].mxu0  ;;  %2964 = vmatmul.mubr.bf16.gmra.mrb[236].mxu0 %v2660_v60 }
 0x228   : > { %v1184_v12 = vadd.f32 %v1183_v11, %v5240_v42  ;;  %v1185_v13 = vpop.f32.mrb[162].mxu0  ;;  %2143 = vmatmul.mubr.bf16.gmra.mrb[220].mxu1 %v1587_v2  ;;  %2973 = vmatprep.mubr.bf16.mxu0 %v4900_v3 }
 0x229   : > { %v2418_v15 = vmax.f32 %v1879_v61, %v1881_v9  ;;  %v1186_v16 = vadd.f32 %v1185_v13, %v5237_v41  ;;  %v1187_v17 = vpop.f32.mrb[163].mxu0  ;;  %2152 = vmatprep.mubr.bf16.mxu1 %v4900_v3  ;;  %v2545_v21 = vmax.f32 %v2417_v6, 0.0 }
 0x22a   : > { %v1500_v18 = vmax.f32 %v1182_v8, %v1184_v12  ;;  %v1188_v19 = vadd.f32 %v1187_v17, %v5240_v42 }
 0x22b   : > { %v1884_v20 = vpop.f32.mrb[116].mxu1  ;;  %v2546_v22 = vmax.f32 %v2418_v15, 0.0 }
 0x22c   : > { %v1501_v24 = vmax.f32 %v1186_v16, %v1188_v19  ;;  %v1885_v25 = vadd.f32 %v1884_v20, %v5584_v45  ;;  %v1886_v26 = vpop.f32.mrb[117].mxu1 }
 0x22d   : > { %v1887_v27 = vadd.f32 %v1886_v26, %v5588_v49  ;;  %v1888_v28 = vpop.f32.mrb[118].mxu1  ;;  %v2661_v29 = vpack.c.bf16 %v2546_v22, %v2545_v21 }
 0x22e   : > { %v1889_v30 = vadd.f32 %v1888_v28, %v5584_v45  ;;  %v1191_v35 = vpop.f32.mrb[164].mxu0  ;;  %v1890_v36 = vpop.f32.mrb[119].mxu1  ;;  %v1588_v39 = vpack.c.bf16 %v1501_v24, %v1500_v18 }
 0x22f   : > { %v2419_v46 = vmax.f32 %v1885_v25, %v1887_v27  ;;  %v1192_v47 = vadd.f32 %v1191_v35, %v5237_v41  ;;  %v1891_v50 = vadd.f32 %v1890_v36, %v5588_v49  ;;  %v1193_v51 = vpop.f32.mrb[165].mxu0  ;;  %2974 = vmatmul.mubr.bf16.gmra.mrb[240].mxu0 %v2661_v29 }
 0x230   : > { %v1194_v53 = vadd.f32 %v1193_v51, %v5240_v42  ;;  %v1195_v54 = vpop.f32.mrb[166].mxu0  ;;  %2153 = vmatmul.mubr.bf16.gmra.mrb[224].mxu1 %v1588_v39  ;;  %2983 = vmatprep.mubr.bf16.mxu0 %v4900_v3 }
 0x231   : > { %v2420_v55 = vmax.f32 %v1889_v30, %v1891_v50  ;;  %v1196_v56 = vadd.f32 %v1195_v54, %v5237_v41  ;;  %v1197_v57 = vpop.f32.mrb[167].mxu0  ;;  %2162 = vmatprep.mubr.bf16.mxu1 %v4900_v3  ;;  %v2547_v61 = vmax.f32 %v2419_v46, 0.0 }
 0x232   : > { %v1502_v58 = vmax.f32 %v1192_v47, %v1194_v53  ;;  %v1198_v59 = vadd.f32 %v1197_v57, %v5240_v42 }
 0x233   : > { %v1894_v60 = vpop.f32.mrb[120].mxu1  ;;  %v2548_v62 = vmax.f32 %v2420_v55, 0.0 }
 0x234   : > { %v1503_v63 = vmax.f32 %v1196_v56, %v1198_v59  ;;  %v1895_v2 = vadd.f32 %v1894_v60, %v5584_v45  ;;  %v1896_v6 = vpop.f32.mrb[121].mxu1 }
 0x235   : > { %v1897_v8 = vadd.f32 %v1896_v6, %v5588_v49  ;;  %v1898_v9 = vpop.f32.mrb[122].mxu1  ;;  %v2662_v11 = vpack.c.bf16 %v2548_v62, %v2547_v61 }
 0x236   : > { %v1899_v12 = vadd.f32 %v1898_v9, %v5584_v45  ;;  %v1201_v13 = vpop.f32.mrb[168].mxu0  ;;  %v1900_v15 = vpop.f32.mrb[123].mxu1  ;;  %v1589_v16 = vpack.c.bf16 %v1503_v63, %v1502_v58 }
 0x237   : > { %v2421_v17 = vmax.f32 %v1895_v2, %v1897_v8  ;;  %v1202_v18 = vadd.f32 %v1201_v13, %v5237_v41  ;;  %v1901_v19 = vadd.f32 %v1900_v15, %v5588_v49  ;;  %v1203_v20 = vpop.f32.mrb[169].mxu0  ;;  %2984 = vmatmul.mubr.bf16.gmra.mrb[244].mxu0 %v2662_v11 }
 0x238   : > { %v1204_v21 = vadd.f32 %v1203_v20, %v5240_v42  ;;  %v1205_v22 = vpop.f32.mrb[170].mxu0  ;;  %2163 = vmatmul.mubr.bf16.gmra.mrb[228].mxu1 %v1589_v16  ;;  %2993 = vmatprep.mubr.bf16.mxu0 %v4900_v3 }
 0x239   : > { %v2422_v24 = vmax.f32 %v1899_v12, %v1901_v19  ;;  %v1206_v25 = vadd.f32 %v1205_v22, %v5237_v41  ;;  %v1207_v26 = vpop.f32.mrb[171].mxu0  ;;  %2172 = vmatprep.mubr.bf16.mxu1 %v4900_v3  ;;  %v2549_v30 = vmax.f32 %v2421_v17, 0.0 }
 0x23a   : > { %v1504_v27 = vmax.f32 %v1202_v18, %v1204_v21  ;;  %v1208_v28 = vadd.f32 %v1207_v26, %v5240_v42 }
 0x23b   : > { %v1904_v29 = vpop.f32.mrb[124].mxu1  ;;  %v2550_v35 = vmax.f32 %v2422_v24, 0.0 }
 0x23c   : > { %v1505_v36 = vmax.f32 %v1206_v25, %v1208_v28  ;;  %v1905_v39 = vadd.f32 %v1904_v29, %v5584_v45  ;;  %v1906_v43 = vpop.f32.mrb[125].mxu1 }
 0x23d   : > { %v1907_v46 = vadd.f32 %v1906_v43, %v5588_v49  ;;  %v1908_v47 = vpop.f32.mrb[126].mxu1  ;;  %v2663_v50 = vpack.c.bf16 %v2550_v35, %v2549_v30 }
 0x23e   : > { %v1909_v51 = vadd.f32 %v1908_v47, %v5584_v45  ;;  %v1211_v53 = vpop.f32.mrb[172].mxu0  ;;  %v1910_v54 = vpop.f32.mrb[127].mxu1  ;;  %v1590_v55 = vpack.c.bf16 %v1505_v36, %v1504_v27 }
 0x23f   : > { %v2423_v56 = vmax.f32 %v1905_v39, %v1907_v46  ;;  %v1212_v57 = vadd.f32 %v1211_v53, %v5237_v41  ;;  %v1911_v58 = vadd.f32 %v1910_v54, %v5588_v49  ;;  %v1213_v59 = vpop.f32.mrb[173].mxu0  ;;  %2994 = vmatmul.mubr.bf16.gmra.mrb[248].mxu0 %v2663_v50 }
 0x240   : > { %v1214_v60 = vadd.f32 %v1213_v59, %v5240_v42  ;;  %v1215_v61 = vpop.f32.mrb[174].mxu0  ;;  %2173 = vmatmul.mubr.bf16.gmra.mrb[232].mxu1 %v1590_v55  ;;  %3003 = vmatprep.mubr.bf16.mxu0 %v4900_v3 }
 0x241   : > { %v2424_v62 = vmax.f32 %v1909_v51, %v1911_v58  ;;  %v1216_v63 = vadd.f32 %v1215_v61, %v5237_v41  ;;  %v1217_v2 = vpop.f32.mrb[175].mxu0  ;;  %2182 = vmatprep.mubr.bf16.mxu1 %v4900_v3  ;;  %v2551_v11 = vmax.f32 %v2423_v56, 0.0 }
 0x242   : > { %v1506_v6 = vmax.f32 %v1212_v57, %v1214_v60  ;;  %v1218_v8 = vadd.f32 %v1217_v2, %v5240_v42 }
 0x243   : > { %v1914_v9 = vpop.f32.mrb[128].mxu1  ;;  %v2552_v12 = vmax.f32 %v2424_v62, 0.0 }
 0x244   : > { %v1507_v13 = vmax.f32 %v1216_v63, %v1218_v8  ;;  %v1915_v15 = vadd.f32 %v1914_v9, %v5584_v45  ;;  %v1916_v16 = vpop.f32.mrb[129].mxu1 }
 0x245   : > { %v1917_v17 = vadd.f32 %v1916_v16, %v5588_v49  ;;  %v1918_v18 = vpop.f32.mrb[130].mxu1  ;;  %v2664_v19 = vpack.c.bf16 %v2552_v12, %v2551_v11 }
 0x246   : > { %v1919_v20 = vadd.f32 %v1918_v18, %v5584_v45  ;;  %v1221_v21 = vpop.f32.mrb[176].mxu0  ;;  %v1920_v22 = vpop.f32.mrb[131].mxu1  ;;  %v1591_v24 = vpack.c.bf16 %v1507_v13, %v1506_v6 }
 0x247   : > { %v2425_v25 = vmax.f32 %v1915_v15, %v1917_v17  ;;  %v1222_v26 = vadd.f32 %v1221_v21, %v5237_v41  ;;  %v1921_v27 = vadd.f32 %v1920_v22, %v5588_v49  ;;  %v1223_v28 = vpop.f32.mrb[177].mxu0  ;;  %3004 = vmatmul.mubr.bf16.gmra.mrb[252].mxu0 %v2664_v19 }
 0x248   : > { %v1224_v29 = vadd.f32 %v1223_v28, %v5240_v42  ;;  %v1225_v30 = vpop.f32.mrb[178].mxu0  ;;  %2183 = vmatmul.mubr.bf16.gmra.mrb[236].mxu1 %v1591_v24  ;;  %3013 = vmatprep.mubr.bf16.mxu0 %v4900_v3 }
 0x249   : > { %v2426_v35 = vmax.f32 %v1919_v20, %v1921_v27  ;;  %v1226_v36 = vadd.f32 %v1225_v30, %v5237_v41  ;;  %v1227_v39 = vpop.f32.mrb[179].mxu0  ;;  %2192 = vmatprep.mubr.bf16.mxu1 %v4900_v3  ;;  %v2553_v47 = vmax.f32 %v2425_v25, 0.0 }
 0x24a   : > { %v1508_v43 = vmax.f32 %v1222_v26, %v1224_v29  ;;  %v1228_v46 = vadd.f32 %v1227_v39, %v5240_v42 }
 0x24b   : > { %v2554_v50 = vmax.f32 %v2426_v35, 0.0  ;;  %v1924_v51 = vpop.f32.mrb[132].mxu1 }
 0x24c   : > { %v1509_v53 = vmax.f32 %v1226_v36, %v1228_v46  ;;  %v1925_v54 = vadd.f32 %v1924_v51, %v5584_v45  ;;  %v1926_v55 = vpop.f32.mrb[133].mxu1 }
 0x24d   : > { %v2665_v56 = vpack.c.bf16 %v2554_v50, %v2553_v47  ;;  %v1927_v57 = vadd.f32 %v1926_v55, %v5588_v49  ;;  %v1928_v58 = vpop.f32.mrb[134].mxu1 }
 0x24e   : > { %v1929_v59 = vadd.f32 %v1928_v58, %v5584_v45  ;;  %v1231_v60 = vpop.f32.mrb[180].mxu0  ;;  %v1930_v61 = vpop.f32.mrb[135].mxu1  ;;  %v1592_v62 = vpack.c.bf16 %v1509_v53, %v1508_v43 }
 0x24f   : > { %v2427_v63 = vmax.f32 %v1925_v54, %v1927_v57  ;;  %v1232_v2 = vadd.f32 %v1231_v60, %v5237_v41  ;;  %v1931_v6 = vadd.f32 %v1930_v61, %v5588_v49  ;;  %v1233_v8 = vpop.f32.mrb[181].mxu0  ;;  %3014 = vmatmul.mubr.bf16.gmra.mrb[0].mxu0 %v2665_v56 }
 0x250   : > { %v1234_v9 = vadd.f32 %v1233_v8, %v5240_v42  ;;  %v1235_v11 = vpop.f32.mrb[182].mxu0  ;;  %2193 = vmatmul.mubr.bf16.gmra.mrb[240].mxu1 %v1592_v62  ;;  %3023 = vmatprep.mubr.bf16.mxu0 %v4900_v3 }
 0x251   : > { %v2428_v12 = vmax.f32 %v1929_v59, %v1931_v6  ;;  %v1236_v13 = vadd.f32 %v1235_v11, %v5237_v41  ;;  %v1237_v15 = vpop.f32.mrb[183].mxu0  ;;  %2202 = vmatprep.mubr.bf16.mxu1 %v4900_v3  ;;  %v2555_v18 = vmax.f32 %v2427_v63, 0.0 }
 0x252   : > { %v1510_v16 = vmax.f32 %v1232_v2, %v1234_v9  ;;  %v1238_v17 = vadd.f32 %v1237_v15, %v5240_v42 }
 0x253   : > { %v2556_v19 = vmax.f32 %v2428_v12, 0.0  ;;  %v1934_v20 = vpop.f32.mrb[136].mxu1 }
 0x254   : > { %v1511_v21 = vmax.f32 %v1236_v13, %v1238_v17  ;;  %v1935_v22 = vadd.f32 %v1934_v20, %v5584_v45  ;;  %v1936_v24 = vpop.f32.mrb[137].mxu1 }
 0x255   : > { %v2666_v25 = vpack.c.bf16 %v2556_v19, %v2555_v18  ;;  %v1937_v26 = vadd.f32 %v1936_v24, %v5588_v49  ;;  %v1938_v27 = vpop.f32.mrb[138].mxu1 }
 0x256   : > { %v1939_v28 = vadd.f32 %v1938_v27, %v5584_v45  ;;  %v1241_v29 = vpop.f32.mrb[184].mxu0  ;;  %v1940_v30 = vpop.f32.mrb[139].mxu1  ;;  %v1593_v35 = vpack.c.bf16 %v1511_v21, %v1510_v16 }
 0x257   : > { %v2429_v36 = vmax.f32 %v1935_v22, %v1937_v26  ;;  %v1242_v39 = vadd.f32 %v1241_v29, %v5237_v41  ;;  %v1941_v43 = vadd.f32 %v1940_v30, %v5588_v49  ;;  %v1243_v46 = vpop.f32.mrb[185].mxu0  ;;  %3024 = vmatmul.mubr.bf16.gmra.mrb[4].mxu0 %v2666_v25  ;;  %v4888_v26 = vld [vmem:[%s6770_s7 + $0x28] sm:$0xff]  }
 0x258   : > { %v1244_v47 = vadd.f32 %v1243_v46, %v5240_v42  ;;  %v1245_v50 = vpop.f32.mrb[186].mxu0  ;;  %2203 = vmatmul.mubr.bf16.gmra.mrb[244].mxu1 %v1593_v35  ;;  %3033 = vmatprep.mubr.bf16.mxu0 %v4900_v3 }
 0x259   : > { %v2430_v51 = vmax.f32 %v1939_v28, %v1941_v43  ;;  %v1246_v53 = vadd.f32 %v1245_v50, %v5237_v41  ;;  %v1247_v54 = vpop.f32.mrb[187].mxu0  ;;  %2212 = vmatprep.mubr.bf16.mxu1 %v4900_v3  ;;  %v2557_v57 = vmax.f32 %v2429_v36, 0.0  ;;  %4688 = vmatprep.subr.bf16.mxu1 %v4888_v26  ;;  %v4889_v50 = vld [vmem:[%s6770_s7 + $0x30] sm:$0xff]  }
 0x25a   : > { %v1512_v55 = vmax.f32 %v1242_v39, %v1244_v47  ;;  %v1248_v56 = vadd.f32 %v1247_v54, %v5240_v42  ;;  %4689 = vmatpush3.bf16.msra.mxu1 %v4888_v26 }
 0x25b   : > { %v2558_v58 = vmax.f32 %v2430_v51, 0.0  ;;  %v1944_v59 = vpop.f32.mrb[140].mxu1  ;;  %4690 = vmatprep.subr.bf16.mxu1 %v4889_v50 }
 0x25c   : > { %v1513_v60 = vmax.f32 %v1246_v53, %v1248_v56  ;;  %v1945_v61 = vadd.f32 %v1944_v59, %v5584_v45  ;;  %v1946_v62 = vpop.f32.mrb[141].mxu1 }
 0x25d   : > { %v2667_v63 = vpack.c.bf16 %v2558_v58, %v2557_v57  ;;  %v1947_v2 = vadd.f32 %v1946_v62, %v5588_v49  ;;  %v1948_v6 = vpop.f32.mrb[142].mxu1 }
 0x25e   : > { %v1949_v8 = vadd.f32 %v1948_v6, %v5584_v45  ;;  %v1251_v9 = vpop.f32.mrb[188].mxu0  ;;  %v1950_v11 = vpop.f32.mrb[143].mxu1  ;;  %v1594_v12 = vpack.c.bf16 %v1513_v60, %v1512_v55  ;;  %4691 = vmatpush3.bf16.msra.mxu1 %v4889_v50  ;;  %v4890_v55 = vld [vmem:[%s6770_s7 + $0x38] sm:$0xff]  }
 0x25f   : > { %v2431_v13 = vmax.f32 %v1945_v61, %v1947_v2  ;;  %v1252_v15 = vadd.f32 %v1251_v9, %v5237_v41  ;;  %v1951_v16 = vadd.f32 %v1950_v11, %v5588_v49  ;;  %v1253_v17 = vpop.f32.mrb[189].mxu0  ;;  %3034 = vmatmul.mubr.bf16.gmra.mrb[8].mxu0 %v2667_v63  ;;  %4692 = vmatprep.subr.bf16.mxu1 %v4890_v55 }
 0x260   : > { %v1254_v18 = vadd.f32 %v1253_v17, %v5240_v42  ;;  %v1255_v19 = vpop.f32.mrb[190].mxu0  ;;  %2213 = vmatmul.mubr.bf16.gmra.mrb[248].mxu1 %v1594_v12  ;;  %3043 = vmatprep.mubr.bf16.mxu0 %v4900_v3 }
 0x261   : > { %v2432_v20 = vmax.f32 %v1949_v8, %v1951_v16  ;;  %v1256_v21 = vadd.f32 %v1255_v19, %v5237_v41  ;;  %v1257_v22 = vpop.f32.mrb[191].mxu0  ;;  %2222 = vmatprep.mubr.bf16.mxu1 %v4900_v3  ;;  %v2559_v27 = vmax.f32 %v2431_v13, 0.0 }
 0x262   : > { %v1514_v24 = vmax.f32 %v1252_v15, %v1254_v18  ;;  %v1258_v25 = vadd.f32 %v1257_v22, %v5240_v42  ;;  %4693 = vmatpush3.bf16.msra.mxu1 %v4890_v55 }
 0x263   : > { %v2560_v28 = vmax.f32 %v2432_v20, 0.0  ;;  %v1954_v29 = vpop.f32.mrb[144].mxu1 }
 0x264   : > { %v1515_v30 = vmax.f32 %v1256_v21, %v1258_v25  ;;  %v1955_v35 = vadd.f32 %v1954_v29, %v5584_v45  ;;  %v1956_v36 = vpop.f32.mrb[145].mxu1 }
 0x265   : > { %v2668_v39 = vpack.c.bf16 %v2560_v28, %v2559_v27  ;;  %v1957_v41 = vadd.f32 %v1956_v36, %v5588_v49  ;;  %v1958_v43 = vpop.f32.mrb[146].mxu1 }
 0x266   : > { %v1959_v46 = vadd.f32 %v1958_v43, %v5584_v45  ;;  %v1960_v42 = vpop.f32.mrb[147].mxu1  ;;  %v1595_v47 = vpack.c.bf16 %v1515_v30, %v1514_v24 }
 0x267   : > { %v2433_v51 = vmax.f32 %v1955_v35, %v1957_v41  ;;  %v1961_v53 = vadd.f32 %v1960_v42, %v5588_v49  ;;  %3044 = vmatmul.mubr.bf16.gmra.mrb[12].mxu0 %v2668_v39 }
 0x268   : > { %2223 = vmatmul.mubr.bf16.gmra.mrb[252].mxu1 %v1595_v47  ;;  %3053 = vmatprep.mubr.bf16.mxu0 %v4900_v3 }
 0x269   : > { %v2434_v54 = vmax.f32 %v1959_v46, %v1961_v53  ;;  %2232 = vmatprep.mubr.bf16.mxu1 %v4900_v3  ;;  %v2561_v56 = vmax.f32 %v2433_v51, 0.0 }
 0x26b   : > { %v2562_v57 = vmax.f32 %v2434_v54, 0.0  ;;  %v1964_v58 = vpop.f32.mrb[148].mxu1 }
 0x26c   : > { %v1965_v59 = vadd.f32 %v1964_v58, %v5584_v45  ;;  %v1966_v60 = vpop.f32.mrb[149].mxu1 }
 0x26d   : > { %v2669_v61 = vpack.c.bf16 %v2562_v57, %v2561_v56  ;;  %v1967_v62 = vadd.f32 %v1966_v60, %v5588_v49  ;;  %v1968_v63 = vpop.f32.mrb[150].mxu1 }
 0x26e   : > { %v1969_v2 = vadd.f32 %v1968_v63, %v5584_v45  ;;  %v1970_v6 = vpop.f32.mrb[151].mxu1 }
 0x26f   : > { %v2435_v8 = vmax.f32 %v1965_v59, %v1967_v62  ;;  %v1971_v9 = vadd.f32 %v1970_v6, %v5588_v49  ;;  %3054 = vmatmul.mubr.bf16.gmra.mrb[16].mxu0 %v2669_v61 }
 0x270   : > { %2233 = vmatmul.mubr.bf16.gmra.mrb[0].mxu1 %v5272_v23  ;;  %3063 = vmatprep.mubr.bf16.mxu0 %v4900_v3 }
 0x271   : > { %v2436_v11 = vmax.f32 %v1969_v2, %v1971_v9  ;;  %2242 = vmatprep.mubr.bf16.mxu1 %v4900_v3  ;;  %v2563_v12 = vmax.f32 %v2435_v8, 0.0 }
 0x273   : > { %v2564_v13 = vmax.f32 %v2436_v11, 0.0  ;;  %v1974_v15 = vpop.f32.mrb[152].mxu1 }
 0x274   : > { %v1975_v16 = vadd.f32 %v1974_v15, %v5584_v45  ;;  %v1976_v17 = vpop.f32.mrb[153].mxu1 }
 0x275   : > { %v2670_v18 = vpack.c.bf16 %v2564_v13, %v2563_v12  ;;  %v1977_v19 = vadd.f32 %v1976_v17, %v5588_v49  ;;  %v1978_v20 = vpop.f32.mrb[154].mxu1 }
 0x276   : > { %v1979_v21 = vadd.f32 %v1978_v20, %v5584_v45  ;;  %v1980_v22 = vpop.f32.mrb[155].mxu1 }
 0x277   : > { %v2437_v24 = vmax.f32 %v1975_v16, %v1977_v19  ;;  %v1981_v23 = vadd.f32 %v1980_v22, %v5588_v49  ;;  %3064 = vmatmul.mubr.bf16.gmra.mrb[20].mxu0 %v2670_v18 }
 0x278   : > { %2243 = vmatmul.mubr.bf16.gmra.mrb[4].mxu1 %v5287_v52  ;;  %3073 = vmatprep.mubr.bf16.mxu0 %v4900_v3 }
 0x279   : > { %v2438_v25 = vmax.f32 %v1979_v21, %v1981_v23  ;;  %2252 = vmatprep.mubr.bf16.mxu1 %v4900_v3  ;;  %v2565_v26 = vmax.f32 %v2437_v24, 0.0 }
 0x27b   : > { %v2566_v27 = vmax.f32 %v2438_v25, 0.0  ;;  %v1984_v28 = vpop.f32.mrb[156].mxu1 }
 0x27c   : > { %v1985_v29 = vadd.f32 %v1984_v28, %v5584_v45  ;;  %v1986_v30 = vpop.f32.mrb[157].mxu1 }
 0x27d   : > { %v2671_v35 = vpack.c.bf16 %v2566_v27, %v2565_v26  ;;  %v1987_v36 = vadd.f32 %v1986_v30, %v5588_v49  ;;  %v1988_v39 = vpop.f32.mrb[158].mxu1 }
 0x27e   : > { %v1989_v41 = vadd.f32 %v1988_v39, %v5584_v45  ;;  %v1990_v43 = vpop.f32.mrb[159].mxu1 }
 0x27f   : > { %v2439_v46 = vmax.f32 %v1985_v29, %v1987_v36  ;;  %v1991_v52 = vadd.f32 %v1990_v43, %v5588_v49  ;;  %3074 = vmatmul.mubr.bf16.gmra.mrb[24].mxu0 %v2671_v35  ;;  %v2729_v43 = vld [vmem:[%s6769_s6] sm:$0x3] }
 0x280   : > { %2253 = vmatmul.mubr.bf16.gmra.mrb[8].mxu1 %v5302_v14  ;;  %3083 = vmatprep.mubr.bf16.mxu0 %v4900_v3 }
 0x281   : > { %v2440_v42 = vmax.f32 %v1989_v41, %v1991_v52  ;;  %2262 = vmatprep.mubr.bf16.mxu1 %v4900_v3  ;;  %v2567_v47 = vmax.f32 %v2439_v46, 0.0 }
 0x283   : > { %v2568_v50 = vmax.f32 %v2440_v42, 0.0  ;;  %v1994_v51 = vpop.f32.mrb[160].mxu1 }
 0x284   : > { %v1995_v53 = vadd.f32 %v1994_v51, %v5584_v45  ;;  %v1996_v54 = vpop.f32.mrb[161].mxu1 }
 0x285   : > { %v2672_v55 = vpack.c.bf16 %v2568_v50, %v2567_v47  ;;  %v1997_v56 = vadd.f32 %v1996_v54, %v5588_v49  ;;  %v1998_v57 = vpop.f32.mrb[162].mxu1  ;;  %v5866_v54 = vrot.slane %v2729_v43, %v5233_v40 }
 0x286   : > { %v1999_v58 = vadd.f32 %v1998_v57, %v5584_v45  ;;  %v2000_v59 = vpop.f32.mrb[163].mxu1 }
 0x287   : > { %v2441_v60 = vmax.f32 %v1995_v53, %v1997_v56  ;;  %v2001_v14 = vadd.f32 %v2000_v59, %v5588_v49  ;;  %3084 = vmatmul.mubr.bf16.gmra.mrb[28].mxu0 %v2672_v55  ;;  %v5862_v53 = vrot.slane %v2729_v43, %v5228_v38 }
 0x288   : > { %2263 = vmatmul.mubr.bf16.gmra.mrb[12].mxu1 %v5317_v44  ;;  %3093 = vmatprep.mubr.bf16.mxu0 %v4900_v3 }
 0x289   : > { %v2442_v61 = vmax.f32 %v1999_v58, %v2001_v14  ;;  %2272 = vmatprep.mubr.bf16.mxu1 %v4900_v3  ;;  %v2569_v62 = vmax.f32 %v2441_v60, 0.0 }
 0x28b   : > { %v2570_v63 = vmax.f32 %v2442_v61, 0.0  ;;  %v2004_v2 = vpop.f32.mrb[164].mxu1 }
 0x28c   : > { %v2005_v6 = vadd.f32 %v2004_v2, %v5584_v45  ;;  %v2006_v8 = vpop.f32.mrb[165].mxu1 }
 0x28d   : > { %v2673_v9 = vpack.c.bf16 %v2570_v63, %v2569_v62  ;;  %v2007_v11 = vadd.f32 %v2006_v8, %v5588_v49  ;;  %v2008_v12 = vpop.f32.mrb[166].mxu1 }
 0x28e   : > { %v2009_v13 = vadd.f32 %v2008_v12, %v5584_v45  ;;  %v2010_v15 = vpop.f32.mrb[167].mxu1 }
 0x28f   : > { %v2443_v16 = vmax.f32 %v2005_v6, %v2007_v11  ;;  %v2011_v44 = vadd.f32 %v2010_v15, %v5588_v49  ;;  %3094 = vmatmul.mubr.bf16.gmra.mrb[32].mxu0 %v2673_v9 }
 0x290   : > { %2273 = vmatmul.mubr.bf16.gmra.mrb[16].mxu1 %v5332_v7  ;;  %3103 = vmatprep.mubr.bf16.mxu0 %v4900_v3 }
 0x291   : > { %v2444_v17 = vmax.f32 %v2009_v13, %v2011_v44  ;;  %2282 = vmatprep.mubr.bf16.mxu1 %v4900_v3  ;;  %v2571_v18 = vmax.f32 %v2443_v16, 0.0 }
 0x293   : > { %v2572_v19 = vmax.f32 %v2444_v17, 0.0  ;;  %v2014_v20 = vpop.f32.mrb[168].mxu1 }
 0x294   : > { %v2015_v21 = vadd.f32 %v2014_v20, %v5584_v45  ;;  %v2016_v22 = vpop.f32.mrb[169].mxu1 }
 0x295   : > { %v2674_v24 = vpack.c.bf16 %v2572_v19, %v2571_v18  ;;  %v2017_v23 = vadd.f32 %v2016_v22, %v5588_v49  ;;  %v2018_v25 = vpop.f32.mrb[170].mxu1 }
 0x296   : > { %v2019_v26 = vadd.f32 %v2018_v25, %v5584_v45  ;;  %v2020_v27 = vpop.f32.mrb[171].mxu1 }
 0x297   : > { %v2445_v28 = vmax.f32 %v2015_v21, %v2017_v23  ;;  %v2021_v7 = vadd.f32 %v2020_v27, %v5588_v49  ;;  %3104 = vmatmul.mubr.bf16.gmra.mrb[36].mxu0 %v2674_v24 }
 0x298   : > { %2283 = vmatmul.mubr.bf16.gmra.mrb[20].mxu1 %v5347_v34  ;;  %3113 = vmatprep.mubr.bf16.mxu0 %v4900_v3 }
 0x299   : > { %v2446_v29 = vmax.f32 %v2019_v26, %v2021_v7  ;;  %2292 = vmatprep.mubr.bf16.mxu1 %v4900_v3  ;;  %v2573_v30 = vmax.f32 %v2445_v28, 0.0 }
 0x29b   : > { %v2574_v35 = vmax.f32 %v2446_v29, 0.0  ;;  %v2024_v36 = vpop.f32.mrb[172].mxu1 }
 0x29c   : > { %v2025_v39 = vadd.f32 %v2024_v36, %v5584_v45  ;;  %v2026_v41 = vpop.f32.mrb[173].mxu1 }
 0x29d   : > { %v2675_v46 = vpack.c.bf16 %v2574_v35, %v2573_v30  ;;  %v2027_v52 = vadd.f32 %v2026_v41, %v5588_v49  ;;  %v2028_v42 = vpop.f32.mrb[174].mxu1 }
 0x29e   : > { %v2029_v34 = vadd.f32 %v2028_v42, %v5584_v45  ;;  %v2030_v47 = vpop.f32.mrb[175].mxu1 }
 0x29f   : > { %v2447_v50 = vmax.f32 %v2025_v39, %v2027_v52  ;;  %v2031_v51 = vadd.f32 %v2030_v47, %v5588_v49  ;;  %3114 = vmatmul.mubr.bf16.gmra.mrb[40].mxu0 %v2675_v46 }
 0x2a0   : > { %2293 = vmatmul.mubr.bf16.gmra.mrb[24].mxu1 %v5368_v4  ;;  %3123 = vmatprep.mubr.bf16.mxu0 %v4900_v3 }
 0x2a1   : > { %v2448_v55 = vmax.f32 %v2029_v34, %v2031_v51  ;;  %2302 = vmatprep.mubr.bf16.mxu1 %v4900_v3  ;;  %v2575_v57 = vmax.f32 %v2447_v50, 0.0 }
 0x2a2   : > { %v2855_v56 = vpop.f32.mrb[192].mxu0 }
 0x2a3   : > { %v2576_v58 = vmax.f32 %v2448_v55, 0.0  ;;  %v2856_v59 = vadd.f32 %v2855_v56, %v5862_v53  ;;  %v2034_v60 = vpop.f32.mrb[176].mxu1  ;;  %v2857_v14 = vpop.f32.mrb[193].mxu0 }
 0x2a4   : > { %v2035_v38 = vadd.f32 %v2034_v60, %v5584_v45  ;;  %v2858_v61 = vadd.f32 %v2857_v14, %v5866_v54  ;;  %v2036_v4 = vpop.f32.mrb[177].mxu1  ;;  %v2859_v62 = vpop.f32.mrb[194].mxu0 }
 0x2a5   : > { %v2676_v40 = vpack.c.bf16 %v2576_v58, %v2575_v57  ;;  %v2037_v63 = vadd.f32 %v2036_v4, %v5588_v49  ;;  %v2860_v2 = vadd.f32 %v2859_v62, %v5862_v53  ;;  %v2038_v6 = vpop.f32.mrb[178].mxu1  ;;  %v2861_v8 = vpop.f32.mrb[195].mxu0 }
 0x2a6   : > { %v3494_v9 = vmax.f32 %v2856_v59, %v2858_v61  ;;  %v2039_v11 = vadd.f32 %v2038_v6, %v5584_v45  ;;  %v2862_v12 = vadd.f32 %v2861_v8, %v5866_v54  ;;  %v2040_v13 = vpop.f32.mrb[179].mxu1 }
 0x2a7   : > { %v2449_v15 = vmax.f32 %v2035_v38, %v2037_v63  ;;  %v2041_v16 = vadd.f32 %v2040_v13, %v5588_v49  ;;  %3124 = vmatmul.mubr.bf16.gmra.mrb[44].mxu0 %v2676_v40 }
 0x2a8   : > { %v3495_v44 = vmax.f32 %v2860_v2, %v2862_v12  ;;  %2303 = vmatmul.mubr.bf16.gmra.mrb[28].mxu1 %v5386_v33  ;;  %3133 = vmatprep.mubr.bf16.mxu0 %v4900_v3 }
 0x2a9   : > { %v2450_v17 = vmax.f32 %v2039_v11, %v2041_v16  ;;  %2312 = vmatprep.mubr.bf16.mxu1 %v4900_v3  ;;  %v2577_v20 = vmax.f32 %v2449_v15, 0.0 }
 0x2aa   : > { %v2865_v18 = vpop.f32.mrb[196].mxu0  ;;  %v5881_v19 = vpack.c.bf16 %v3495_v44, %v3494_v9 }
 0x2ab   : > { %v2578_v21 = vmax.f32 %v2450_v17, 0.0  ;;  %v2866_v22 = vadd.f32 %v2865_v18, %v5862_v53  ;;  %v2044_v24 = vpop.f32.mrb[180].mxu1  ;;  %v2867_v23 = vpop.f32.mrb[197].mxu0 }
 0x2ac   : > { %v2045_v25 = vadd.f32 %v2044_v24, %v5584_v45  ;;  %v2868_v26 = vadd.f32 %v2867_v23, %v5866_v54  ;;  %v2046_v27 = vpop.f32.mrb[181].mxu1  ;;  %v2869_v33 = vpop.f32.mrb[198].mxu0 }
 0x2ad   : > { %v2677_v28 = vpack.c.bf16 %v2578_v21, %v2577_v20  ;;  %v2047_v7 = vadd.f32 %v2046_v27, %v5588_v49  ;;  %v2870_v29 = vadd.f32 %v2869_v33, %v5862_v53  ;;  %v2048_v30 = vpop.f32.mrb[182].mxu1  ;;  %v2871_v35 = vpop.f32.mrb[199].mxu0 }
 0x2ae   : > { %v3496_v36 = vmax.f32 %v2866_v22, %v2868_v26  ;;  %v2049_v39 = vadd.f32 %v2048_v30, %v5584_v45  ;;  %v2872_v41 = vadd.f32 %v2871_v35, %v5866_v54  ;;  %v2050_v43 = vpop.f32.mrb[183].mxu1 }
 0x2af   : > { %v2451_v46 = vmax.f32 %v2045_v25, %v2047_v7  ;;  %v2051_v52 = vadd.f32 %v2050_v43, %v5588_v49  ;;  %3134 = vmatmul.mubr.bf16.gmra.mrb[48].mxu0 %v2677_v28 }
 0x2b0   : > { %v3497_v42 = vmax.f32 %v2870_v29, %v2872_v41  ;;  %2313 = vmatmul.mubr.bf16.gmra.mrb[32].mxu1 %v5401_v1  ;;  %3143 = vmatprep.mubr.bf16.mxu0 %v4900_v3 }
 0x2b1   : > { %v2452_v34 = vmax.f32 %v2049_v39, %v2051_v52  ;;  %2322 = vmatprep.mubr.bf16.mxu1 %v4900_v3  ;;  %v2579_v51 = vmax.f32 %v2451_v46, 0.0 }
 0x2b2   : > { %v5894_v47 = vpack.c.bf16 %v3497_v42, %v3496_v36  ;;  %v2875_v50 = vpop.f32.mrb[200].mxu0 }
 0x2b3   : > { %v2580_v55 = vmax.f32 %v2452_v34, 0.0  ;;  %v2876_v56 = vadd.f32 %v2875_v50, %v5862_v53  ;;  %v2054_v57 = vpop.f32.mrb[184].mxu1  ;;  %v2877_v58 = vpop.f32.mrb[201].mxu0 }
 0x2b4   : > { %v2055_v59 = vadd.f32 %v2054_v57, %v5584_v45  ;;  %v2878_v60 = vadd.f32 %v2877_v58, %v5866_v54  ;;  %v2056_v14 = vpop.f32.mrb[185].mxu1  ;;  %v2879_v1 = vpop.f32.mrb[202].mxu0 }
 0x2b5   : > { %v2678_v38 = vpack.c.bf16 %v2580_v55, %v2579_v51  ;;  %v2057_v61 = vadd.f32 %v2056_v14, %v5588_v49  ;;  %v2880_v4 = vadd.f32 %v2879_v1, %v5862_v53  ;;  %v2058_v62 = vpop.f32.mrb[186].mxu1  ;;  %v2881_v40 = vpop.f32.mrb[203].mxu0 }
 0x2b6   : > { %v3498_v63 = vmax.f32 %v2876_v56, %v2878_v60  ;;  %v2059_v2 = vadd.f32 %v2058_v62, %v5584_v45  ;;  %v2882_v6 = vadd.f32 %v2881_v40, %v5866_v54  ;;  %v2060_v8 = vpop.f32.mrb[187].mxu1 }
 0x2b7   : > { %v2453_v9 = vmax.f32 %v2055_v59, %v2057_v61  ;;  %v2061_v11 = vadd.f32 %v2060_v8, %v5588_v49  ;;  %3144 = vmatmul.mubr.bf16.gmra.mrb[52].mxu0 %v2678_v38 }
 0x2b8   : > { %v3499_v12 = vmax.f32 %v2880_v4, %v2882_v6  ;;  %2323 = vmatmul.mubr.bf16.gmra.mrb[36].mxu1 %v5416_v31  ;;  %3153 = vmatprep.mubr.bf16.mxu0 %v4900_v3 }
 0x2b9   : > { %v2454_v13 = vmax.f32 %v2059_v2, %v2061_v11  ;;  %2332 = vmatprep.mubr.bf16.mxu1 %v4900_v3  ;;  %v2581_v44 = vmax.f32 %v2453_v9, 0.0 }
 0x2ba   : > { %v2885_v15 = vpop.f32.mrb[204].mxu0  ;;  %v5907_v16 = vpack.c.bf16 %v3499_v12, %v3498_v63 }
 0x2bb   : > { %v2582_v17 = vmax.f32 %v2454_v13, 0.0  ;;  %v2886_v18 = vadd.f32 %v2885_v15, %v5862_v53  ;;  %v2064_v20 = vpop.f32.mrb[188].mxu1  ;;  %v2887_v21 = vpop.f32.mrb[205].mxu0 }
 0x2bc   : > { %v2065_v22 = vadd.f32 %v2064_v20, %v5584_v45  ;;  %v2888_v24 = vadd.f32 %v2887_v21, %v5866_v54  ;;  %v2066_v23 = vpop.f32.mrb[189].mxu1  ;;  %v2889_v31 = vpop.f32.mrb[206].mxu0 }
 0x2bd   : > { %v2679_v25 = vpack.c.bf16 %v2582_v17, %v2581_v44  ;;  %v2067_v26 = vadd.f32 %v2066_v23, %v5588_v49  ;;  %v2890_v27 = vadd.f32 %v2889_v31, %v5862_v53  ;;  %v2068_v33 = vpop.f32.mrb[190].mxu1  ;;  %v2891_v28 = vpop.f32.mrb[207].mxu0 }
 0x2be   : > { %v3500_v7 = vmax.f32 %v2886_v18, %v2888_v24  ;;  %v2069_v29 = vadd.f32 %v2068_v33, %v5584_v45  ;;  %v2892_v30 = vadd.f32 %v2891_v28, %v5866_v54  ;;  %v2070_v35 = vpop.f32.mrb[191].mxu1 }
 0x2bf   : > { %v2455_v36 = vmax.f32 %v2065_v22, %v2067_v26  ;;  %v2071_v39 = vadd.f32 %v2070_v35, %v5588_v49  ;;  %3154 = vmatmul.mubr.bf16.gmra.mrb[56].mxu0 %v2679_v25 }
 0x2c0   : > { %v3501_v41 = vmax.f32 %v2890_v27, %v2892_v30  ;;  %2333 = vmatmul.mubr.bf16.gmra.mrb[40].mxu1 %v5431_v0  ;;  %3163 = vmatprep.mubr.bf16.mxu0 %v4900_v3 }
 0x2c1   : > { %v2456_v43 = vmax.f32 %v2069_v29, %v2071_v39  ;;  %2342 = vmatprep.mubr.bf16.mxu1 %v4900_v3  ;;  %v2583_v42 = vmax.f32 %v2455_v36, 0.0 }
 0x2c2   : > { %v5920_v46 = vpack.c.bf16 %v3501_v41, %v3500_v7  ;;  %v2895_v52 = vpop.f32.mrb[208].mxu0 }
 0x2c3   : > { %v2584_v34 = vmax.f32 %v2456_v43, 0.0  ;;  %v2896_v50 = vadd.f32 %v2895_v52, %v5862_v53  ;;  %v2074_v51 = vpop.f32.mrb[192].mxu1  ;;  %v2897_v55 = vpop.f32.mrb[209].mxu0 }
 0x2c4   : > { %v2075_v56 = vadd.f32 %v2074_v51, %v5584_v45  ;;  %v2898_v57 = vadd.f32 %v2897_v55, %v5866_v54  ;;  %v2076_v58 = vpop.f32.mrb[193].mxu1  ;;  %v2899_v0 = vpop.f32.mrb[210].mxu0 }
 0x2c5   : > { %v2680_v59 = vpack.c.bf16 %v2584_v34, %v2583_v42  ;;  %v2077_v60 = vadd.f32 %v2076_v58, %v5588_v49  ;;  %v2900_v14 = vadd.f32 %v2899_v0, %v5862_v53  ;;  %v2078_v1 = vpop.f32.mrb[194].mxu1  ;;  %v2901_v38 = vpop.f32.mrb[211].mxu0 }
 0x2c6   : > { %v3502_v61 = vmax.f32 %v2896_v50, %v2898_v57  ;;  %v2079_v4 = vadd.f32 %v2078_v1, %v5584_v45  ;;  %v2902_v62 = vadd.f32 %v2901_v38, %v5866_v54  ;;  %v2080_v40 = vpop.f32.mrb[195].mxu1 }
 0x2c7   : > { %v2457_v63 = vmax.f32 %v2075_v56, %v2077_v60  ;;  %v2081_v2 = vadd.f32 %v2080_v40, %v5588_v49  ;;  %3164 = vmatmul.mubr.bf16.gmra.mrb[60].mxu0 %v2680_v59 }
 0x2c8   : > { %v3503_v6 = vmax.f32 %v2900_v14, %v2902_v62  ;;  %2343 = vmatmul.mubr.bf16.gmra.mrb[44].mxu1 %v5446_v32  ;;  %3173 = vmatprep.mubr.bf16.mxu0 %v4900_v3 }
 0x2c9   : > { %v2458_v8 = vmax.f32 %v2079_v4, %v2081_v2  ;;  %2352 = vmatprep.mubr.bf16.mxu1 %v4900_v3  ;;  %v2585_v12 = vmax.f32 %v2457_v63, 0.0 }
 0x2ca   : > { %v2905_v9 = vpop.f32.mrb[212].mxu0  ;;  %v5933_v11 = vpack.c.bf16 %v3503_v6, %v3502_v61 }
 0x2cb   : > { %v2586_v13 = vmax.f32 %v2458_v8, 0.0  ;;  %v2906_v15 = vadd.f32 %v2905_v9, %v5862_v53  ;;  %v2084_v44 = vpop.f32.mrb[196].mxu1  ;;  %v2907_v17 = vpop.f32.mrb[213].mxu0 }
 0x2cc   : > { %v2085_v18 = vadd.f32 %v2084_v44, %v5584_v45  ;;  %v2908_v20 = vadd.f32 %v2907_v17, %v5866_v54  ;;  %v2086_v21 = vpop.f32.mrb[197].mxu1  ;;  %v2909_v32 = vpop.f32.mrb[214].mxu0 }
 0x2cd   : > { %v2681_v22 = vpack.c.bf16 %v2586_v13, %v2585_v12  ;;  %v2087_v24 = vadd.f32 %v2086_v21, %v5588_v49  ;;  %v2910_v23 = vadd.f32 %v2909_v32, %v5862_v53  ;;  %v2088_v31 = vpop.f32.mrb[198].mxu1  ;;  %v2911_v25 = vpop.f32.mrb[215].mxu0 }
 0x2ce   : > { %v3504_v26 = vmax.f32 %v2906_v15, %v2908_v20  ;;  %v2089_v27 = vadd.f32 %v2088_v31, %v5584_v45  ;;  %v2912_v33 = vadd.f32 %v2911_v25, %v5866_v54  ;;  %v2090_v28 = vpop.f32.mrb[199].mxu1 }
 0x2cf   : > { %v2459_v7 = vmax.f32 %v2085_v18, %v2087_v24  ;;  %v2091_v29 = vadd.f32 %v2090_v28, %v5588_v49  ;;  %3174 = vmatmul.mubr.bf16.gmra.mrb[64].mxu0 %v2681_v22 }
 0x2d0   : > { %v3505_v30 = vmax.f32 %v2910_v23, %v2912_v33  ;;  %2353 = vmatmul.mubr.bf16.gmra.mrb[48].mxu1 %v5461_v5  ;;  %3183 = vmatprep.mubr.bf16.mxu0 %v4900_v3 }
 0x2d1   : > { %v2460_v35 = vmax.f32 %v2089_v27, %v2091_v29  ;;  %2362 = vmatprep.mubr.bf16.mxu1 %v4900_v3  ;;  %v2587_v41 = vmax.f32 %v2459_v7, 0.0 }
 0x2d2   : > { %v5946_v36 = vpack.c.bf16 %v3505_v30, %v3504_v26  ;;  %v2915_v39 = vpop.f32.mrb[216].mxu0 }
 0x2d3   : > { %v2588_v43 = vmax.f32 %v2460_v35, 0.0  ;;  %v2916_v52 = vadd.f32 %v2915_v39, %v5862_v53  ;;  %v2094_v42 = vpop.f32.mrb[200].mxu1  ;;  %v2917_v34 = vpop.f32.mrb[217].mxu0 }
 0x2d4   : > { %v2095_v50 = vadd.f32 %v2094_v42, %v5584_v45  ;;  %v2918_v51 = vadd.f32 %v2917_v34, %v5866_v54  ;;  %v2096_v55 = vpop.f32.mrb[201].mxu1  ;;  %v2919_v5 = vpop.f32.mrb[218].mxu0 }
 0x2d5   : > { %v2682_v56 = vpack.c.bf16 %v2588_v43, %v2587_v41  ;;  %v2097_v57 = vadd.f32 %v2096_v55, %v5588_v49  ;;  %v2920_v58 = vadd.f32 %v2919_v5, %v5862_v53  ;;  %v2098_v0 = vpop.f32.mrb[202].mxu1  ;;  %v2921_v59 = vpop.f32.mrb[219].mxu0 }
 0x2d6   : > { %v3506_v60 = vmax.f32 %v2916_v52, %v2918_v51  ;;  %v2099_v14 = vadd.f32 %v2098_v0, %v5584_v45  ;;  %v2922_v1 = vadd.f32 %v2921_v59, %v5866_v54  ;;  %v2100_v38 = vpop.f32.mrb[203].mxu1 }
 0x2d7   : > { %v2461_v61 = vmax.f32 %v2095_v50, %v2097_v57  ;;  %v2101_v4 = vadd.f32 %v2100_v38, %v5588_v49  ;;  %3184 = vmatmul.mubr.bf16.gmra.mrb[68].mxu0 %v2682_v56 }
 0x2d8   : > { %v3507_v62 = vmax.f32 %v2920_v58, %v2922_v1  ;;  %2363 = vmatmul.mubr.bf16.gmra.mrb[52].mxu1 %v5476_v37  ;;  %3193 = vmatprep.mubr.bf16.mxu0 %v4900_v3 }
 0x2d9   : > { %v2462_v40 = vmax.f32 %v2099_v14, %v2101_v4  ;;  %2372 = vmatprep.mubr.bf16.mxu1 %v4900_v3  ;;  %v2589_v6 = vmax.f32 %v2461_v61, 0.0 }
 0x2da   : > { %v2925_v63 = vpop.f32.mrb[220].mxu0  ;;  %v5959_v2 = vpack.c.bf16 %v3507_v62, %v3506_v60 }
 0x2db   : > { %v2590_v8 = vmax.f32 %v2462_v40, 0.0  ;;  %v2926_v9 = vadd.f32 %v2925_v63, %v5862_v53  ;;  %v2104_v12 = vpop.f32.mrb[204].mxu1  ;;  %v2927_v13 = vpop.f32.mrb[221].mxu0 }
 0x2dc   : > { %v2105_v15 = vadd.f32 %v2104_v12, %v5584_v45  ;;  %v2928_v44 = vadd.f32 %v2927_v13, %v5866_v54  ;;  %v2106_v17 = vpop.f32.mrb[205].mxu1  ;;  %v2929_v37 = vpop.f32.mrb[222].mxu0 }
 0x2dd   : > { %v2683_v18 = vpack.c.bf16 %v2590_v8, %v2589_v6  ;;  %v2107_v20 = vadd.f32 %v2106_v17, %v5588_v49  ;;  %v2930_v21 = vadd.f32 %v2929_v37, %v5862_v53  ;;  %v2108_v32 = vpop.f32.mrb[206].mxu1  ;;  %v2931_v22 = vpop.f32.mrb[223].mxu0 }
 0x2de   : > { %v3508_v24 = vmax.f32 %v2926_v9, %v2928_v44  ;;  %v2109_v23 = vadd.f32 %v2108_v32, %v5584_v45  ;;  %v2932_v31 = vadd.f32 %v2931_v22, %v5866_v54  ;;  %v2110_v25 = vpop.f32.mrb[207].mxu1 }
 0x2df   : > { %v2463_v26 = vmax.f32 %v2105_v15, %v2107_v20  ;;  %v2111_v27 = vadd.f32 %v2110_v25, %v5588_v49  ;;  %3194 = vmatmul.mubr.bf16.gmra.mrb[72].mxu0 %v2683_v18 }
 0x2e0   : > { %v3509_v33 = vmax.f32 %v2930_v21, %v2932_v31  ;;  %2373 = vmatmul.mubr.bf16.gmra.mrb[56].mxu1 %v5491_v10  ;;  %3203 = vmatprep.mubr.bf16.mxu0 %v4900_v3 }
 0x2e1   : > { %v2464_v28 = vmax.f32 %v2109_v23, %v2111_v27  ;;  %2382 = vmatprep.mubr.bf16.mxu1 %v4900_v3  ;;  %v2591_v30 = vmax.f32 %v2463_v26, 0.0 }
 0x2e2   : > { %v5972_v7 = vpack.c.bf16 %v3509_v33, %v3508_v24  ;;  %v2935_v29 = vpop.f32.mrb[224].mxu0 }
 0x2e3   : > { %v2592_v35 = vmax.f32 %v2464_v28, 0.0  ;;  %v2936_v39 = vadd.f32 %v2935_v29, %v5862_v53  ;;  %v2114_v41 = vpop.f32.mrb[208].mxu1  ;;  %v2937_v43 = vpop.f32.mrb[225].mxu0 }
 0x2e4   : > { %v2115_v52 = vadd.f32 %v2114_v41, %v5584_v45  ;;  %v2938_v42 = vadd.f32 %v2937_v43, %v5866_v54  ;;  %v2116_v34 = vpop.f32.mrb[209].mxu1  ;;  %v2939_v10 = vpop.f32.mrb[226].mxu0 }
 0x2e5   : > { %v2684_v50 = vpack.c.bf16 %v2592_v35, %v2591_v30  ;;  %v2117_v51 = vadd.f32 %v2116_v34, %v5588_v49  ;;  %v2940_v55 = vadd.f32 %v2939_v10, %v5862_v53  ;;  %v2118_v5 = vpop.f32.mrb[210].mxu1  ;;  %v2941_v56 = vpop.f32.mrb[227].mxu0 }
 0x2e6   : > { %v3510_v57 = vmax.f32 %v2936_v39, %v2938_v42  ;;  %v2119_v58 = vadd.f32 %v2118_v5, %v5584_v45  ;;  %v2942_v0 = vadd.f32 %v2941_v56, %v5866_v54  ;;  %v2120_v59 = vpop.f32.mrb[211].mxu1 }
 0x2e7   : > { %v2465_v60 = vmax.f32 %v2115_v52, %v2117_v51  ;;  %v2121_v14 = vadd.f32 %v2120_v59, %v5588_v49  ;;  %3204 = vmatmul.mubr.bf16.gmra.mrb[76].mxu0 %v2684_v50 }
 0x2e8   : > { %v3511_v1 = vmax.f32 %v2940_v55, %v2942_v0  ;;  %2383 = vmatmul.mubr.bf16.gmra.mrb[60].mxu1 %v5509_v48  ;;  %3213 = vmatprep.mubr.bf16.mxu0 %v4900_v3 }
 0x2e9   : > { %v2466_v38 = vmax.f32 %v2119_v58, %v2121_v14  ;;  %4694 = vmatprep.mubr.bf16.mxu1 %v5881_v19  ;;  %v2593_v62 = vmax.f32 %v2465_v60, 0.0 }
 0x2ea   : > { %v2945_v61 = vpop.f32.mrb[228].mxu0  ;;  %v5985_v4 = vpack.c.bf16 %v3511_v1, %v3510_v57 }
 0x2eb   : > { %v2594_v40 = vmax.f32 %v2466_v38, 0.0  ;;  %v2946_v63 = vadd.f32 %v2945_v61, %v5862_v53  ;;  %v2124_v6 = vpop.f32.mrb[212].mxu1  ;;  %v2947_v8 = vpop.f32.mrb[229].mxu0 }
 0x2ec   : > { %v2125_v9 = vadd.f32 %v2124_v6, %v5584_v45  ;;  %v2948_v12 = vadd.f32 %v2947_v8, %v5866_v54  ;;  %v2126_v13 = vpop.f32.mrb[213].mxu1  ;;  %v2949_v48 = vpop.f32.mrb[230].mxu0 }
 0x2ed   : > { %v2685_v15 = vpack.c.bf16 %v2594_v40, %v2593_v62  ;;  %v2127_v44 = vadd.f32 %v2126_v13, %v5588_v49  ;;  %v2950_v19 = vadd.f32 %v2949_v48, %v5862_v53  ;;  %v2128_v17 = vpop.f32.mrb[214].mxu1  ;;  %v2951_v37 = vpop.f32.mrb[231].mxu0 }
 0x2ee   : > { %v3512_v18 = vmax.f32 %v2946_v63, %v2948_v12  ;;  %v2129_v20 = vadd.f32 %v2128_v17, %v5584_v45  ;;  %v2952_v21 = vadd.f32 %v2951_v37, %v5866_v54  ;;  %v2130_v32 = vpop.f32.mrb[215].mxu1 }
 0x2ef   : > { %v2467_v22 = vmax.f32 %v2125_v9, %v2127_v44  ;;  %v2131_v24 = vadd.f32 %v2130_v32, %v5588_v49  ;;  %3214 = vmatmul.mubr.bf16.gmra.mrb[80].mxu0 %v2685_v15 }
 0x2f0   : > { %v3513_v23 = vmax.f32 %v2950_v19, %v2952_v21  ;;  %4695 = vmatmul.mubr.bf16.vlgmr.msra.gmra.mrb[64].mxu1 %v5894_v47  ;;  %3223 = vmatprep.mubr.bf16.mxu0 %v4900_v3 }
 0x2f1   : > { %v2468_v31 = vmax.f32 %v2129_v20, %v2131_v24  ;;  %4698 = vmatprep.mubr.bf16.mxu1 %v5907_v16  ;;  %v2595_v27 = vmax.f32 %v2467_v22, 0.0 }
 0x2f2   : > { %v5998_v25 = vpack.c.bf16 %v3513_v23, %v3512_v18  ;;  %v2955_v26 = vpop.f32.mrb[232].mxu0 }
 0x2f3   : > { %v2596_v33 = vmax.f32 %v2468_v31, 0.0  ;;  %v2956_v28 = vadd.f32 %v2955_v26, %v5862_v53  ;;  %v2134_v29 = vpop.f32.mrb[216].mxu1  ;;  %v2957_v30 = vpop.f32.mrb[233].mxu0 }
 0x2f4   : > { %v2135_v35 = vadd.f32 %v2134_v29, %v5584_v45  ;;  %v2958_v39 = vadd.f32 %v2957_v30, %v5866_v54  ;;  %v2136_v41 = vpop.f32.mrb[217].mxu1  ;;  %v2959_v47 = vpop.f32.mrb[234].mxu0 }
 0x2f5   : > { %v2686_v43 = vpack.c.bf16 %v2596_v33, %v2595_v27  ;;  %v2137_v52 = vadd.f32 %v2136_v41, %v5588_v49  ;;  %v2960_v16 = vadd.f32 %v2959_v47, %v5862_v53  ;;  %v2138_v42 = vpop.f32.mrb[218].mxu1  ;;  %v2961_v34 = vpop.f32.mrb[235].mxu0 }
 0x2f6   : > { %v3514_v10 = vmax.f32 %v2956_v28, %v2958_v39  ;;  %v2139_v50 = vadd.f32 %v2138_v42, %v5584_v45  ;;  %v2962_v51 = vadd.f32 %v2961_v34, %v5866_v54  ;;  %v2140_v55 = vpop.f32.mrb[219].mxu1 }
 0x2f7   : > { %v2469_v5 = vmax.f32 %v2135_v35, %v2137_v52  ;;  %v2141_v56 = vadd.f32 %v2140_v55, %v5588_v49  ;;  %3224 = vmatmul.mubr.bf16.gmra.mrb[84].mxu0 %v2686_v43 }
 0x2f8   : > { %v3515_v57 = vmax.f32 %v2960_v16, %v2962_v51  ;;  %4699 = vmatmul.mubr.bf16.gmra.mrb[68].mxu1 %v5920_v46  ;;  %3233 = vmatprep.mubr.bf16.mxu0 %v4900_v3 }
 0x2f9   : > { %v2470_v58 = vmax.f32 %v2139_v50, %v2141_v56  ;;  %4702 = vmatprep.mubr.bf16.mxu1 %v5933_v11  ;;  %v2597_v60 = vmax.f32 %v2469_v5, 0.0 }
 0x2fa   : > { %v2965_v0 = vpop.f32.mrb[236].mxu0  ;;  %v6011_v59 = vpack.c.bf16 %v3515_v57, %v3514_v10 }
 0x2fb   : > { %v2598_v14 = vmax.f32 %v2470_v58, 0.0  ;;  %v2966_v1 = vadd.f32 %v2965_v0, %v5862_v53  ;;  %v2144_v38 = vpop.f32.mrb[220].mxu1  ;;  %v2967_v61 = vpop.f32.mrb[237].mxu0 }
 0x2fc   : > { %v2145_v62 = vadd.f32 %v2144_v38, %v5584_v45  ;;  %v2968_v40 = vadd.f32 %v2967_v61, %v5866_v54  ;;  %v2146_v63 = vpop.f32.mrb[221].mxu1  ;;  %v2969_v46 = vpop.f32.mrb[238].mxu0 }
 0x2fd   : > { %v2687_v6 = vpack.c.bf16 %v2598_v14, %v2597_v60  ;;  %v2147_v8 = vadd.f32 %v2146_v63, %v5588_v49  ;;  %v2970_v11 = vadd.f32 %v2969_v46, %v5862_v53  ;;  %v2148_v9 = vpop.f32.mrb[222].mxu1  ;;  %v2971_v12 = vpop.f32.mrb[239].mxu0 }
 0x2fe   : > { %v3516_v13 = vmax.f32 %v2966_v1, %v2968_v40  ;;  %v2149_v48 = vadd.f32 %v2148_v9, %v5584_v45  ;;  %v2972_v15 = vadd.f32 %v2971_v12, %v5866_v54  ;;  %v2150_v44 = vpop.f32.mrb[223].mxu1 }
 0x2ff   : > { %v2471_v19 = vmax.f32 %v2145_v62, %v2147_v8  ;;  %v2151_v17 = vadd.f32 %v2150_v44, %v5588_v49  ;;  %3234 = vmatmul.mubr.bf16.gmra.mrb[88].mxu0 %v2687_v6 }
 0x300   : > { %v3517_v37 = vmax.f32 %v2970_v11, %v2972_v15  ;;  %4703 = vmatmul.mubr.bf16.gmra.mrb[72].mxu1 %v5946_v36  ;;  %3243 = vmatprep.mubr.bf16.mxu0 %v4900_v3 }
 0x301   : > { %v2472_v18 = vmax.f32 %v2149_v48, %v2151_v17  ;;  %4706 = vmatprep.mubr.bf16.mxu1 %v5959_v2  ;;  %v2599_v32 = vmax.f32 %v2471_v19, 0.0 }
 0x302   : > { %v6024_v20 = vpack.c.bf16 %v3517_v37, %v3516_v13  ;;  %v2975_v21 = vpop.f32.mrb[240].mxu0 }
 0x303   : > { %v2600_v22 = vmax.f32 %v2472_v18, 0.0  ;;  %v2976_v24 = vadd.f32 %v2975_v21, %v5862_v53  ;;  %v2154_v23 = vpop.f32.mrb[224].mxu1  ;;  %v2977_v31 = vpop.f32.mrb[241].mxu0 }
 0x304   : > { %v2155_v26 = vadd.f32 %v2154_v23, %v5584_v45  ;;  %v2978_v27 = vadd.f32 %v2977_v31, %v5866_v54  ;;  %v2156_v33 = vpop.f32.mrb[225].mxu1  ;;  %v2979_v36 = vpop.f32.mrb[242].mxu0 }
 0x305   : > { %v2688_v28 = vpack.c.bf16 %v2600_v22, %v2599_v32  ;;  %v2157_v29 = vadd.f32 %v2156_v33, %v5588_v49  ;;  %v2980_v2 = vadd.f32 %v2979_v36, %v5862_v53  ;;  %v2158_v30 = vpop.f32.mrb[226].mxu1  ;;  %v2981_v35 = vpop.f32.mrb[243].mxu0 }
 0x306   : > { %v3518_v39 = vmax.f32 %v2976_v24, %v2978_v27  ;;  %v2159_v41 = vadd.f32 %v2158_v30, %v5584_v45  ;;  %v2982_v47 = vadd.f32 %v2981_v35, %v5866_v54  ;;  %v2160_v43 = vpop.f32.mrb[227].mxu1 }
 0x307   : > { %v2473_v52 = vmax.f32 %v2155_v26, %v2157_v29  ;;  %v2161_v16 = vadd.f32 %v2160_v43, %v5588_v49  ;;  %3244 = vmatmul.mubr.bf16.gmra.mrb[92].mxu0 %v2688_v28 }
 0x308   : > { %v3519_v42 = vmax.f32 %v2980_v2, %v2982_v47  ;;  %4707 = vmatmul.mubr.bf16.gmra.mrb[76].mxu1 %v5972_v7  ;;  %3253 = vmatprep.mubr.bf16.mxu0 %v4900_v3 }
 0x309   : > { %v2474_v34 = vmax.f32 %v2159_v41, %v2161_v16  ;;  %4710 = vmatprep.mubr.bf16.mxu1 %v5985_v4  ;;  %v2601_v51 = vmax.f32 %v2473_v52, 0.0 }
 0x30a   : > { %v2985_v10 = vpop.f32.mrb[244].mxu0  ;;  %v3634_v50 = vpack.c.bf16 %v3519_v42, %v3518_v39 }
 0x30b   : > { %v2602_v55 = vmax.f32 %v2474_v34, 0.0  ;;  %v2986_v5 = vadd.f32 %v2985_v10, %v5862_v53  ;;  %v2164_v56 = vpop.f32.mrb[228].mxu1  ;;  %v2987_v57 = vpop.f32.mrb[245].mxu0 }
 0x30c   : > { %v2165_v58 = vadd.f32 %v2164_v56, %v5584_v45  ;;  %v2988_v0 = vadd.f32 %v2987_v57, %v5866_v54  ;;  %v2166_v60 = vpop.f32.mrb[229].mxu1  ;;  %v2989_v14 = vpop.f32.mrb[246].mxu0 }
 0x30d   : > { %v2689_v7 = vpack.c.bf16 %v2602_v55, %v2601_v51  ;;  %v2167_v1 = vadd.f32 %v2166_v60, %v5588_v49  ;;  %v2990_v38 = vadd.f32 %v2989_v14, %v5862_v53  ;;  %v2168_v4 = vpop.f32.mrb[230].mxu1  ;;  %v2991_v61 = vpop.f32.mrb[247].mxu0 }
 0x30e   : > { %v3520_v62 = vmax.f32 %v2986_v5, %v2988_v0  ;;  %v2169_v40 = vadd.f32 %v2168_v4, %v5584_v45  ;;  %v2992_v63 = vadd.f32 %v2991_v61, %v5866_v54  ;;  %v2170_v46 = vpop.f32.mrb[231].mxu1 }
 0x30f   : > { %v2475_v6 = vmax.f32 %v2165_v58, %v2167_v1  ;;  %v2171_v8 = vadd.f32 %v2170_v46, %v5588_v49  ;;  %3254 = vmatmul.mubr.bf16.gmra.mrb[96].mxu0 %v2689_v7 }
 0x310   : > { %v3521_v11 = vmax.f32 %v2990_v38, %v2992_v63  ;;  %4711 = vmatmul.mubr.bf16.gmra.mrb[80].mxu1 %v5998_v25  ;;  %3263 = vmatprep.mubr.bf16.mxu0 %v4900_v3 }
 0x311   : > { %v2476_v9 = vmax.f32 %v2169_v40, %v2171_v8  ;;  %4714 = vmatprep.mubr.bf16.mxu1 %v6011_v59  ;;  %v2603_v48 = vmax.f32 %v2475_v6, 0.0 }
 0x312   : > { %v3635_v12 = vpack.c.bf16 %v3521_v11, %v3520_v62  ;;  %v2995_v13 = vpop.f32.mrb[248].mxu0 }
 0x313   : > { %v2604_v15 = vmax.f32 %v2476_v9, 0.0  ;;  %v2996_v44 = vadd.f32 %v2995_v13, %v5862_v53  ;;  %v2174_v19 = vpop.f32.mrb[232].mxu1  ;;  %v2997_v17 = vpop.f32.mrb[249].mxu0 }
 0x314   : > { %v2175_v37 = vadd.f32 %v2174_v19, %v5584_v45  ;;  %v2998_v18 = vadd.f32 %v2997_v17, %v5866_v54  ;;  %v2176_v21 = vpop.f32.mrb[233].mxu1  ;;  %v2999_v32 = vpop.f32.mrb[250].mxu0 }
 0x315   : > { %v2690_v25 = vpack.c.bf16 %v2604_v15, %v2603_v48  ;;  %v2177_v22 = vadd.f32 %v2176_v21, %v5588_v49  ;;  %v3000_v24 = vadd.f32 %v2999_v32, %v5862_v53  ;;  %v2178_v59 = vpop.f32.mrb[234].mxu1  ;;  %v3001_v23 = vpop.f32.mrb[251].mxu0 }
 0x316   : > { %v3522_v31 = vmax.f32 %v2996_v44, %v2998_v18  ;;  %v2179_v26 = vadd.f32 %v2178_v59, %v5584_v45  ;;  %v3002_v27 = vadd.f32 %v3001_v23, %v5866_v54  ;;  %v2180_v33 = vpop.f32.mrb[235].mxu1 }
 0x317   : > { %v2477_v36 = vmax.f32 %v2175_v37, %v2177_v22  ;;  %v2181_v28 = vadd.f32 %v2180_v33, %v5588_v49  ;;  %3264 = vmatmul.mubr.bf16.gmra.mrb[100].mxu0 %v2690_v25 }
 0x318   : > { %v3523_v29 = vmax.f32 %v3000_v24, %v3002_v27  ;;  %4715 = vmatmul.mubr.bf16.gmra.mrb[84].mxu1 %v6024_v20  ;;  %3273 = vmatprep.mubr.bf16.mxu0 %v4900_v3 }
 0x319   : > { %v2478_v2 = vmax.f32 %v2179_v26, %v2181_v28  ;;  %4718 = vmatprep.mubr.bf16.mxu1 %v3634_v50  ;;  %v2605_v39 = vmax.f32 %v2477_v36, 0.0 }
 0x31a   : > { %v3005_v30 = vpop.f32.mrb[252].mxu0  ;;  %v3636_v35 = vpack.c.bf16 %v3523_v29, %v3522_v31 }
 0x31b   : > { %v2606_v41 = vmax.f32 %v2478_v2, 0.0  ;;  %v3006_v47 = vadd.f32 %v3005_v30, %v5862_v53  ;;  %v2184_v43 = vpop.f32.mrb[236].mxu1  ;;  %v3007_v52 = vpop.f32.mrb[253].mxu0 }
 0x31c   : > { %v2185_v16 = vadd.f32 %v2184_v43, %v5584_v45  ;;  %v3008_v42 = vadd.f32 %v3007_v52, %v5866_v54  ;;  %v2186_v34 = vpop.f32.mrb[237].mxu1  ;;  %v3009_v10 = vpop.f32.mrb[254].mxu0 }
 0x31d   : > { %v2691_v51 = vpack.c.bf16 %v2606_v41, %v2605_v39  ;;  %v2187_v20 = vadd.f32 %v2186_v34, %v5588_v49  ;;  %v3010_v55 = vadd.f32 %v3009_v10, %v5862_v53  ;;  %v2188_v50 = vpop.f32.mrb[238].mxu1  ;;  %v3011_v5 = vpop.f32.mrb[255].mxu0 }
 0x31e   : > { %v3524_v56 = vmax.f32 %v3006_v47, %v3008_v42  ;;  %v2189_v57 = vadd.f32 %v2188_v50, %v5584_v45  ;;  %v3012_v58 = vadd.f32 %v3011_v5, %v5866_v54  ;;  %v2190_v0 = vpop.f32.mrb[239].mxu1 }
 0x31f   : > { %v2479_v60 = vmax.f32 %v2185_v16, %v2187_v20  ;;  %v2191_v14 = vadd.f32 %v2190_v0, %v5588_v49  ;;  %3274 = vmatmul.mubr.bf16.gmra.mrb[104].mxu0 %v2691_v51 }
 0x320   : > { %v3525_v7 = vmax.f32 %v3010_v55, %v3012_v58  ;;  %4719 = vmatmul.mubr.bf16.gmra.mrb[88].mxu1 %v3635_v12  ;;  %3283 = vmatprep.mubr.bf16.mxu0 %v4900_v3 }
 0x321   : > { %v2480_v1 = vmax.f32 %v2189_v57, %v2191_v14  ;;  %4722 = vmatprep.mubr.bf16.mxu1 %v3636_v35  ;;  %v2607_v61 = vmax.f32 %v2479_v60, 0.0 }
 0x322   : > { %v3637_v38 = vpack.c.bf16 %v3525_v7, %v3524_v56  ;;  %v3015_v4 = vpop.f32.mrb[0].mxu0 }
 0x323   : > { %v2608_v62 = vmax.f32 %v2480_v1, 0.0  ;;  %v3016_v40 = vadd.f32 %v3015_v4, %v5862_v53  ;;  %v2194_v63 = vpop.f32.mrb[240].mxu1  ;;  %v3017_v46 = vpop.f32.mrb[1].mxu0 }
 0x324   : > { %v2195_v6 = vadd.f32 %v2194_v63, %v5584_v45  ;;  %v3018_v8 = vadd.f32 %v3017_v46, %v5866_v54  ;;  %v2196_v11 = vpop.f32.mrb[241].mxu1  ;;  %v3019_v9 = vpop.f32.mrb[2].mxu0 }
 0x325   : > { %v2692_v13 = vpack.c.bf16 %v2608_v62, %v2607_v61  ;;  %v2197_v12 = vadd.f32 %v2196_v11, %v5588_v49  ;;  %v3020_v48 = vadd.f32 %v3019_v9, %v5862_v53  ;;  %v2198_v15 = vpop.f32.mrb[242].mxu1  ;;  %v3021_v44 = vpop.f32.mrb[3].mxu0 }
 0x326   : > { %v3526_v19 = vmax.f32 %v3016_v40, %v3018_v8  ;;  %v2199_v17 = vadd.f32 %v2198_v15, %v5584_v45  ;;  %v3022_v37 = vadd.f32 %v3021_v44, %v5866_v54  ;;  %v2200_v18 = vpop.f32.mrb[243].mxu1 }
 0x327   : > { %v2481_v21 = vmax.f32 %v2195_v6, %v2197_v12  ;;  %v2201_v32 = vadd.f32 %v2200_v18, %v5588_v49  ;;  %3284 = vmatmul.mubr.bf16.gmra.mrb[108].mxu0 %v2692_v13 }
 0x328   : > { %v3527_v25 = vmax.f32 %v3020_v48, %v3022_v37  ;;  %4723 = vmatmul.mubr.bf16.gmra.mrb[92].mxu1 %v3637_v38  ;;  %3293 = vmatprep.mubr.bf16.mxu0 %v4900_v3 }
 0x329   : > { %v2482_v22 = vmax.f32 %v2199_v17, %v2201_v32  ;;  %v2609_v23 = vmax.f32 %v2481_v21, 0.0 }
 0x32a   : > { %v3025_v24 = vpop.f32.mrb[4].mxu0  ;;  %v3638_v59 = vpack.c.bf16 %v3527_v25, %v3526_v19 }
 0x32b   : > { %v2610_v31 = vmax.f32 %v2482_v22, 0.0  ;;  %v3026_v26 = vadd.f32 %v3025_v24, %v5862_v53  ;;  %v2204_v27 = vpop.f32.mrb[244].mxu1  ;;  %v3027_v33 = vpop.f32.mrb[5].mxu0 }
 0x32c   : > { %v2205_v36 = vadd.f32 %v2204_v27, %v5584_v45  ;;  %v3028_v28 = vadd.f32 %v3027_v33, %v5866_v54  ;;  %v2206_v29 = vpop.f32.mrb[245].mxu1  ;;  %v3029_v2 = vpop.f32.mrb[6].mxu0  ;;  %4726 = vmatprep.mubr.bf16.mxu1 %v3638_v59 }
 0x32d   : > { %v2693_v30 = vpack.c.bf16 %v2610_v31, %v2609_v23  ;;  %v2207_v35 = vadd.f32 %v2206_v29, %v5588_v49  ;;  %v3030_v39 = vadd.f32 %v3029_v2, %v5862_v53  ;;  %v2208_v41 = vpop.f32.mrb[246].mxu1  ;;  %v3031_v47 = vpop.f32.mrb[7].mxu0 }
 0x32e   : > { %v3528_v43 = vmax.f32 %v3026_v26, %v3028_v28  ;;  %v2209_v52 = vadd.f32 %v2208_v41, %v5584_v45  ;;  %v3032_v16 = vadd.f32 %v3031_v47, %v5866_v54  ;;  %v2210_v42 = vpop.f32.mrb[247].mxu1 }
 0x32f   : > { %v2483_v34 = vmax.f32 %v2205_v36, %v2207_v35  ;;  %v2211_v10 = vadd.f32 %v2210_v42, %v5588_v49  ;;  %3294 = vmatmul.mubr.bf16.gmra.mrb[112].mxu0 %v2693_v30 }
 0x330   : > { %v3529_v51 = vmax.f32 %v3030_v39, %v3032_v16  ;;  %3303 = vmatprep.mubr.bf16.mxu0 %v4900_v3 }
 0x331   : > { %v2484_v20 = vmax.f32 %v2209_v52, %v2211_v10  ;;  %v2611_v5 = vmax.f32 %v2483_v34, 0.0 }
 0x332   : > { %v3639_v55 = vpack.c.bf16 %v3529_v51, %v3528_v43  ;;  %v3035_v50 = vpop.f32.mrb[8].mxu0 }
 0x333   : > { %v2612_v56 = vmax.f32 %v2484_v20, 0.0  ;;  %v3036_v57 = vadd.f32 %v3035_v50, %v5862_v53  ;;  %v2214_v58 = vpop.f32.mrb[248].mxu1  ;;  %v3037_v0 = vpop.f32.mrb[9].mxu0 }
 0x334   : > { %v2215_v60 = vadd.f32 %v2214_v58, %v5584_v45  ;;  %v3038_v14 = vadd.f32 %v3037_v0, %v5866_v54  ;;  %v2216_v7 = vpop.f32.mrb[249].mxu1  ;;  %v3039_v1 = vpop.f32.mrb[10].mxu0  ;;  %4727 = vmatmul.mubr.bf16.gmra.mrb[96].mxu1 %v3639_v55 }
 0x335   : > { %v2694_v38 = vpack.c.bf16 %v2612_v56, %v2611_v5  ;;  %v2217_v4 = vadd.f32 %v2216_v7, %v5588_v49  ;;  %v3040_v61 = vadd.f32 %v3039_v1, %v5862_v53  ;;  %v2218_v62 = vpop.f32.mrb[250].mxu1  ;;  %v3041_v40 = vpop.f32.mrb[11].mxu0 }
 0x336   : > { %v3530_v63 = vmax.f32 %v3036_v57, %v3038_v14  ;;  %v2219_v46 = vadd.f32 %v2218_v62, %v5584_v45  ;;  %v3042_v6 = vadd.f32 %v3041_v40, %v5866_v54  ;;  %v2220_v8 = vpop.f32.mrb[251].mxu1 }
 0x337   : > { %v2485_v11 = vmax.f32 %v2215_v60, %v2217_v4  ;;  %v2221_v9 = vadd.f32 %v2220_v8, %v5588_v49  ;;  %3304 = vmatmul.mubr.bf16.gmra.mrb[116].mxu0 %v2694_v38 }
 0x338   : > { %v3531_v13 = vmax.f32 %v3040_v61, %v3042_v6  ;;  %3313 = vmatprep.mubr.bf16.mxu0 %v4900_v3 }
 0x339   : > { %v2486_v12 = vmax.f32 %v2219_v46, %v2221_v9  ;;  %v2613_v44 = vmax.f32 %v2485_v11, 0.0 }
 0x33a   : > { %v3045_v48 = vpop.f32.mrb[12].mxu0  ;;  %v3640_v15 = vpack.c.bf16 %v3531_v13, %v3530_v63 }
 0x33b   : > { %v2614_v19 = vmax.f32 %v2486_v12, 0.0  ;;  %v3046_v17 = vadd.f32 %v3045_v48, %v5862_v53  ;;  %v2224_v37 = vpop.f32.mrb[252].mxu1  ;;  %v3047_v18 = vpop.f32.mrb[13].mxu0 }
 0x33c   : > { %v2225_v21 = vadd.f32 %v2224_v37, %v5584_v45  ;;  %v3048_v32 = vadd.f32 %v3047_v18, %v5866_v54  ;;  %v2226_v25 = vpop.f32.mrb[253].mxu1  ;;  %v3049_v22 = vpop.f32.mrb[14].mxu0  ;;  %4730 = vmatprep.mubr.bf16.mxu1 %v3640_v15 }
 0x33d   : > { %v2695_v24 = vpack.c.bf16 %v2614_v19, %v2613_v44  ;;  %v2227_v59 = vadd.f32 %v2226_v25, %v5588_v49  ;;  %v3050_v23 = vadd.f32 %v3049_v22, %v5862_v53  ;;  %v2228_v31 = vpop.f32.mrb[254].mxu1  ;;  %v3051_v26 = vpop.f32.mrb[15].mxu0 }
 0x33e   : > { %v3532_v27 = vmax.f32 %v3046_v17, %v3048_v32  ;;  %v2229_v33 = vadd.f32 %v2228_v31, %v5584_v45  ;;  %v3052_v36 = vadd.f32 %v3051_v26, %v5866_v54  ;;  %v2230_v28 = vpop.f32.mrb[255].mxu1 }
 0x33f   : > { %v2487_v29 = vmax.f32 %v2225_v21, %v2227_v59  ;;  %v2231_v2 = vadd.f32 %v2230_v28, %v5588_v49  ;;  %3314 = vmatmul.mubr.bf16.gmra.mrb[120].mxu0 %v2695_v24 }
 0x340   : > { %v3533_v30 = vmax.f32 %v3050_v23, %v3052_v36  ;;  %3323 = vmatprep.mubr.bf16.mxu0 %v4900_v3 }
 0x341   : > { %v2488_v35 = vmax.f32 %v2229_v33, %v2231_v2  ;;  %v2615_v47 = vmax.f32 %v2487_v29, 0.0 }
 0x342   : > { %v3641_v39 = vpack.c.bf16 %v3533_v30, %v3532_v27  ;;  %v3055_v41 = vpop.f32.mrb[16].mxu0 }
 0x343   : > { %v2616_v43 = vmax.f32 %v2488_v35, 0.0  ;;  %v3056_v52 = vadd.f32 %v3055_v41, %v5862_v53  ;;  %v2234_v16 = vpop.f32.mrb[0].mxu1  ;;  %v3057_v42 = vpop.f32.mrb[17].mxu0 }
 0x344   : > { %v2235_v34 = vadd.f32 %v2234_v16, %v5584_v45  ;;  %v3058_v10 = vadd.f32 %v3057_v42, %v5866_v54  ;;  %v2236_v51 = vpop.f32.mrb[1].mxu1  ;;  %v3059_v20 = vpop.f32.mrb[18].mxu0  ;;  %4731 = vmatmul.mubr.bf16.gmra.mrb[100].mxu1 %v3641_v39 }
 0x345   : > { %v2696_v55 = vpack.c.bf16 %v2616_v43, %v2615_v47  ;;  %v2237_v50 = vadd.f32 %v2236_v51, %v5588_v49  ;;  %v3060_v5 = vadd.f32 %v3059_v20, %v5862_v53  ;;  %v2238_v56 = vpop.f32.mrb[2].mxu1  ;;  %v3061_v57 = vpop.f32.mrb[19].mxu0 }
 0x346   : > { %v3534_v58 = vmax.f32 %v3056_v52, %v3058_v10  ;;  %v2239_v0 = vadd.f32 %v2238_v56, %v5584_v45  ;;  %v3062_v60 = vadd.f32 %v3061_v57, %v5866_v54  ;;  %v2240_v14 = vpop.f32.mrb[3].mxu1 }
 0x347   : > { %v2489_v7 = vmax.f32 %v2235_v34, %v2237_v50  ;;  %v2241_v1 = vadd.f32 %v2240_v14, %v5588_v49  ;;  %3324 = vmatmul.mubr.bf16.gmra.mrb[124].mxu0 %v2696_v55 }
 0x348   : > { %v3535_v38 = vmax.f32 %v3060_v5, %v3062_v60  ;;  %3333 = vmatprep.mubr.bf16.mxu0 %v4900_v3 }
 0x349   : > { %v2490_v4 = vmax.f32 %v2239_v0, %v2241_v1  ;;  %v2617_v40 = vmax.f32 %v2489_v7, 0.0 }
 0x34a   : > { %v3065_v61 = vpop.f32.mrb[20].mxu0  ;;  %v3642_v62 = vpack.c.bf16 %v3535_v38, %v3534_v58 }
 0x34b   : > { %v2618_v63 = vmax.f32 %v2490_v4, 0.0  ;;  %v3066_v46 = vadd.f32 %v3065_v61, %v5862_v53  ;;  %v2244_v6 = vpop.f32.mrb[4].mxu1  ;;  %v3067_v8 = vpop.f32.mrb[21].mxu0 }
 0x34c   : > { %v2245_v11 = vadd.f32 %v2244_v6, %v5584_v45  ;;  %v3068_v9 = vadd.f32 %v3067_v8, %v5866_v54  ;;  %v2246_v13 = vpop.f32.mrb[5].mxu1  ;;  %v3069_v12 = vpop.f32.mrb[22].mxu0  ;;  %4734 = vmatprep.mubr.bf16.mxu1 %v3642_v62 }
 0x34d   : > { %v2697_v48 = vpack.c.bf16 %v2618_v63, %v2617_v40  ;;  %v2247_v15 = vadd.f32 %v2246_v13, %v5588_v49  ;;  %v3070_v44 = vadd.f32 %v3069_v12, %v5862_v53  ;;  %v2248_v19 = vpop.f32.mrb[6].mxu1  ;;  %v3071_v17 = vpop.f32.mrb[23].mxu0 }
 0x34e   : > { %v3536_v37 = vmax.f32 %v3066_v46, %v3068_v9  ;;  %v2249_v18 = vadd.f32 %v2248_v19, %v5584_v45  ;;  %v3072_v21 = vadd.f32 %v3071_v17, %v5866_v54  ;;  %v2250_v32 = vpop.f32.mrb[7].mxu1 }
 0x34f   : > { %v2491_v25 = vmax.f32 %v2245_v11, %v2247_v15  ;;  %v2251_v22 = vadd.f32 %v2250_v32, %v5588_v49  ;;  %3334 = vmatmul.mubr.bf16.gmra.mrb[128].mxu0 %v2697_v48 }
 0x350   : > { %v3537_v24 = vmax.f32 %v3070_v44, %v3072_v21  ;;  %3343 = vmatprep.mubr.bf16.mxu0 %v4900_v3 }
 0x351   : > { %v2492_v59 = vmax.f32 %v2249_v18, %v2251_v22  ;;  %v2619_v26 = vmax.f32 %v2491_v25, 0.0 }
 0x352   : > { %v3643_v23 = vpack.c.bf16 %v3537_v24, %v3536_v37  ;;  %v3075_v31 = vpop.f32.mrb[24].mxu0 }
 0x353   : > { %v2620_v27 = vmax.f32 %v2492_v59, 0.0  ;;  %v3076_v33 = vadd.f32 %v3075_v31, %v5862_v53  ;;  %v2254_v36 = vpop.f32.mrb[8].mxu1  ;;  %v3077_v28 = vpop.f32.mrb[25].mxu0 }
 0x354   : > { %v2255_v29 = vadd.f32 %v2254_v36, %v5584_v45  ;;  %v3078_v2 = vadd.f32 %v3077_v28, %v5866_v54  ;;  %v2256_v30 = vpop.f32.mrb[9].mxu1  ;;  %v3079_v35 = vpop.f32.mrb[26].mxu0  ;;  %4735 = vmatmul.mubr.bf16.gmra.mrb[104].mxu1 %v3643_v23 }
 0x355   : > { %v2698_v39 = vpack.c.bf16 %v2620_v27, %v2619_v26  ;;  %v2257_v41 = vadd.f32 %v2256_v30, %v5588_v49  ;;  %v3080_v47 = vadd.f32 %v3079_v35, %v5862_v53  ;;  %v2258_v43 = vpop.f32.mrb[10].mxu1  ;;  %v3081_v52 = vpop.f32.mrb[27].mxu0 }
 0x356   : > { %v3538_v16 = vmax.f32 %v3076_v33, %v3078_v2  ;;  %v2259_v42 = vadd.f32 %v2258_v43, %v5584_v45  ;;  %v3082_v34 = vadd.f32 %v3081_v52, %v5866_v54  ;;  %v2260_v10 = vpop.f32.mrb[11].mxu1 }
 0x357   : > { %v2493_v51 = vmax.f32 %v2255_v29, %v2257_v41  ;;  %v2261_v20 = vadd.f32 %v2260_v10, %v5588_v49  ;;  %3344 = vmatmul.mubr.bf16.gmra.mrb[132].mxu0 %v2698_v39 }
 0x358   : > { %v3539_v55 = vmax.f32 %v3080_v47, %v3082_v34  ;;  %3353 = vmatprep.mubr.bf16.mxu0 %v4900_v3 }
 0x359   : > { %v2494_v50 = vmax.f32 %v2259_v42, %v2261_v20  ;;  %v2621_v57 = vmax.f32 %v2493_v51, 0.0 }
 0x35a   : > { %v3085_v5 = vpop.f32.mrb[28].mxu0  ;;  %v3644_v56 = vpack.c.bf16 %v3539_v55, %v3538_v16 }
 0x35b   : > { %v2622_v58 = vmax.f32 %v2494_v50, 0.0  ;;  %v3086_v0 = vadd.f32 %v3085_v5, %v5862_v53  ;;  %v2264_v60 = vpop.f32.mrb[12].mxu1  ;;  %v3087_v14 = vpop.f32.mrb[29].mxu0 }
 0x35c   : > { %v2265_v7 = vadd.f32 %v2264_v60, %v5584_v45  ;;  %v3088_v1 = vadd.f32 %v3087_v14, %v5866_v54  ;;  %v2266_v38 = vpop.f32.mrb[13].mxu1  ;;  %v3089_v4 = vpop.f32.mrb[30].mxu0  ;;  %4738 = vmatprep.mubr.bf16.mxu1 %v3644_v56 }
 0x35d   : > { %v2699_v61 = vpack.c.bf16 %v2622_v58, %v2621_v57  ;;  %v2267_v62 = vadd.f32 %v2266_v38, %v5588_v49  ;;  %v3090_v40 = vadd.f32 %v3089_v4, %v5862_v53  ;;  %v2268_v63 = vpop.f32.mrb[14].mxu1  ;;  %v3091_v46 = vpop.f32.mrb[31].mxu0 }
 0x35e   : > { %v3540_v6 = vmax.f32 %v3086_v0, %v3088_v1  ;;  %v2269_v8 = vadd.f32 %v2268_v63, %v5584_v45  ;;  %v3092_v11 = vadd.f32 %v3091_v46, %v5866_v54  ;;  %v2270_v9 = vpop.f32.mrb[15].mxu1 }
 0x35f   : > { %v2495_v13 = vmax.f32 %v2265_v7, %v2267_v62  ;;  %v2271_v12 = vadd.f32 %v2270_v9, %v5588_v49  ;;  %3354 = vmatmul.mubr.bf16.gmra.mrb[136].mxu0 %v2699_v61 }
 0x360   : > { %v3541_v48 = vmax.f32 %v3090_v40, %v3092_v11  ;;  %3363 = vmatprep.mubr.bf16.mxu0 %v4900_v3 }
 0x361   : > { %v2496_v15 = vmax.f32 %v2269_v8, %v2271_v12  ;;  %v2623_v17 = vmax.f32 %v2495_v13, 0.0 }
 0x362   : > { %v3645_v44 = vpack.c.bf16 %v3541_v48, %v3540_v6  ;;  %v3095_v19 = vpop.f32.mrb[32].mxu0 }
 0x363   : > { %v2624_v37 = vmax.f32 %v2496_v15, 0.0  ;;  %v3096_v18 = vadd.f32 %v3095_v19, %v5862_v53  ;;  %v2274_v21 = vpop.f32.mrb[16].mxu1  ;;  %v3097_v32 = vpop.f32.mrb[33].mxu0 }
 0x364   : > { %v2275_v25 = vadd.f32 %v2274_v21, %v5584_v45  ;;  %v3098_v22 = vadd.f32 %v3097_v32, %v5866_v54  ;;  %v2276_v24 = vpop.f32.mrb[17].mxu1  ;;  %v3099_v59 = vpop.f32.mrb[34].mxu0  ;;  %4739 = vmatmul.mubr.bf16.gmra.mrb[108].mxu1 %v3645_v44 }
 0x365   : > { %v2700_v23 = vpack.c.bf16 %v2624_v37, %v2623_v17  ;;  %v2277_v31 = vadd.f32 %v2276_v24, %v5588_v49  ;;  %v3100_v26 = vadd.f32 %v3099_v59, %v5862_v53  ;;  %v2278_v27 = vpop.f32.mrb[18].mxu1  ;;  %v3101_v33 = vpop.f32.mrb[35].mxu0 }
 0x366   : > { %v3542_v36 = vmax.f32 %v3096_v18, %v3098_v22  ;;  %v2279_v28 = vadd.f32 %v2278_v27, %v5584_v45  ;;  %v3102_v29 = vadd.f32 %v3101_v33, %v5866_v54  ;;  %v2280_v2 = vpop.f32.mrb[19].mxu1 }
 0x367   : > { %v2497_v30 = vmax.f32 %v2275_v25, %v2277_v31  ;;  %v2281_v35 = vadd.f32 %v2280_v2, %v5588_v49  ;;  %3364 = vmatmul.mubr.bf16.gmra.mrb[140].mxu0 %v2700_v23 }
 0x368   : > { %v3543_v39 = vmax.f32 %v3100_v26, %v3102_v29  ;;  %3373 = vmatprep.mubr.bf16.mxu0 %v4900_v3 }
 0x369   : > { %v2498_v41 = vmax.f32 %v2279_v28, %v2281_v35  ;;  %v2625_v52 = vmax.f32 %v2497_v30, 0.0 }
 0x36a   : > { %v3105_v47 = vpop.f32.mrb[36].mxu0  ;;  %v3646_v43 = vpack.c.bf16 %v3543_v39, %v3542_v36 }
 0x36b   : > { %v2626_v16 = vmax.f32 %v2498_v41, 0.0  ;;  %v3106_v42 = vadd.f32 %v3105_v47, %v5862_v53  ;;  %v2284_v34 = vpop.f32.mrb[20].mxu1  ;;  %v3107_v10 = vpop.f32.mrb[37].mxu0 }
 0x36c   : > { %v2285_v51 = vadd.f32 %v2284_v34, %v5584_v45  ;;  %v3108_v20 = vadd.f32 %v3107_v10, %v5866_v54  ;;  %v2286_v55 = vpop.f32.mrb[21].mxu1  ;;  %v3109_v50 = vpop.f32.mrb[38].mxu0  ;;  %4742 = vmatprep.mubr.bf16.mxu1 %v3646_v43 }
 0x36d   : > { %v2701_v5 = vpack.c.bf16 %v2626_v16, %v2625_v52  ;;  %v2287_v56 = vadd.f32 %v2286_v55, %v5588_v49  ;;  %v3110_v57 = vadd.f32 %v3109_v50, %v5862_v53  ;;  %v2288_v58 = vpop.f32.mrb[22].mxu1  ;;  %v3111_v0 = vpop.f32.mrb[39].mxu0 }
 0x36e   : > { %v3544_v60 = vmax.f32 %v3106_v42, %v3108_v20  ;;  %v2289_v14 = vadd.f32 %v2288_v58, %v5584_v45  ;;  %v3112_v7 = vadd.f32 %v3111_v0, %v5866_v54  ;;  %v2290_v1 = vpop.f32.mrb[23].mxu1 }
 0x36f   : > { %v2499_v38 = vmax.f32 %v2285_v51, %v2287_v56  ;;  %v2291_v4 = vadd.f32 %v2290_v1, %v5588_v49  ;;  %3374 = vmatmul.mubr.bf16.gmra.mrb[144].mxu0 %v2701_v5 }
 0x370   : > { %v3545_v61 = vmax.f32 %v3110_v57, %v3112_v7  ;;  %3383 = vmatprep.mubr.bf16.mxu0 %v4900_v3 }
 0x371   : > { %v2500_v62 = vmax.f32 %v2289_v14, %v2291_v4  ;;  %v2627_v46 = vmax.f32 %v2499_v38, 0.0 }
 0x372   : > { %v3647_v40 = vpack.c.bf16 %v3545_v61, %v3544_v60  ;;  %v3115_v63 = vpop.f32.mrb[40].mxu0 }
 0x373   : > { %v2628_v6 = vmax.f32 %v2500_v62, 0.0  ;;  %v3116_v8 = vadd.f32 %v3115_v63, %v5862_v53  ;;  %v2294_v11 = vpop.f32.mrb[24].mxu1  ;;  %v3117_v9 = vpop.f32.mrb[41].mxu0 }
 0x374   : > { %v2295_v13 = vadd.f32 %v2294_v11, %v5584_v45  ;;  %v3118_v12 = vadd.f32 %v3117_v9, %v5866_v54  ;;  %v2296_v48 = vpop.f32.mrb[25].mxu1  ;;  %v3119_v15 = vpop.f32.mrb[42].mxu0  ;;  %4743 = vmatmul.mubr.bf16.gmra.mrb[112].mxu1 %v3647_v40 }
 0x375   : > { %v2702_v44 = vpack.c.bf16 %v2628_v6, %v2627_v46  ;;  %v2297_v19 = vadd.f32 %v2296_v48, %v5588_v49  ;;  %v3120_v17 = vadd.f32 %v3119_v15, %v5862_v53  ;;  %v2298_v37 = vpop.f32.mrb[26].mxu1  ;;  %v3121_v18 = vpop.f32.mrb[43].mxu0 }
 0x376   : > { %v3546_v21 = vmax.f32 %v3116_v8, %v3118_v12  ;;  %v2299_v32 = vadd.f32 %v2298_v37, %v5584_v45  ;;  %v3122_v25 = vadd.f32 %v3121_v18, %v5866_v54  ;;  %v2300_v22 = vpop.f32.mrb[27].mxu1 }
 0x377   : > { %v2501_v24 = vmax.f32 %v2295_v13, %v2297_v19  ;;  %v2301_v59 = vadd.f32 %v2300_v22, %v5588_v49  ;;  %3384 = vmatmul.mubr.bf16.gmra.mrb[148].mxu0 %v2702_v44 }
 0x378   : > { %v3547_v23 = vmax.f32 %v3120_v17, %v3122_v25  ;;  %3393 = vmatprep.mubr.bf16.mxu0 %v4900_v3 }
 0x379   : > { %v2502_v31 = vmax.f32 %v2299_v32, %v2301_v59  ;;  %v2629_v33 = vmax.f32 %v2501_v24, 0.0 }
 0x37a   : > { %v3125_v26 = vpop.f32.mrb[44].mxu0  ;;  %v3648_v27 = vpack.c.bf16 %v3547_v23, %v3546_v21 }
 0x37b   : > { %v2630_v36 = vmax.f32 %v2502_v31, 0.0  ;;  %v3126_v28 = vadd.f32 %v3125_v26, %v5862_v53  ;;  %v2304_v29 = vpop.f32.mrb[28].mxu1  ;;  %v3127_v2 = vpop.f32.mrb[45].mxu0 }
 0x37c   : > { %v2305_v30 = vadd.f32 %v2304_v29, %v5584_v45  ;;  %v3128_v35 = vadd.f32 %v3127_v2, %v5866_v54  ;;  %v2306_v39 = vpop.f32.mrb[29].mxu1  ;;  %v3129_v41 = vpop.f32.mrb[46].mxu0  ;;  %4746 = vmatprep.mubr.bf16.mxu1 %v3648_v27 }
 0x37d   : > { %v2703_v47 = vpack.c.bf16 %v2630_v36, %v2629_v33  ;;  %v2307_v43 = vadd.f32 %v2306_v39, %v5588_v49  ;;  %v3130_v52 = vadd.f32 %v3129_v41, %v5862_v53  ;;  %v2308_v16 = vpop.f32.mrb[30].mxu1  ;;  %v3131_v42 = vpop.f32.mrb[47].mxu0 }
 0x37e   : > { %v3548_v34 = vmax.f32 %v3126_v28, %v3128_v35  ;;  %v2309_v10 = vadd.f32 %v2308_v16, %v5584_v45  ;;  %v3132_v51 = vadd.f32 %v3131_v42, %v5866_v54  ;;  %v2310_v20 = vpop.f32.mrb[31].mxu1 }
 0x37f   : > { %v2503_v55 = vmax.f32 %v2305_v30, %v2307_v43  ;;  %v2311_v50 = vadd.f32 %v2310_v20, %v5588_v49  ;;  %3394 = vmatmul.mubr.bf16.gmra.mrb[152].mxu0 %v2703_v47 }
 0x380   : > { %v3549_v5 = vmax.f32 %v3130_v52, %v3132_v51  ;;  %3403 = vmatprep.mubr.bf16.mxu0 %v4900_v3 }
 0x381   : > { %v2504_v56 = vmax.f32 %v2309_v10, %v2311_v50  ;;  %v2631_v0 = vmax.f32 %v2503_v55, 0.0 }
 0x382   : > { %v3649_v57 = vpack.c.bf16 %v3549_v5, %v3548_v34  ;;  %v3135_v58 = vpop.f32.mrb[48].mxu0 }
 0x383   : > { %v2632_v60 = vmax.f32 %v2504_v56, 0.0  ;;  %v3136_v14 = vadd.f32 %v3135_v58, %v5862_v53  ;;  %v2314_v7 = vpop.f32.mrb[32].mxu1  ;;  %v3137_v1 = vpop.f32.mrb[49].mxu0 }
 0x384   : > { %v2315_v38 = vadd.f32 %v2314_v7, %v5584_v45  ;;  %v3138_v4 = vadd.f32 %v3137_v1, %v5866_v54  ;;  %v2316_v61 = vpop.f32.mrb[33].mxu1  ;;  %v3139_v62 = vpop.f32.mrb[50].mxu0  ;;  %4747 = vmatmul.mubr.bf16.gmra.mrb[116].mxu1 %v3649_v57 }
 0x385   : > { %v2704_v40 = vpack.c.bf16 %v2632_v60, %v2631_v0  ;;  %v2317_v63 = vadd.f32 %v2316_v61, %v5588_v49  ;;  %v3140_v46 = vadd.f32 %v3139_v62, %v5862_v53  ;;  %v2318_v6 = vpop.f32.mrb[34].mxu1  ;;  %v3141_v8 = vpop.f32.mrb[51].mxu0 }
 0x386   : > { %v3550_v11 = vmax.f32 %v3136_v14, %v3138_v4  ;;  %v2319_v9 = vadd.f32 %v2318_v6, %v5584_v45  ;;  %v3142_v13 = vadd.f32 %v3141_v8, %v5866_v54  ;;  %v2320_v12 = vpop.f32.mrb[35].mxu1 }
 0x387   : > { %v2505_v48 = vmax.f32 %v2315_v38, %v2317_v63  ;;  %v2321_v15 = vadd.f32 %v2320_v12, %v5588_v49  ;;  %3404 = vmatmul.mubr.bf16.gmra.mrb[156].mxu0 %v2704_v40 }
 0x388   : > { %v3551_v44 = vmax.f32 %v3140_v46, %v3142_v13  ;;  %3413 = vmatprep.mubr.bf16.mxu0 %v4900_v3 }
 0x389   : > { %v2506_v19 = vmax.f32 %v2319_v9, %v2321_v15  ;;  %v2633_v18 = vmax.f32 %v2505_v48, 0.0 }
 0x38a   : > { %v3145_v17 = vpop.f32.mrb[52].mxu0  ;;  %v3650_v37 = vpack.c.bf16 %v3551_v44, %v3550_v11 }
 0x38b   : > { %v2634_v21 = vmax.f32 %v2506_v19, 0.0  ;;  %v3146_v32 = vadd.f32 %v3145_v17, %v5862_v53  ;;  %v2324_v25 = vpop.f32.mrb[36].mxu1  ;;  %v3147_v22 = vpop.f32.mrb[53].mxu0 }
 0x38c   : > { %v2325_v24 = vadd.f32 %v2324_v25, %v5584_v45  ;;  %v3148_v59 = vadd.f32 %v3147_v22, %v5866_v54  ;;  %v2326_v23 = vpop.f32.mrb[37].mxu1  ;;  %v3149_v31 = vpop.f32.mrb[54].mxu0  ;;  %4750 = vmatprep.mubr.bf16.mxu1 %v3650_v37 }
 0x38d   : > { %v2705_v26 = vpack.c.bf16 %v2634_v21, %v2633_v18  ;;  %v2327_v27 = vadd.f32 %v2326_v23, %v5588_v49  ;;  %v3150_v33 = vadd.f32 %v3149_v31, %v5862_v53  ;;  %v2328_v36 = vpop.f32.mrb[38].mxu1  ;;  %v3151_v28 = vpop.f32.mrb[55].mxu0 }
 0x38e   : > { %v3552_v29 = vmax.f32 %v3146_v32, %v3148_v59  ;;  %v2329_v2 = vadd.f32 %v2328_v36, %v5584_v45  ;;  %v3152_v30 = vadd.f32 %v3151_v28, %v5866_v54  ;;  %v2330_v35 = vpop.f32.mrb[39].mxu1 }
 0x38f   : > { %v2507_v39 = vmax.f32 %v2325_v24, %v2327_v27  ;;  %v2331_v41 = vadd.f32 %v2330_v35, %v5588_v49  ;;  %3414 = vmatmul.mubr.bf16.gmra.mrb[160].mxu0 %v2705_v26 }
 0x390   : > { %v3553_v47 = vmax.f32 %v3150_v33, %v3152_v30  ;;  %3423 = vmatprep.mubr.bf16.mxu0 %v4900_v3 }
 0x391   : > { %v2508_v43 = vmax.f32 %v2329_v2, %v2331_v41  ;;  %v2635_v42 = vmax.f32 %v2507_v39, 0.0 }
 0x392   : > { %v3651_v52 = vpack.c.bf16 %v3553_v47, %v3552_v29  ;;  %v3155_v16 = vpop.f32.mrb[56].mxu0 }
 0x393   : > { %v2636_v34 = vmax.f32 %v2508_v43, 0.0  ;;  %v3156_v10 = vadd.f32 %v3155_v16, %v5862_v53  ;;  %v2334_v51 = vpop.f32.mrb[40].mxu1  ;;  %v3157_v20 = vpop.f32.mrb[57].mxu0 }
 0x394   : > { %v2335_v55 = vadd.f32 %v2334_v51, %v5584_v45  ;;  %v3158_v50 = vadd.f32 %v3157_v20, %v5866_v54  ;;  %v2336_v5 = vpop.f32.mrb[41].mxu1  ;;  %v3159_v56 = vpop.f32.mrb[58].mxu0  ;;  %4751 = vmatmul.mubr.bf16.gmra.mrb[120].mxu1 %v3651_v52 }
 0x395   : > { %v2706_v57 = vpack.c.bf16 %v2636_v34, %v2635_v42  ;;  %v2337_v58 = vadd.f32 %v2336_v5, %v5588_v49  ;;  %v3160_v0 = vadd.f32 %v3159_v56, %v5862_v53  ;;  %v2338_v60 = vpop.f32.mrb[42].mxu1  ;;  %v3161_v14 = vpop.f32.mrb[59].mxu0 }
 0x396   : > { %v3554_v7 = vmax.f32 %v3156_v10, %v3158_v50  ;;  %v2339_v1 = vadd.f32 %v2338_v60, %v5584_v45  ;;  %v3162_v38 = vadd.f32 %v3161_v14, %v5866_v54  ;;  %v2340_v4 = vpop.f32.mrb[43].mxu1 }
 0x397   : > { %v2509_v61 = vmax.f32 %v2335_v55, %v2337_v58  ;;  %v2341_v62 = vadd.f32 %v2340_v4, %v5588_v49  ;;  %3424 = vmatmul.mubr.bf16.gmra.mrb[164].mxu0 %v2706_v57 }
 0x398   : > { %v3555_v40 = vmax.f32 %v3160_v0, %v3162_v38  ;;  %3433 = vmatprep.mubr.bf16.mxu0 %v4900_v3 }
 0x399   : > { %v2510_v63 = vmax.f32 %v2339_v1, %v2341_v62  ;;  %v2637_v8 = vmax.f32 %v2509_v61, 0.0 }
 0x39a   : > { %v3165_v46 = vpop.f32.mrb[60].mxu0  ;;  %v3652_v6 = vpack.c.bf16 %v3555_v40, %v3554_v7 }
 0x39b   : > { %v2638_v11 = vmax.f32 %v2510_v63, 0.0  ;;  %v3166_v9 = vadd.f32 %v3165_v46, %v5862_v53  ;;  %v2344_v13 = vpop.f32.mrb[44].mxu1  ;;  %v3167_v12 = vpop.f32.mrb[61].mxu0 }
 0x39c   : > { %v2345_v48 = vadd.f32 %v2344_v13, %v5584_v45  ;;  %v3168_v15 = vadd.f32 %v3167_v12, %v5866_v54  ;;  %v2346_v44 = vpop.f32.mrb[45].mxu1  ;;  %v3169_v19 = vpop.f32.mrb[62].mxu0  ;;  %4754 = vmatprep.mubr.bf16.mxu1 %v3652_v6 }
 0x39d   : > { %v2707_v17 = vpack.c.bf16 %v2638_v11, %v2637_v8  ;;  %v2347_v37 = vadd.f32 %v2346_v44, %v5588_v49  ;;  %v3170_v18 = vadd.f32 %v3169_v19, %v5862_v53  ;;  %v2348_v21 = vpop.f32.mrb[46].mxu1  ;;  %v3171_v32 = vpop.f32.mrb[63].mxu0 }
 0x39e   : > { %v3556_v25 = vmax.f32 %v3166_v9, %v3168_v15  ;;  %v2349_v22 = vadd.f32 %v2348_v21, %v5584_v45  ;;  %v3172_v24 = vadd.f32 %v3171_v32, %v5866_v54  ;;  %v2350_v59 = vpop.f32.mrb[47].mxu1 }
 0x39f   : > { %v2511_v23 = vmax.f32 %v2345_v48, %v2347_v37  ;;  %v2351_v31 = vadd.f32 %v2350_v59, %v5588_v49  ;;  %3434 = vmatmul.mubr.bf16.gmra.mrb[168].mxu0 %v2707_v17 }
 0x3a0   : > { %v3557_v26 = vmax.f32 %v3170_v18, %v3172_v24  ;;  %3443 = vmatprep.mubr.bf16.mxu0 %v4900_v3 }
 0x3a1   : > { %v2512_v27 = vmax.f32 %v2349_v22, %v2351_v31  ;;  %v2639_v28 = vmax.f32 %v2511_v23, 0.0 }
 0x3a2   : > { %v3653_v33 = vpack.c.bf16 %v3557_v26, %v3556_v25  ;;  %v3175_v36 = vpop.f32.mrb[64].mxu0 }
 0x3a3   : > { %v2640_v29 = vmax.f32 %v2512_v27, 0.0  ;;  %v3176_v2 = vadd.f32 %v3175_v36, %v5862_v53  ;;  %v2354_v30 = vpop.f32.mrb[48].mxu1  ;;  %v3177_v35 = vpop.f32.mrb[65].mxu0 }
 0x3a4   : > { %v2355_v39 = vadd.f32 %v2354_v30, %v5584_v45  ;;  %v3178_v41 = vadd.f32 %v3177_v35, %v5866_v54  ;;  %v2356_v47 = vpop.f32.mrb[49].mxu1  ;;  %v3179_v43 = vpop.f32.mrb[66].mxu0  ;;  %4755 = vmatmul.mubr.bf16.gmra.mrb[124].mxu1 %v3653_v33 }
 0x3a5   : > { %v2708_v52 = vpack.c.bf16 %v2640_v29, %v2639_v28  ;;  %v2357_v16 = vadd.f32 %v2356_v47, %v5588_v49  ;;  %v3180_v42 = vadd.f32 %v3179_v43, %v5862_v53  ;;  %v2358_v34 = vpop.f32.mrb[50].mxu1  ;;  %v3181_v10 = vpop.f32.mrb[67].mxu0 }
 0x3a6   : > { %v3558_v51 = vmax.f32 %v3176_v2, %v3178_v41  ;;  %v2359_v20 = vadd.f32 %v2358_v34, %v5584_v45  ;;  %v3182_v55 = vadd.f32 %v3181_v10, %v5866_v54  ;;  %v2360_v50 = vpop.f32.mrb[51].mxu1 }
 0x3a7   : > { %v2513_v5 = vmax.f32 %v2355_v39, %v2357_v16  ;;  %v2361_v56 = vadd.f32 %v2360_v50, %v5588_v49  ;;  %3444 = vmatmul.mubr.bf16.gmra.mrb[172].mxu0 %v2708_v52 }
 0x3a8   : > { %v3559_v57 = vmax.f32 %v3180_v42, %v3182_v55  ;;  %3453 = vmatprep.mubr.bf16.mxu0 %v4900_v3 }
 0x3a9   : > { %v2514_v58 = vmax.f32 %v2359_v20, %v2361_v56  ;;  %v2641_v14 = vmax.f32 %v2513_v5, 0.0 }
 0x3aa   : > { %v3185_v0 = vpop.f32.mrb[68].mxu0  ;;  %v3654_v60 = vpack.c.bf16 %v3559_v57, %v3558_v51 }
 0x3ab   : > { %v2642_v7 = vmax.f32 %v2514_v58, 0.0  ;;  %v3186_v1 = vadd.f32 %v3185_v0, %v5862_v53  ;;  %v2364_v38 = vpop.f32.mrb[52].mxu1  ;;  %v3187_v4 = vpop.f32.mrb[69].mxu0 }
 0x3ac   : > { %v2365_v61 = vadd.f32 %v2364_v38, %v5584_v45  ;;  %v3188_v62 = vadd.f32 %v3187_v4, %v5866_v54  ;;  %v2366_v40 = vpop.f32.mrb[53].mxu1  ;;  %v3189_v63 = vpop.f32.mrb[70].mxu0  ;;  %4758 = vmatprep.mubr.bf16.mxu1 %v3654_v60 }
 0x3ad   : > { %v2709_v46 = vpack.c.bf16 %v2642_v7, %v2641_v14  ;;  %v2367_v6 = vadd.f32 %v2366_v40, %v5588_v49  ;;  %v3190_v8 = vadd.f32 %v3189_v63, %v5862_v53  ;;  %v2368_v11 = vpop.f32.mrb[54].mxu1  ;;  %v3191_v9 = vpop.f32.mrb[71].mxu0 }
 0x3ae   : > { %v3560_v13 = vmax.f32 %v3186_v1, %v3188_v62  ;;  %v2369_v12 = vadd.f32 %v2368_v11, %v5584_v45  ;;  %v3192_v48 = vadd.f32 %v3191_v9, %v5866_v54  ;;  %v2370_v15 = vpop.f32.mrb[55].mxu1 }
 0x3af   : > { %v2515_v44 = vmax.f32 %v2365_v61, %v2367_v6  ;;  %v2371_v19 = vadd.f32 %v2370_v15, %v5588_v49  ;;  %3454 = vmatmul.mubr.bf16.gmra.mrb[176].mxu0 %v2709_v46 }
 0x3b0   : > { %v3561_v17 = vmax.f32 %v3190_v8, %v3192_v48  ;;  %3463 = vmatprep.mubr.bf16.mxu0 %v4900_v3  ;;  %v6250_v8 = vld [vmem:[%s6771_s8] ss:$0 sm:$0xff] }
 0x3b1   : > { %v2516_v37 = vmax.f32 %v2369_v12, %v2371_v19  ;;  %v2643_v32 = vmax.f32 %v2515_v44, 0.0 }
 0x3b2   : > { %v3655_v18 = vpack.c.bf16 %v3561_v17, %v3560_v13  ;;  %v3195_v21 = vpop.f32.mrb[72].mxu0 }
 0x3b3   : > { %v2644_v25 = vmax.f32 %v2516_v37, 0.0  ;;  %v3196_v22 = vadd.f32 %v3195_v21, %v5862_v53  ;;  %v2374_v24 = vpop.f32.mrb[56].mxu1  ;;  %v3197_v59 = vpop.f32.mrb[73].mxu0 }
 0x3b4   : > { %v2375_v23 = vadd.f32 %v2374_v24, %v5584_v45  ;;  %v3198_v31 = vadd.f32 %v3197_v59, %v5866_v54  ;;  %v2376_v26 = vpop.f32.mrb[57].mxu1  ;;  %v3199_v27 = vpop.f32.mrb[74].mxu0  ;;  %4759 = vmatmul.mubr.bf16.gmra.mrb[128].mxu1 %v3655_v18 }
 0x3b5   : > { %v2710_v33 = vpack.c.bf16 %v2644_v25, %v2643_v32  ;;  %v2377_v36 = vadd.f32 %v2376_v26, %v5588_v49  ;;  %v3200_v28 = vadd.f32 %v3199_v27, %v5862_v53  ;;  %v2378_v29 = vpop.f32.mrb[58].mxu1  ;;  %v3201_v2 = vpop.f32.mrb[75].mxu0 }
 0x3b6   : > { %v3562_v30 = vmax.f32 %v3196_v22, %v3198_v31  ;;  %v2379_v35 = vadd.f32 %v2378_v29, %v5584_v45  ;;  %v3202_v39 = vadd.f32 %v3201_v2, %v5866_v54  ;;  %v2380_v41 = vpop.f32.mrb[59].mxu1 }
 0x3b7   : > { %v2517_v47 = vmax.f32 %v2375_v23, %v2377_v36  ;;  %v2381_v43 = vadd.f32 %v2380_v41, %v5588_v49  ;;  %3464 = vmatmul.mubr.bf16.gmra.mrb[180].mxu0 %v2710_v33 }
 0x3b8   : > { %v3563_v52 = vmax.f32 %v3200_v28, %v3202_v39  ;;  %3473 = vmatprep.mubr.bf16.mxu0 %v4900_v3 }
 0x3b9   : > { %v2518_v16 = vmax.f32 %v2379_v35, %v2381_v43  ;;  %v2645_v10 = vmax.f32 %v2517_v47, 0.0 }
 0x3ba   : > { %v3205_v42 = vpop.f32.mrb[76].mxu0  ;;  %v3656_v34 = vpack.c.bf16 %v3563_v52, %v3562_v30 }
 0x3bb   : > { %v2646_v51 = vmax.f32 %v2518_v16, 0.0  ;;  %v3206_v20 = vadd.f32 %v3205_v42, %v5862_v53  ;;  %v2384_v55 = vpop.f32.mrb[60].mxu1  ;;  %v3207_v50 = vpop.f32.mrb[77].mxu0 }
 0x3bc   : > { %v2385_v5 = vadd.f32 %v2384_v55, %v5584_v45  ;;  %v3208_v56 = vadd.f32 %v3207_v50, %v5866_v54  ;;  %v2386_v57 = vpop.f32.mrb[61].mxu1  ;;  %v3209_v58 = vpop.f32.mrb[78].mxu0  ;;  %4762 = vmatprep.mubr.bf16.mxu1 %v3656_v34 }
 0x3bd   : > { %v2711_v0 = vpack.c.bf16 %v2646_v51, %v2645_v10  ;;  %v2387_v60 = vadd.f32 %v2386_v57, %v5588_v49  ;;  %v3210_v14 = vadd.f32 %v3209_v58, %v5862_v53  ;;  %v2388_v7 = vpop.f32.mrb[62].mxu1  ;;  %v3211_v1 = vpop.f32.mrb[79].mxu0 }
 0x3be   : > { %v3564_v38 = vmax.f32 %v3206_v20, %v3208_v56  ;;  %v2389_v4 = vadd.f32 %v2388_v7, %v5584_v45  ;;  %v3212_v61 = vadd.f32 %v3211_v1, %v5866_v54  ;;  %v2390_v62 = vpop.f32.mrb[63].mxu1 }
 0x3bf   : > { %v2519_v40 = vmax.f32 %v2385_v5, %v2387_v60  ;;  %v2391_v63 = vadd.f32 %v2390_v62, %v5588_v49  ;;  %3474 = vmatmul.mubr.bf16.gmra.mrb[184].mxu0 %v2711_v0 }
 0x3c0   : > { %v3565_v46 = vmax.f32 %v3210_v14, %v3212_v61  ;;  %3483 = vmatprep.mubr.bf16.mxu0 %v4900_v3 }
 0x3c1   : > { %v2520_v6 = vmax.f32 %v2389_v4, %v2391_v63  ;;  %v2647_v45 = vmax.f32 %v2519_v40, 0.0 }
 0x3c2   : > { %v3657_v11 = vpack.c.bf16 %v3565_v46, %v3564_v38  ;;  %v3215_v9 = vpop.f32.mrb[80].mxu0 }
 0x3c3   : > { %v2648_v13 = vmax.f32 %v2520_v6, 0.0  ;;  %v3216_v12 = vadd.f32 %v3215_v9, %v5862_v53  ;;  %v3217_v48 = vpop.f32.mrb[81].mxu0  ;;  %v4696_v3 = vpop.f32.mrb[64].mxu1 }
 0x3c4   : > { %v3218_v49 = vadd.f32 %v3217_v48, %v5866_v54  ;;  %v3800_v15 = vadd.f32 %v4696_v3, %v6250_v8  ;;  %v3219_v44 = vpop.f32.mrb[82].mxu0  ;;  %v3791_v19 = vpop.f32.mrb[65].mxu1  ;;  %4763 = vmatmul.mubr.bf16.gmra.mrb[132].mxu1 %v3657_v11 }
 0x3c5   : > { %v2712_v17 = vpack.c.bf16 %v2648_v13, %v2647_v45  ;;  %v3220_v37 = vadd.f32 %v3219_v44, %v5862_v53  ;;  %v3792_v18 = vadd.f32 %v6250_v8, %v3791_v19  ;;  %v3221_v21 = vpop.f32.mrb[83].mxu0  ;;  %v4697_v32 = vpop.f32.mrb[66].mxu1 }
 0x3c6   : > { %v3566_v25 = vmax.f32 %v3216_v12, %v3218_v49  ;;  %4305 = vst.msk [vmem:[%s6258_s20 + $0x10] sm:$0xff] %vm4302_vm2, %v3800_v15  ;;  %v3222_v22 = vadd.f32 %v3221_v21, %v5866_v54  ;;  %v3803_v24 = vadd.f32 %v4697_v32, %v6250_v8  ;;  %v3794_v59 = vpop.f32.mrb[67].mxu1 }
 0x3c7   : > { %4303 = vst.msk [vmem:[%s6258_s20] sm:$0xff] %vm4302_vm2, %v3792_v18  ;;  %v3795_v23 = vadd.f32 %v6250_v8, %v3794_v59  ;;  %3484 = vmatmul.mubr.bf16.gmra.mrb[188].mxu0 %v2712_v17 }
 0x3c8   : > { %v3567_v31 = vmax.f32 %v3220_v37, %v3222_v22  ;;  %4306 = vst.msk [vmem:[%s6258_s20 + $0x18] sm:$0xff] %vm4302_vm2, %v3803_v24 }
 0x3c9   : > { %4304 = vst.msk [vmem:[%s6258_s20 + $0x8] sm:$0xff] %vm4302_vm2, %v3795_v23 }
 0x3ca   : > { %v3225_v26 = vpop.f32.mrb[84].mxu0  ;;  %v3658_v27 = vpack.c.bf16 %v3567_v31, %v3566_v25 }
 0x3cb   : > { %v3226_v33 = vadd.f32 %v3225_v26, %v5862_v53  ;;  %v3227_v36 = vpop.f32.mrb[85].mxu0  ;;  %v4700_v28 = vpop.f32.mrb[68].mxu1 }
 0x3cc   : > { %v3228_v29 = vadd.f32 %v3227_v36, %v5866_v54  ;;  %v3816_v2 = vadd.f32 %v4700_v28, %v6250_v8  ;;  %v3229_v30 = vpop.f32.mrb[86].mxu0  ;;  %v3807_v35 = vpop.f32.mrb[69].mxu1  ;;  %4766 = vmatprep.mubr.bf16.mxu1 %v3658_v27 }
 0x3cd   : > { %v3230_v39 = vadd.f32 %v3229_v30, %v5862_v53  ;;  %v3808_v41 = vadd.f32 %v6250_v8, %v3807_v35  ;;  %v3231_v47 = vpop.f32.mrb[87].mxu0  ;;  %v4701_v43 = vpop.f32.mrb[70].mxu1 }
 0x3ce   : > { %v3568_v52 = vmax.f32 %v3226_v33, %v3228_v29  ;;  %4309 = vst.msk [vmem:[%s6258_s20 + $0x30] sm:$0xff] %vm4302_vm2, %v3816_v2  ;;  %v3232_v16 = vadd.f32 %v3231_v47, %v5866_v54  ;;  %v3819_v42 = vadd.f32 %v4701_v43, %v6250_v8  ;;  %v3810_v34 = vpop.f32.mrb[71].mxu1 }
 0x3cf   : > { %4307 = vst.msk [vmem:[%s6258_s20 + $0x20] sm:$0xff] %vm4302_vm2, %v3808_v41  ;;  %v3811_v10 = vadd.f32 %v6250_v8, %v3810_v34 }
 0x3d0   : > { %v3569_v51 = vmax.f32 %v3230_v39, %v3232_v16  ;;  %4310 = vst.msk [vmem:[%s6258_s20 + $0x38] sm:$0xff] %vm4302_vm2, %v3819_v42 }
 0x3d1   : > { %4308 = vst.msk [vmem:[%s6258_s20 + $0x28] sm:$0xff] %vm4302_vm2, %v3811_v10 }
 0x3d2   : > { %v3659_v20 = vpack.c.bf16 %v3569_v51, %v3568_v52  ;;  %v3235_v55 = vpop.f32.mrb[88].mxu0 }
 0x3d3   : > { %v3236_v50 = vadd.f32 %v3235_v55, %v5862_v53  ;;  %v3237_v5 = vpop.f32.mrb[89].mxu0  ;;  %v4704_v56 = vpop.f32.mrb[72].mxu1 }
 0x3d4   : > { %v3238_v57 = vadd.f32 %v3237_v5, %v5866_v54  ;;  %v3832_v58 = vadd.f32 %v4704_v56, %v6250_v8  ;;  %v3239_v0 = vpop.f32.mrb[90].mxu0  ;;  %v3823_v60 = vpop.f32.mrb[73].mxu1  ;;  %4767 = vmatmul.mubr.bf16.gmra.mrb[136].mxu1 %v3659_v20 }
 0x3d5   : > { %v3240_v14 = vadd.f32 %v3239_v0, %v5862_v53  ;;  %v3824_v7 = vadd.f32 %v6250_v8, %v3823_v60  ;;  %v3241_v1 = vpop.f32.mrb[91].mxu0  ;;  %v4705_v38 = vpop.f32.mrb[74].mxu1 }
 0x3d6   : > { %v3570_v4 = vmax.f32 %v3236_v50, %v3238_v57  ;;  %4313 = vst.msk [vmem:[%s6258_s20 + $0x50] sm:$0xff] %vm4302_vm2, %v3832_v58  ;;  %v3242_v61 = vadd.f32 %v3241_v1, %v5866_v54  ;;  %v3835_v62 = vadd.f32 %v4705_v38, %v6250_v8  ;;  %v3826_v40 = vpop.f32.mrb[75].mxu1 }
 0x3d7   : > { %4311 = vst.msk [vmem:[%s6258_s20 + $0x40] sm:$0xff] %vm4302_vm2, %v3824_v7  ;;  %v3827_v63 = vadd.f32 %v6250_v8, %v3826_v40 }
 0x3d8   : > { %v3571_v46 = vmax.f32 %v3240_v14, %v3242_v61  ;;  %4314 = vst.msk [vmem:[%s6258_s20 + $0x58] sm:$0xff] %vm4302_vm2, %v3835_v62 }
 0x3d9   : > { %4312 = vst.msk [vmem:[%s6258_s20 + $0x48] sm:$0xff] %vm4302_vm2, %v3827_v63 }
 0x3da   : > { %v3245_v6 = vpop.f32.mrb[92].mxu0  ;;  %v3660_v11 = vpack.c.bf16 %v3571_v46, %v3570_v4 }
 0x3db   : > { %v3246_v9 = vadd.f32 %v3245_v6, %v5862_v53  ;;  %v3247_v45 = vpop.f32.mrb[93].mxu0  ;;  %v4708_v13 = vpop.f32.mrb[76].mxu1 }
 0x3dc   : > { %v3248_v12 = vadd.f32 %v3247_v45, %v5866_v54  ;;  %v3848_v48 = vadd.f32 %v4708_v13, %v6250_v8  ;;  %v3249_v3 = vpop.f32.mrb[94].mxu0  ;;  %v3839_v49 = vpop.f32.mrb[77].mxu1  ;;  %4770 = vmatprep.mubr.bf16.mxu1 %v3660_v11 }
 0x3dd   : > { %v3250_v15 = vadd.f32 %v3249_v3, %v5862_v53  ;;  %v3840_v44 = vadd.f32 %v6250_v8, %v3839_v49  ;;  %v3251_v19 = vpop.f32.mrb[95].mxu0  ;;  %v4709_v17 = vpop.f32.mrb[78].mxu1 }
 0x3de   : > { %v3572_v37 = vmax.f32 %v3246_v9, %v3248_v12  ;;  %4317 = vst.msk [vmem:[%s6258_s20 + $0x70] sm:$0xff] %vm4302_vm2, %v3848_v48  ;;  %v3252_v18 = vadd.f32 %v3251_v19, %v5866_v54  ;;  %v3851_v21 = vadd.f32 %v4709_v17, %v6250_v8  ;;  %v3842_v32 = vpop.f32.mrb[79].mxu1 }
 0x3df   : > { %4315 = vst.msk [vmem:[%s6258_s20 + $0x60] sm:$0xff] %vm4302_vm2, %v3840_v44  ;;  %v3843_v25 = vadd.f32 %v6250_v8, %v3842_v32 }
 0x3e0   : > { %v3573_v22 = vmax.f32 %v3250_v15, %v3252_v18  ;;  %4318 = vst.msk [vmem:[%s6258_s20 + $0x78] sm:$0xff] %vm4302_vm2, %v3851_v21 }
 0x3e1   : > { %4316 = vst.msk [vmem:[%s6258_s20 + $0x68] sm:$0xff] %vm4302_vm2, %v3843_v25 }
 0x3e2   : > { %v3661_v24 = vpack.c.bf16 %v3573_v22, %v3572_v37  ;;  %v3255_v59 = vpop.f32.mrb[96].mxu0 }
 0x3e3   : > { %v3256_v23 = vadd.f32 %v3255_v59, %v5862_v53  ;;  %v3257_v31 = vpop.f32.mrb[97].mxu0  ;;  %v4712_v26 = vpop.f32.mrb[80].mxu1 }
 0x3e4   : > { %v3258_v27 = vadd.f32 %v3257_v31, %v5866_v54  ;;  %v3864_v33 = vadd.f32 %v4712_v26, %v6250_v8  ;;  %v3259_v36 = vpop.f32.mrb[98].mxu0  ;;  %v3855_v28 = vpop.f32.mrb[81].mxu1  ;;  %4771 = vmatmul.mubr.bf16.gmra.mrb[140].mxu1 %v3661_v24 }
 0x3e5   : > { %v3260_v29 = vadd.f32 %v3259_v36, %v5862_v53  ;;  %v3856_v2 = vadd.f32 %v6250_v8, %v3855_v28  ;;  %v3261_v30 = vpop.f32.mrb[99].mxu0  ;;  %v4713_v35 = vpop.f32.mrb[82].mxu1 }
 0x3e6   : > { %v3574_v39 = vmax.f32 %v3256_v23, %v3258_v27  ;;  %4321 = vst.msk [vmem:[%s6258_s20 + $0x90] sm:$0xff] %vm4302_vm2, %v3864_v33  ;;  %v3262_v41 = vadd.f32 %v3261_v30, %v5866_v54  ;;  %v3867_v47 = vadd.f32 %v4713_v35, %v6250_v8  ;;  %v3858_v43 = vpop.f32.mrb[83].mxu1 }
 0x3e7   : > { %4319 = vst.msk [vmem:[%s6258_s20 + $0x80] sm:$0xff] %vm4302_vm2, %v3856_v2  ;;  %v3859_v52 = vadd.f32 %v6250_v8, %v3858_v43 }
 0x3e8   : > { %v3575_v16 = vmax.f32 %v3260_v29, %v3262_v41  ;;  %4322 = vst.msk [vmem:[%s6258_s20 + $0x98] sm:$0xff] %vm4302_vm2, %v3867_v47 }
 0x3e9   : > { %4320 = vst.msk [vmem:[%s6258_s20 + $0x88] sm:$0xff] %vm4302_vm2, %v3859_v52 }
 0x3ea   : > { %v3265_v42 = vpop.f32.mrb[100].mxu0  ;;  %v3662_v34 = vpack.c.bf16 %v3575_v16, %v3574_v39 }
 0x3eb   : > { %v3266_v10 = vadd.f32 %v3265_v42, %v5862_v53  ;;  %v3267_v51 = vpop.f32.mrb[101].mxu0  ;;  %v4716_v20 = vpop.f32.mrb[84].mxu1 }
 0x3ec   : > { %v3268_v55 = vadd.f32 %v3267_v51, %v5866_v54  ;;  %v3880_v50 = vadd.f32 %v4716_v20, %v6250_v8  ;;  %v3269_v5 = vpop.f32.mrb[102].mxu0  ;;  %v3871_v56 = vpop.f32.mrb[85].mxu1  ;;  %4774 = vmatprep.mubr.bf16.mxu1 %v3662_v34 }
 0x3ed   : > { %v3270_v57 = vadd.f32 %v3269_v5, %v5862_v53  ;;  %v3872_v58 = vadd.f32 %v6250_v8, %v3871_v56  ;;  %v3271_v0 = vpop.f32.mrb[103].mxu0  ;;  %v4717_v60 = vpop.f32.mrb[86].mxu1 }
 0x3ee   : > { %v3576_v14 = vmax.f32 %v3266_v10, %v3268_v55  ;;  %4325 = vst.msk [vmem:[%s6258_s20 + $0xb0] sm:$0xff] %vm4302_vm2, %v3880_v50  ;;  %v3272_v7 = vadd.f32 %v3271_v0, %v5866_v54  ;;  %v3883_v1 = vadd.f32 %v4717_v60, %v6250_v8  ;;  %v3874_v38 = vpop.f32.mrb[87].mxu1 }
 0x3ef   : > { %4323 = vst.msk [vmem:[%s6258_s20 + $0xa0] sm:$0xff] %vm4302_vm2, %v3872_v58  ;;  %v3875_v4 = vadd.f32 %v6250_v8, %v3874_v38 }
 0x3f0   : > { %v3577_v61 = vmax.f32 %v3270_v57, %v3272_v7  ;;  %4326 = vst.msk [vmem:[%s6258_s20 + $0xb8] sm:$0xff] %vm4302_vm2, %v3883_v1 }
 0x3f1   : > { %4324 = vst.msk [vmem:[%s6258_s20 + $0xa8] sm:$0xff] %vm4302_vm2, %v3875_v4 }
 0x3f2   : > { %v3663_v62 = vpack.c.bf16 %v3577_v61, %v3576_v14  ;;  %v3275_v40 = vpop.f32.mrb[104].mxu0 }
 0x3f3   : > { %v3276_v63 = vadd.f32 %v3275_v40, %v5862_v53  ;;  %v3277_v46 = vpop.f32.mrb[105].mxu0  ;;  %v4720_v6 = vpop.f32.mrb[88].mxu1 }
 0x3f4   : > { %v3278_v11 = vadd.f32 %v3277_v46, %v5866_v54  ;;  %v3896_v9 = vadd.f32 %v4720_v6, %v6250_v8  ;;  %v3279_v45 = vpop.f32.mrb[106].mxu0  ;;  %v3887_v13 = vpop.f32.mrb[89].mxu1  ;;  %4775 = vmatmul.mubr.bf16.gmra.mrb[144].mxu1 %v3663_v62 }
 0x3f5   : > { %v3280_v12 = vadd.f32 %v3279_v45, %v5862_v53  ;;  %v3888_v48 = vadd.f32 %v6250_v8, %v3887_v13  ;;  %v3281_v3 = vpop.f32.mrb[107].mxu0  ;;  %v4721_v49 = vpop.f32.mrb[90].mxu1 }
 0x3f6   : > { %v3578_v15 = vmax.f32 %v3276_v63, %v3278_v11  ;;  %4329 = vst.msk [vmem:[%s6258_s20 + $0xd0] sm:$0xff] %vm4302_vm2, %v3896_v9  ;;  %v3282_v44 = vadd.f32 %v3281_v3, %v5866_v54  ;;  %v3899_v19 = vadd.f32 %v4721_v49, %v6250_v8  ;;  %v3890_v17 = vpop.f32.mrb[91].mxu1 }
 0x3f7   : > { %4327 = vst.msk [vmem:[%s6258_s20 + $0xc0] sm:$0xff] %vm4302_vm2, %v3888_v48  ;;  %v3891_v37 = vadd.f32 %v6250_v8, %v3890_v17 }
 0x3f8   : > { %v3579_v18 = vmax.f32 %v3280_v12, %v3282_v44  ;;  %4330 = vst.msk [vmem:[%s6258_s20 + $0xd8] sm:$0xff] %vm4302_vm2, %v3899_v19 }
 0x3f9   : > { %4328 = vst.msk [vmem:[%s6258_s20 + $0xc8] sm:$0xff] %vm4302_vm2, %v3891_v37 }
 0x3fa   : > { %v3285_v21 = vpop.f32.mrb[108].mxu0  ;;  %v3664_v32 = vpack.c.bf16 %v3579_v18, %v3578_v15 }
 0x3fb   : > { %v3286_v25 = vadd.f32 %v3285_v21, %v5862_v53  ;;  %v3287_v22 = vpop.f32.mrb[109].mxu0  ;;  %v4724_v24 = vpop.f32.mrb[92].mxu1 }
 0x3fc   : > { %v3288_v59 = vadd.f32 %v3287_v22, %v5866_v54  ;;  %v3912_v23 = vadd.f32 %v4724_v24, %v6250_v8  ;;  %v3289_v31 = vpop.f32.mrb[110].mxu0  ;;  %v3903_v26 = vpop.f32.mrb[93].mxu1  ;;  %4778 = vmatprep.mubr.bf16.mxu1 %v3664_v32 }
 0x3fd   : > { %v3290_v27 = vadd.f32 %v3289_v31, %v5862_v53  ;;  %v3904_v33 = vadd.f32 %v6250_v8, %v3903_v26  ;;  %v3291_v36 = vpop.f32.mrb[111].mxu0  ;;  %v4725_v28 = vpop.f32.mrb[94].mxu1 }
 0x3fe   : > { %v3580_v29 = vmax.f32 %v3286_v25, %v3288_v59  ;;  %4333 = vst.msk [vmem:[%s6258_s20 + $0xf0] sm:$0xff] %vm4302_vm2, %v3912_v23  ;;  %v3292_v2 = vadd.f32 %v3291_v36, %v5866_v54  ;;  %v3915_v30 = vadd.f32 %v4725_v28, %v6250_v8  ;;  %v3906_v35 = vpop.f32.mrb[95].mxu1 }
 0x3ff   : > { %4331 = vst.msk [vmem:[%s6258_s20 + $0xe0] sm:$0xff] %vm4302_vm2, %v3904_v33  ;;  %v3907_v39 = vadd.f32 %v6250_v8, %v3906_v35 }
 0x400   : > { %v3581_v41 = vmax.f32 %v3290_v27, %v3292_v2  ;;  %4334 = vst.msk [vmem:[%s6258_s20 + $0xf8] sm:$0xff] %vm4302_vm2, %v3915_v30 }
 0x401   : > { %4332 = vst.msk [vmem:[%s6258_s20 + $0xe8] sm:$0xff] %vm4302_vm2, %v3907_v39 }
 0x402   : > { %v3665_v47 = vpack.c.bf16 %v3581_v41, %v3580_v29  ;;  %v3295_v43 = vpop.f32.mrb[112].mxu0 }
 0x403   : > { %v3296_v52 = vadd.f32 %v3295_v43, %v5862_v53  ;;  %v3297_v16 = vpop.f32.mrb[113].mxu0 }
 0x404   : > { %v3298_v42 = vadd.f32 %v3297_v16, %v5866_v54  ;;  %v3299_v34 = vpop.f32.mrb[114].mxu0  ;;  %4779 = vmatmul.mubr.bf16.gmra.mrb[148].mxu1 %v3665_v47 }
 0x405   : > { %v3300_v10 = vadd.f32 %v3299_v34, %v5862_v53  ;;  %v3301_v51 = vpop.f32.mrb[115].mxu0 }
 0x406   : > { %v3582_v20 = vmax.f32 %v3296_v52, %v3298_v42  ;;  %v3302_v55 = vadd.f32 %v3301_v51, %v5866_v54 }
 0x407   : > { %v4728_v50 = vpop.f32.mrb[96].mxu1 }
 0x408   : > { %v3583_v5 = vmax.f32 %v3300_v10, %v3302_v55  ;;  %v3928_v56 = vadd.f32 %v4728_v50, %v6250_v8  ;;  %v3919_v57 = vpop.f32.mrb[97].mxu1 }
 0x409   : > { %v3920_v58 = vadd.f32 %v6250_v8, %v3919_v57  ;;  %v4729_v0 = vpop.f32.mrb[98].mxu1 }
 0x40a   : > { %4337 = vst.msk [vmem:[%s6258_s20 + $0x110] sm:$0xff] %vm4302_vm2, %v3928_v56  ;;  %v3931_v60 = vadd.f32 %v4729_v0, %v6250_v8  ;;  %v3305_v14 = vpop.f32.mrb[116].mxu0  ;;  %v3922_v7 = vpop.f32.mrb[99].mxu1  ;;  %v3666_v1 = vpack.c.bf16 %v3583_v5, %v3582_v20 }
 0x40b   : > { %4335 = vst.msk [vmem:[%s6258_s20 + $0x100] sm:$0xff] %vm4302_vm2, %v3920_v58  ;;  %v3306_v38 = vadd.f32 %v3305_v14, %v5862_v53  ;;  %v3923_v4 = vadd.f32 %v6250_v8, %v3922_v7  ;;  %v3307_v61 = vpop.f32.mrb[117].mxu0 }
 0x40c   : > { %4338 = vst.msk [vmem:[%s6258_s20 + $0x118] sm:$0xff] %vm4302_vm2, %v3931_v60  ;;  %v3308_v62 = vadd.f32 %v3307_v61, %v5866_v54  ;;  %v3309_v40 = vpop.f32.mrb[118].mxu0  ;;  %4782 = vmatprep.mubr.bf16.mxu1 %v3666_v1 }
 0x40d   : > { %4336 = vst.msk [vmem:[%s6258_s20 + $0x108] sm:$0xff] %vm4302_vm2, %v3923_v4  ;;  %v3310_v63 = vadd.f32 %v3309_v40, %v5862_v53  ;;  %v3311_v46 = vpop.f32.mrb[119].mxu0 }
 0x40e   : > { %v3584_v6 = vmax.f32 %v3306_v38, %v3308_v62  ;;  %v3312_v11 = vadd.f32 %v3311_v46, %v5866_v54 }
 0x410   : > { %v3585_v9 = vmax.f32 %v3310_v63, %v3312_v11 }
 0x412   : > { %v3667_v45 = vpack.c.bf16 %v3585_v9, %v3584_v6  ;;  %v3315_v13 = vpop.f32.mrb[120].mxu0 }
 0x413   : > { %v3316_v12 = vadd.f32 %v3315_v13, %v5862_v53  ;;  %v3317_v48 = vpop.f32.mrb[121].mxu0 }
 0x414   : > { %v3318_v3 = vadd.f32 %v3317_v48, %v5866_v54  ;;  %v3319_v49 = vpop.f32.mrb[122].mxu0  ;;  %4783 = vmatmul.mubr.bf16.gmra.mrb[152].mxu1 %v3667_v45 }
 0x415   : > { %v3320_v15 = vadd.f32 %v3319_v49, %v5862_v53  ;;  %v3321_v44 = vpop.f32.mrb[123].mxu0 }
 0x416   : > { %v3586_v19 = vmax.f32 %v3316_v12, %v3318_v3  ;;  %v3322_v17 = vadd.f32 %v3321_v44, %v5866_v54 }
 0x417   : > { %v4732_v37 = vpop.f32.mrb[100].mxu1 }
 0x418   : > { %v3587_v18 = vmax.f32 %v3320_v15, %v3322_v17  ;;  %v3944_v21 = vadd.f32 %v4732_v37, %v6250_v8  ;;  %v3935_v32 = vpop.f32.mrb[101].mxu1 }
 0x419   : > { %v3936_v25 = vadd.f32 %v6250_v8, %v3935_v32  ;;  %v4733_v22 = vpop.f32.mrb[102].mxu1 }
 0x41a   : > { %4341 = vst.msk [vmem:[%s6258_s20 + $0x130] sm:$0xff] %vm4302_vm2, %v3944_v21  ;;  %v3947_v24 = vadd.f32 %v4733_v22, %v6250_v8  ;;  %v3325_v59 = vpop.f32.mrb[124].mxu0  ;;  %v3938_v23 = vpop.f32.mrb[103].mxu1  ;;  %v3668_v31 = vpack.c.bf16 %v3587_v18, %v3586_v19 }
 0x41b   : > { %4339 = vst.msk [vmem:[%s6258_s20 + $0x120] sm:$0xff] %vm4302_vm2, %v3936_v25  ;;  %v3326_v26 = vadd.f32 %v3325_v59, %v5862_v53  ;;  %v3939_v27 = vadd.f32 %v6250_v8, %v3938_v23  ;;  %v3327_v33 = vpop.f32.mrb[125].mxu0 }
 0x41c   : > { %4342 = vst.msk [vmem:[%s6258_s20 + $0x138] sm:$0xff] %vm4302_vm2, %v3947_v24  ;;  %v3328_v36 = vadd.f32 %v3327_v33, %v5866_v54  ;;  %v3329_v28 = vpop.f32.mrb[126].mxu0  ;;  %4786 = vmatprep.mubr.bf16.mxu1 %v3668_v31 }
 0x41d   : > { %4340 = vst.msk [vmem:[%s6258_s20 + $0x128] sm:$0xff] %vm4302_vm2, %v3939_v27  ;;  %v3330_v29 = vadd.f32 %v3329_v28, %v5862_v53  ;;  %v3331_v2 = vpop.f32.mrb[127].mxu0 }
 0x41e   : > { %v3588_v30 = vmax.f32 %v3326_v26, %v3328_v36  ;;  %v3332_v35 = vadd.f32 %v3331_v2, %v5866_v54 }
 0x420   : > { %v3589_v39 = vmax.f32 %v3330_v29, %v3332_v35 }
 0x422   : > { %v3669_v41 = vpack.c.bf16 %v3589_v39, %v3588_v30  ;;  %v3335_v47 = vpop.f32.mrb[128].mxu0 }
 0x423   : > { %v3336_v43 = vadd.f32 %v3335_v47, %v5862_v53  ;;  %v3337_v52 = vpop.f32.mrb[129].mxu0 }
 0x424   : > { %v3338_v16 = vadd.f32 %v3337_v52, %v5866_v54  ;;  %v3339_v42 = vpop.f32.mrb[130].mxu0  ;;  %4787 = vmatmul.mubr.bf16.gmra.mrb[156].mxu1 %v3669_v41 }
 0x425   : > { %v3340_v34 = vadd.f32 %v3339_v42, %v5862_v53  ;;  %v3341_v10 = vpop.f32.mrb[131].mxu0 }
 0x426   : > { %v3590_v51 = vmax.f32 %v3336_v43, %v3338_v16  ;;  %v3342_v20 = vadd.f32 %v3341_v10, %v5866_v54 }
 0x427   : > { %v4736_v55 = vpop.f32.mrb[104].mxu1 }
 0x428   : > { %v3591_v50 = vmax.f32 %v3340_v34, %v3342_v20  ;;  %v3960_v5 = vadd.f32 %v4736_v55, %v6250_v8  ;;  %v3951_v56 = vpop.f32.mrb[105].mxu1 }
 0x429   : > { %v3952_v57 = vadd.f32 %v6250_v8, %v3951_v56  ;;  %v4737_v58 = vpop.f32.mrb[106].mxu1 }
 0x42a   : > { %4345 = vst.msk [vmem:[%s6258_s20 + $0x150] sm:$0xff] %vm4302_vm2, %v3960_v5  ;;  %v3963_v0 = vadd.f32 %v4737_v58, %v6250_v8  ;;  %v3345_v60 = vpop.f32.mrb[132].mxu0  ;;  %v3954_v14 = vpop.f32.mrb[107].mxu1  ;;  %v3670_v7 = vpack.c.bf16 %v3591_v50, %v3590_v51 }
 0x42b   : > { %4343 = vst.msk [vmem:[%s6258_s20 + $0x140] sm:$0xff] %vm4302_vm2, %v3952_v57  ;;  %v3346_v1 = vadd.f32 %v3345_v60, %v5862_v53  ;;  %v3955_v38 = vadd.f32 %v6250_v8, %v3954_v14  ;;  %v3347_v4 = vpop.f32.mrb[133].mxu0 }
 0x42c   : > { %4346 = vst.msk [vmem:[%s6258_s20 + $0x158] sm:$0xff] %vm4302_vm2, %v3963_v0  ;;  %v3348_v61 = vadd.f32 %v3347_v4, %v5866_v54  ;;  %v3349_v62 = vpop.f32.mrb[134].mxu0  ;;  %4790 = vmatprep.mubr.bf16.mxu1 %v3670_v7 }
 0x42d   : > { %4344 = vst.msk [vmem:[%s6258_s20 + $0x148] sm:$0xff] %vm4302_vm2, %v3955_v38  ;;  %v3350_v40 = vadd.f32 %v3349_v62, %v5862_v53  ;;  %v3351_v63 = vpop.f32.mrb[135].mxu0 }
 0x42e   : > { %v3592_v46 = vmax.f32 %v3346_v1, %v3348_v61  ;;  %v3352_v6 = vadd.f32 %v3351_v63, %v5866_v54 }
 0x430   : > { %v3593_v11 = vmax.f32 %v3350_v40, %v3352_v6 }
 0x432   : > { %v3671_v9 = vpack.c.bf16 %v3593_v11, %v3592_v46  ;;  %v3355_v45 = vpop.f32.mrb[136].mxu0 }
 0x433   : > { %v3356_v13 = vadd.f32 %v3355_v45, %v5862_v53  ;;  %v3357_v12 = vpop.f32.mrb[137].mxu0 }
 0x434   : > { %v3358_v48 = vadd.f32 %v3357_v12, %v5866_v54  ;;  %v3359_v3 = vpop.f32.mrb[138].mxu0  ;;  %4791 = vmatmul.mubr.bf16.gmra.mrb[160].mxu1 %v3671_v9 }
 0x435   : > { %v3360_v49 = vadd.f32 %v3359_v3, %v5862_v53  ;;  %v3361_v15 = vpop.f32.mrb[139].mxu0 }
 0x436   : > { %v3594_v44 = vmax.f32 %v3356_v13, %v3358_v48  ;;  %v3362_v19 = vadd.f32 %v3361_v15, %v5866_v54 }
 0x437   : > { %v4740_v17 = vpop.f32.mrb[108].mxu1 }
 0x438   : > { %v3595_v37 = vmax.f32 %v3360_v49, %v3362_v19  ;;  %v3976_v18 = vadd.f32 %v4740_v17, %v6250_v8  ;;  %v3967_v21 = vpop.f32.mrb[109].mxu1 }
 0x439   : > { %v3968_v32 = vadd.f32 %v6250_v8, %v3967_v21  ;;  %v4741_v25 = vpop.f32.mrb[110].mxu1 }
 0x43a   : > { %4349 = vst.msk [vmem:[%s6258_s20 + $0x170] sm:$0xff] %vm4302_vm2, %v3976_v18  ;;  %v3979_v22 = vadd.f32 %v4741_v25, %v6250_v8  ;;  %v3365_v24 = vpop.f32.mrb[140].mxu0  ;;  %v3970_v59 = vpop.f32.mrb[111].mxu1  ;;  %v3672_v23 = vpack.c.bf16 %v3595_v37, %v3594_v44 }
 0x43b   : > { %4347 = vst.msk [vmem:[%s6258_s20 + $0x160] sm:$0xff] %vm4302_vm2, %v3968_v32  ;;  %v3366_v31 = vadd.f32 %v3365_v24, %v5862_v53  ;;  %v3971_v26 = vadd.f32 %v6250_v8, %v3970_v59  ;;  %v3367_v27 = vpop.f32.mrb[141].mxu0 }
 0x43c   : > { %4350 = vst.msk [vmem:[%s6258_s20 + $0x178] sm:$0xff] %vm4302_vm2, %v3979_v22  ;;  %v3368_v33 = vadd.f32 %v3367_v27, %v5866_v54  ;;  %v3369_v36 = vpop.f32.mrb[142].mxu0  ;;  %4794 = vmatprep.mubr.bf16.mxu1 %v3672_v23 }
 0x43d   : > { %4348 = vst.msk [vmem:[%s6258_s20 + $0x168] sm:$0xff] %vm4302_vm2, %v3971_v26  ;;  %v3370_v28 = vadd.f32 %v3369_v36, %v5862_v53  ;;  %v3371_v29 = vpop.f32.mrb[143].mxu0 }
 0x43e   : > { %v3596_v2 = vmax.f32 %v3366_v31, %v3368_v33  ;;  %v3372_v30 = vadd.f32 %v3371_v29, %v5866_v54 }
 0x440   : > { %v3597_v35 = vmax.f32 %v3370_v28, %v3372_v30 }
 0x442   : > { %v3673_v39 = vpack.c.bf16 %v3597_v35, %v3596_v2  ;;  %v3375_v41 = vpop.f32.mrb[144].mxu0 }
 0x443   : > { %v3376_v47 = vadd.f32 %v3375_v41, %v5862_v53  ;;  %v3377_v43 = vpop.f32.mrb[145].mxu0 }
 0x444   : > { %v3378_v52 = vadd.f32 %v3377_v43, %v5866_v54  ;;  %v3379_v16 = vpop.f32.mrb[146].mxu0  ;;  %4795 = vmatmul.mubr.bf16.gmra.mrb[164].mxu1 %v3673_v39 }
 0x445   : > { %v3380_v42 = vadd.f32 %v3379_v16, %v5862_v53  ;;  %v3381_v34 = vpop.f32.mrb[147].mxu0 }
 0x446   : > { %v3598_v10 = vmax.f32 %v3376_v47, %v3378_v52  ;;  %v3382_v51 = vadd.f32 %v3381_v34, %v5866_v54 }
 0x447   : > { %v4744_v20 = vpop.f32.mrb[112].mxu1 }
 0x448   : > { %v3599_v55 = vmax.f32 %v3380_v42, %v3382_v51  ;;  %v3992_v50 = vadd.f32 %v4744_v20, %v6250_v8  ;;  %v3983_v5 = vpop.f32.mrb[113].mxu1 }
 0x449   : > { %v3984_v56 = vadd.f32 %v6250_v8, %v3983_v5  ;;  %v4745_v57 = vpop.f32.mrb[114].mxu1 }
 0x44a   : > { %4353 = vst.msk [vmem:[%s6258_s20 + $0x190] sm:$0xff] %vm4302_vm2, %v3992_v50  ;;  %v3995_v58 = vadd.f32 %v4745_v57, %v6250_v8  ;;  %v3385_v0 = vpop.f32.mrb[148].mxu0  ;;  %v3986_v60 = vpop.f32.mrb[115].mxu1  ;;  %v3674_v14 = vpack.c.bf16 %v3599_v55, %v3598_v10 }
 0x44b   : > { %4351 = vst.msk [vmem:[%s6258_s20 + $0x180] sm:$0xff] %vm4302_vm2, %v3984_v56  ;;  %v3386_v7 = vadd.f32 %v3385_v0, %v5862_v53  ;;  %v3987_v1 = vadd.f32 %v6250_v8, %v3986_v60  ;;  %v3387_v38 = vpop.f32.mrb[149].mxu0 }
 0x44c   : > { %4354 = vst.msk [vmem:[%s6258_s20 + $0x198] sm:$0xff] %vm4302_vm2, %v3995_v58  ;;  %v3388_v4 = vadd.f32 %v3387_v38, %v5866_v54  ;;  %v3389_v61 = vpop.f32.mrb[150].mxu0  ;;  %4798 = vmatprep.mubr.bf16.mxu1 %v3674_v14 }
 0x44d   : > { %4352 = vst.msk [vmem:[%s6258_s20 + $0x188] sm:$0xff] %vm4302_vm2, %v3987_v1  ;;  %v3390_v62 = vadd.f32 %v3389_v61, %v5862_v53  ;;  %v3391_v40 = vpop.f32.mrb[151].mxu0 }
 0x44e   : > { %v3600_v63 = vmax.f32 %v3386_v7, %v3388_v4  ;;  %v3392_v46 = vadd.f32 %v3391_v40, %v5866_v54 }
 0x450   : > { %v3601_v6 = vmax.f32 %v3390_v62, %v3392_v46 }
 0x452   : > { %v3675_v11 = vpack.c.bf16 %v3601_v6, %v3600_v63  ;;  %v3395_v9 = vpop.f32.mrb[152].mxu0 }
 0x453   : > { %v3396_v45 = vadd.f32 %v3395_v9, %v5862_v53  ;;  %v3397_v13 = vpop.f32.mrb[153].mxu0 }
 0x454   : > { %v3398_v12 = vadd.f32 %v3397_v13, %v5866_v54  ;;  %v3399_v48 = vpop.f32.mrb[154].mxu0  ;;  %4799 = vmatmul.mubr.bf16.gmra.mrb[168].mxu1 %v3675_v11 }
 0x455   : > { %v3400_v3 = vadd.f32 %v3399_v48, %v5862_v53  ;;  %v3401_v49 = vpop.f32.mrb[155].mxu0 }
 0x456   : > { %v3602_v15 = vmax.f32 %v3396_v45, %v3398_v12  ;;  %v3402_v44 = vadd.f32 %v3401_v49, %v5866_v54 }
 0x457   : > { %v4748_v19 = vpop.f32.mrb[116].mxu1 }
 0x458   : > { %v3603_v17 = vmax.f32 %v3400_v3, %v3402_v44  ;;  %v4008_v37 = vadd.f32 %v4748_v19, %v6250_v8  ;;  %v3999_v18 = vpop.f32.mrb[117].mxu1 }
 0x459   : > { %v4000_v21 = vadd.f32 %v6250_v8, %v3999_v18  ;;  %v4749_v32 = vpop.f32.mrb[118].mxu1 }
 0x45a   : > { %4357 = vst.msk [vmem:[%s6258_s20 + $0x1b0] sm:$0xff] %vm4302_vm2, %v4008_v37  ;;  %v4011_v25 = vadd.f32 %v4749_v32, %v6250_v8  ;;  %v3405_v22 = vpop.f32.mrb[156].mxu0  ;;  %v4002_v24 = vpop.f32.mrb[119].mxu1  ;;  %v3676_v59 = vpack.c.bf16 %v3603_v17, %v3602_v15 }
 0x45b   : > { %4355 = vst.msk [vmem:[%s6258_s20 + $0x1a0] sm:$0xff] %vm4302_vm2, %v4000_v21  ;;  %v3406_v23 = vadd.f32 %v3405_v22, %v5862_v53  ;;  %v4003_v31 = vadd.f32 %v6250_v8, %v4002_v24  ;;  %v3407_v26 = vpop.f32.mrb[157].mxu0 }
 0x45c   : > { %4358 = vst.msk [vmem:[%s6258_s20 + $0x1b8] sm:$0xff] %vm4302_vm2, %v4011_v25  ;;  %v3408_v27 = vadd.f32 %v3407_v26, %v5866_v54  ;;  %v3409_v33 = vpop.f32.mrb[158].mxu0  ;;  %4802 = vmatprep.mubr.bf16.mxu1 %v3676_v59 }
 0x45d   : > { %4356 = vst.msk [vmem:[%s6258_s20 + $0x1a8] sm:$0xff] %vm4302_vm2, %v4003_v31  ;;  %v3410_v36 = vadd.f32 %v3409_v33, %v5862_v53  ;;  %v3411_v28 = vpop.f32.mrb[159].mxu0 }
 0x45e   : > { %v3604_v29 = vmax.f32 %v3406_v23, %v3408_v27  ;;  %v3412_v2 = vadd.f32 %v3411_v28, %v5866_v54 }
 0x460   : > { %v3605_v30 = vmax.f32 %v3410_v36, %v3412_v2 }
 0x462   : > { %v3677_v35 = vpack.c.bf16 %v3605_v30, %v3604_v29  ;;  %v3415_v39 = vpop.f32.mrb[160].mxu0 }
 0x463   : > { %v3416_v41 = vadd.f32 %v3415_v39, %v5862_v53  ;;  %v3417_v47 = vpop.f32.mrb[161].mxu0 }
 0x464   : > { %v3418_v43 = vadd.f32 %v3417_v47, %v5866_v54  ;;  %v3419_v52 = vpop.f32.mrb[162].mxu0  ;;  %4803 = vmatmul.mubr.bf16.gmra.mrb[172].mxu1 %v3677_v35 }
 0x465   : > { %v3420_v16 = vadd.f32 %v3419_v52, %v5862_v53  ;;  %v3421_v42 = vpop.f32.mrb[163].mxu0 }
 0x466   : > { %v3606_v34 = vmax.f32 %v3416_v41, %v3418_v43  ;;  %v3422_v10 = vadd.f32 %v3421_v42, %v5866_v54 }
 0x467   : > { %v4752_v51 = vpop.f32.mrb[120].mxu1 }
 0x468   : > { %v3607_v20 = vmax.f32 %v3420_v16, %v3422_v10  ;;  %v4024_v55 = vadd.f32 %v4752_v51, %v6250_v8  ;;  %v4015_v50 = vpop.f32.mrb[121].mxu1 }
 0x469   : > { %v4016_v5 = vadd.f32 %v6250_v8, %v4015_v50  ;;  %v4753_v56 = vpop.f32.mrb[122].mxu1 }
 0x46a   : > { %4361 = vst.msk [vmem:[%s6258_s20 + $0x1d0] sm:$0xff] %vm4302_vm2, %v4024_v55  ;;  %v4027_v57 = vadd.f32 %v4753_v56, %v6250_v8  ;;  %v3425_v58 = vpop.f32.mrb[164].mxu0  ;;  %v4018_v0 = vpop.f32.mrb[123].mxu1  ;;  %v3678_v60 = vpack.c.bf16 %v3607_v20, %v3606_v34 }
 0x46b   : > { %4359 = vst.msk [vmem:[%s6258_s20 + $0x1c0] sm:$0xff] %vm4302_vm2, %v4016_v5  ;;  %v3426_v14 = vadd.f32 %v3425_v58, %v5862_v53  ;;  %v4019_v7 = vadd.f32 %v6250_v8, %v4018_v0  ;;  %v3427_v1 = vpop.f32.mrb[165].mxu0 }
 0x46c   : > { %4362 = vst.msk [vmem:[%s6258_s20 + $0x1d8] sm:$0xff] %vm4302_vm2, %v4027_v57  ;;  %v3428_v38 = vadd.f32 %v3427_v1, %v5866_v54  ;;  %v3429_v4 = vpop.f32.mrb[166].mxu0  ;;  %4806 = vmatprep.mubr.bf16.mxu1 %v3678_v60 }
 0x46d   : > { %4360 = vst.msk [vmem:[%s6258_s20 + $0x1c8] sm:$0xff] %vm4302_vm2, %v4019_v7  ;;  %v3430_v61 = vadd.f32 %v3429_v4, %v5862_v53  ;;  %v3431_v62 = vpop.f32.mrb[167].mxu0 }
 0x46e   : > { %v3608_v40 = vmax.f32 %v3426_v14, %v3428_v38  ;;  %v3432_v63 = vadd.f32 %v3431_v62, %v5866_v54 }
 0x470   : > { %v3609_v46 = vmax.f32 %v3430_v61, %v3432_v63 }
 0x472   : > { %v3679_v6 = vpack.c.bf16 %v3609_v46, %v3608_v40  ;;  %v3435_v11 = vpop.f32.mrb[168].mxu0 }
 0x473   : > { %v3436_v9 = vadd.f32 %v3435_v11, %v5862_v53  ;;  %v3437_v45 = vpop.f32.mrb[169].mxu0 }
 0x474   : > { %v3438_v13 = vadd.f32 %v3437_v45, %v5866_v54  ;;  %v3439_v12 = vpop.f32.mrb[170].mxu0  ;;  %4807 = vmatmul.mubr.bf16.gmra.mrb[176].mxu1 %v3679_v6 }
 0x475   : > { %v3440_v48 = vadd.f32 %v3439_v12, %v5862_v53  ;;  %v3441_v3 = vpop.f32.mrb[171].mxu0 }
 0x476   : > { %v3610_v49 = vmax.f32 %v3436_v9, %v3438_v13  ;;  %v3442_v15 = vadd.f32 %v3441_v3, %v5866_v54 }
 0x477   : > { %v4756_v44 = vpop.f32.mrb[124].mxu1 }
 0x478   : > { %v3611_v19 = vmax.f32 %v3440_v48, %v3442_v15  ;;  %v4040_v17 = vadd.f32 %v4756_v44, %v6250_v8  ;;  %v4031_v37 = vpop.f32.mrb[125].mxu1  ;;  %v6574_v44 = vld [vmem:[%s6771_s8] ss:$0 sm:$0xff] }
 0x479   : > { %v4032_v18 = vadd.f32 %v6250_v8, %v4031_v37  ;;  %v4757_v21 = vpop.f32.mrb[126].mxu1 }
 0x47a   : > { %4365 = vst.msk [vmem:[%s6258_s20 + $0x1f0] sm:$0xff] %vm4302_vm2, %v4040_v17  ;;  %v4043_v32 = vadd.f32 %v4757_v21, %v6250_v8  ;;  %v3445_v25 = vpop.f32.mrb[172].mxu0  ;;  %v4034_v22 = vpop.f32.mrb[127].mxu1  ;;  %v3680_v24 = vpack.c.bf16 %v3611_v19, %v3610_v49 }
 0x47b   : > { %4363 = vst.msk [vmem:[%s6258_s20 + $0x1e0] sm:$0xff] %vm4302_vm2, %v4032_v18  ;;  %v3446_v59 = vadd.f32 %v3445_v25, %v5862_v53  ;;  %v4035_v23 = vadd.f32 %v6250_v8, %v4034_v22  ;;  %v3447_v31 = vpop.f32.mrb[173].mxu0 }
 0x47c   : > { %4366 = vst.msk [vmem:[%s6258_s20 + $0x1f8] sm:$0xff] %vm4302_vm2, %v4043_v32  ;;  %v3448_v26 = vadd.f32 %v3447_v31, %v5866_v54  ;;  %v3449_v27 = vpop.f32.mrb[174].mxu0  ;;  %4810 = vmatprep.mubr.bf16.mxu1 %v3680_v24 }
 0x47d   : > { %4364 = vst.msk [vmem:[%s6258_s20 + $0x1e8] sm:$0xff] %vm4302_vm2, %v4035_v23  ;;  %v3450_v33 = vadd.f32 %v3449_v27, %v5862_v53  ;;  %v3451_v36 = vpop.f32.mrb[175].mxu0 }
 0x47e   : > { %v3612_v28 = vmax.f32 %v3446_v59, %v3448_v26  ;;  %v3452_v29 = vadd.f32 %v3451_v36, %v5866_v54 }
 0x480   : > { %v3613_v2 = vmax.f32 %v3450_v33, %v3452_v29 }
 0x482   : > { %v3681_v30 = vpack.c.bf16 %v3613_v2, %v3612_v28  ;;  %v3455_v35 = vpop.f32.mrb[176].mxu0 }
 0x483   : > { %v3456_v39 = vadd.f32 %v3455_v35, %v5862_v53  ;;  %v3457_v41 = vpop.f32.mrb[177].mxu0 }
 0x484   : > { %v3458_v47 = vadd.f32 %v3457_v41, %v5866_v54  ;;  %v3459_v43 = vpop.f32.mrb[178].mxu0  ;;  %4811 = vmatmul.mubr.bf16.gmra.mrb[180].mxu1 %v3681_v30 }
 0x485   : > { %v3460_v52 = vadd.f32 %v3459_v43, %v5862_v53  ;;  %v3461_v16 = vpop.f32.mrb[179].mxu0 }
 0x486   : > { %v3614_v42 = vmax.f32 %v3456_v39, %v3458_v47  ;;  %v3462_v34 = vadd.f32 %v3461_v16, %v5866_v54 }
 0x487   : > { %v4760_v10 = vpop.f32.mrb[128].mxu1 }
 0x488   : > { %v3615_v51 = vmax.f32 %v3460_v52, %v3462_v34  ;;  %v4056_v20 = vadd.f32 %v4760_v10, %v6250_v8  ;;  %v4047_v55 = vpop.f32.mrb[129].mxu1 }
 0x489   : > { %v4048_v50 = vadd.f32 %v6250_v8, %v4047_v55  ;;  %v4761_v5 = vpop.f32.mrb[130].mxu1 }
 0x48a   : > { %4369 = vst.msk [vmem:[%s6258_s20 + $0x210] sm:$0xff] %vm4302_vm2, %v4056_v20  ;;  %v4059_v56 = vadd.f32 %v4761_v5, %v6250_v8  ;;  %v3465_v57 = vpop.f32.mrb[180].mxu0  ;;  %v4050_v58 = vpop.f32.mrb[131].mxu1  ;;  %v3682_v0 = vpack.c.bf16 %v3615_v51, %v3614_v42 }
 0x48b   : > { %4367 = vst.msk [vmem:[%s6258_s20 + $0x200] sm:$0xff] %vm4302_vm2, %v4048_v50  ;;  %v3466_v60 = vadd.f32 %v3465_v57, %v5862_v53  ;;  %v4051_v14 = vadd.f32 %v6250_v8, %v4050_v58  ;;  %v3467_v7 = vpop.f32.mrb[181].mxu0 }
 0x48c   : > { %4370 = vst.msk [vmem:[%s6258_s20 + $0x218] sm:$0xff] %vm4302_vm2, %v4059_v56  ;;  %v3468_v1 = vadd.f32 %v3467_v7, %v5866_v54  ;;  %v3469_v38 = vpop.f32.mrb[182].mxu0  ;;  %4814 = vmatprep.mubr.bf16.mxu1 %v3682_v0 }
 0x48d   : > { %4368 = vst.msk [vmem:[%s6258_s20 + $0x208] sm:$0xff] %vm4302_vm2, %v4051_v14  ;;  %v3470_v4 = vadd.f32 %v3469_v38, %v5862_v53  ;;  %v3471_v61 = vpop.f32.mrb[183].mxu0 }
 0x48e   : > { %v3616_v62 = vmax.f32 %v3466_v60, %v3468_v1  ;;  %v3472_v40 = vadd.f32 %v3471_v61, %v5866_v54 }
 0x490   : > { %v3617_v63 = vmax.f32 %v3470_v4, %v3472_v40 }
 0x492   : > { %v3683_v46 = vpack.c.bf16 %v3617_v63, %v3616_v62  ;;  %v3475_v6 = vpop.f32.mrb[184].mxu0 }
 0x493   : > { %v3476_v8 = vadd.f32 %v3475_v6, %v5862_v53  ;;  %v3477_v11 = vpop.f32.mrb[185].mxu0 }
 0x494   : > { %v3478_v9 = vadd.f32 %v3477_v11, %v5866_v54  ;;  %v3479_v45 = vpop.f32.mrb[186].mxu0  ;;  %4815 = vmatmul.mubr.bf16.gmra.mrb[184].mxu1 %v3683_v46 }
 0x495   : > { %v3480_v13 = vadd.f32 %v3479_v45, %v5862_v53  ;;  %v3481_v12 = vpop.f32.mrb[187].mxu0 }
 0x496   : > { %v3618_v48 = vmax.f32 %v3476_v8, %v3478_v9  ;;  %v3482_v3 = vadd.f32 %v3481_v12, %v5866_v54 }
 0x497   : > { %v4764_v49 = vpop.f32.mrb[132].mxu1 }
 0x498   : > { %v3619_v15 = vmax.f32 %v3480_v13, %v3482_v3  ;;  %v4072_v19 = vadd.f32 %v6574_v44, %v4764_v49  ;;  %v4063_v17 = vpop.f32.mrb[133].mxu1 }
 0x499   : > { %v4064_v37 = vadd.f32 %v6574_v44, %v4063_v17  ;;  %v4765_v18 = vpop.f32.mrb[134].mxu1 }
 0x49a   : > { %4373 = vst.msk [vmem:[%s6258_s20 + $0x230] sm:$0xff] %vm4302_vm2, %v4072_v19  ;;  %v4075_v21 = vadd.f32 %v6574_v44, %v4765_v18  ;;  %v3485_v32 = vpop.f32.mrb[188].mxu0  ;;  %v4066_v25 = vpop.f32.mrb[135].mxu1  ;;  %v3684_v22 = vpack.c.bf16 %v3619_v15, %v3618_v48 }
 0x49b   : > { %4371 = vst.msk [vmem:[%s6258_s20 + $0x220] sm:$0xff] %vm4302_vm2, %v4064_v37  ;;  %v3486_v24 = vadd.f32 %v3485_v32, %v5862_v53  ;;  %v4067_v59 = vadd.f32 %v6574_v44, %v4066_v25  ;;  %v3487_v23 = vpop.f32.mrb[189].mxu0 }
 0x49c   : > { %4374 = vst.msk [vmem:[%s6258_s20 + $0x238] sm:$0xff] %vm4302_vm2, %v4075_v21  ;;  %v3488_v31 = vadd.f32 %v3487_v23, %v5866_v54  ;;  %v3489_v26 = vpop.f32.mrb[190].mxu0  ;;  %4818 = vmatprep.mubr.bf16.mxu1 %v3684_v22 }
 0x49d   : > { %4372 = vst.msk [vmem:[%s6258_s20 + $0x228] sm:$0xff] %vm4302_vm2, %v4067_v59  ;;  %v3490_v27 = vadd.f32 %v3489_v26, %v5862_v53  ;;  %v3491_v33 = vpop.f32.mrb[191].mxu0 }
 0x49e   : > { %v3620_v36 = vmax.f32 %v3486_v24, %v3488_v31  ;;  %v3492_v28 = vadd.f32 %v3491_v33, %v5866_v54 }
 0x4a0   : > { %v3621_v29 = vmax.f32 %v3490_v27, %v3492_v28 }
 0x4a2   : > { %v3685_v2 = vpack.c.bf16 %v3621_v29, %v3620_v36 }
 0x4a4   : > { %4819 = vmatmul.mubr.bf16.gmra.mrb[188].mxu1 %v3685_v2 }
 0x4a7   : > { %v4768_v30 = vpop.f32.mrb[136].mxu1 }
 0x4a8   : > { %v4088_v35 = vadd.f32 %v6574_v44, %v4768_v30  ;;  %v4079_v39 = vpop.f32.mrb[137].mxu1 }
 0x4a9   : > { %v4080_v41 = vadd.f32 %v6574_v44, %v4079_v39  ;;  %v4769_v47 = vpop.f32.mrb[138].mxu1 }
 0x4aa   : > { %4377 = vst.msk [vmem:[%s6258_s20 + $0x250] sm:$0xff] %vm4302_vm2, %v4088_v35  ;;  %v4091_v53 = vadd.f32 %v6574_v44, %v4769_v47  ;;  %v4082_v43 = vpop.f32.mrb[139].mxu1 }
 0x4ab   : > { %4375 = vst.msk [vmem:[%s6258_s20 + $0x240] sm:$0xff] %vm4302_vm2, %v4080_v41  ;;  %v4083_v54 = vadd.f32 %v6574_v44, %v4082_v43 }
 0x4ac   : > { %4378 = vst.msk [vmem:[%s6258_s20 + $0x258] sm:$0xff] %vm4302_vm2, %v4091_v53 }
 0x4ad   : > { %4376 = vst.msk [vmem:[%s6258_s20 + $0x248] sm:$0xff] %vm4302_vm2, %v4083_v54 }
 0x4b7   : > { %v4772_v52 = vpop.f32.mrb[140].mxu1 }
 0x4b8   : > { %v4104_v16 = vadd.f32 %v6574_v44, %v4772_v52  ;;  %v4095_v42 = vpop.f32.mrb[141].mxu1 }
 0x4b9   : > { %v4096_v34 = vadd.f32 %v6574_v44, %v4095_v42  ;;  %v4773_v10 = vpop.f32.mrb[142].mxu1 }
 0x4ba   : > { %4381 = vst.msk [vmem:[%s6258_s20 + $0x270] sm:$0xff] %vm4302_vm2, %v4104_v16  ;;  %v4107_v51 = vadd.f32 %v6574_v44, %v4773_v10  ;;  %v4098_v20 = vpop.f32.mrb[143].mxu1 }
 0x4bb   : > { %4379 = vst.msk [vmem:[%s6258_s20 + $0x260] sm:$0xff] %vm4302_vm2, %v4096_v34  ;;  %v4099_v55 = vadd.f32 %v6574_v44, %v4098_v20 }
 0x4bc   : > { %4382 = vst.msk [vmem:[%s6258_s20 + $0x278] sm:$0xff] %vm4302_vm2, %v4107_v51 }
 0x4bd   : > { %4380 = vst.msk [vmem:[%s6258_s20 + $0x268] sm:$0xff] %vm4302_vm2, %v4099_v55 }
 0x4c7   : > { %v4776_v50 = vpop.f32.mrb[144].mxu1 }
 0x4c8   : > { %v4120_v5 = vadd.f32 %v6574_v44, %v4776_v50  ;;  %v4111_v56 = vpop.f32.mrb[145].mxu1 }
 0x4c9   : > { %v4112_v57 = vadd.f32 %v6574_v44, %v4111_v56  ;;  %v4777_v58 = vpop.f32.mrb[146].mxu1 }
 0x4ca   : > { %4385 = vst.msk [vmem:[%s6258_s20 + $0x290] sm:$0xff] %vm4302_vm2, %v4120_v5  ;;  %v4123_v0 = vadd.f32 %v6574_v44, %v4777_v58  ;;  %v4114_v60 = vpop.f32.mrb[147].mxu1 }
 0x4cb   : > { %4383 = vst.msk [vmem:[%s6258_s20 + $0x280] sm:$0xff] %vm4302_vm2, %v4112_v57  ;;  %v4115_v14 = vadd.f32 %v6574_v44, %v4114_v60 }
 0x4cc   : > { %4386 = vst.msk [vmem:[%s6258_s20 + $0x298] sm:$0xff] %vm4302_vm2, %v4123_v0 }
 0x4cd   : > { %4384 = vst.msk [vmem:[%s6258_s20 + $0x288] sm:$0xff] %vm4302_vm2, %v4115_v14 }
 0x4d7   : > { %v4780_v7 = vpop.f32.mrb[148].mxu1 }
 0x4d8   : > { %v4136_v1 = vadd.f32 %v6574_v44, %v4780_v7  ;;  %v4127_v38 = vpop.f32.mrb[149].mxu1 }
 0x4d9   : > { %v4128_v4 = vadd.f32 %v6574_v44, %v4127_v38  ;;  %v4781_v61 = vpop.f32.mrb[150].mxu1 }
 0x4da   : > { %4389 = vst.msk [vmem:[%s6258_s20 + $0x2b0] sm:$0xff] %vm4302_vm2, %v4136_v1  ;;  %v4139_v62 = vadd.f32 %v6574_v44, %v4781_v61  ;;  %v4130_v40 = vpop.f32.mrb[151].mxu1 }
 0x4db   : > { %4387 = vst.msk [vmem:[%s6258_s20 + $0x2a0] sm:$0xff] %vm4302_vm2, %v4128_v4  ;;  %v4131_v63 = vadd.f32 %v6574_v44, %v4130_v40 }
 0x4dc   : > { %4390 = vst.msk [vmem:[%s6258_s20 + $0x2b8] sm:$0xff] %vm4302_vm2, %v4139_v62 }
 0x4dd   : > { %4388 = vst.msk [vmem:[%s6258_s20 + $0x2a8] sm:$0xff] %vm4302_vm2, %v4131_v63 }
 0x4e7   : > { %v4784_v46 = vpop.f32.mrb[152].mxu1 }
 0x4e8   : > { %v4152_v6 = vadd.f32 %v6574_v44, %v4784_v46  ;;  %v4143_v8 = vpop.f32.mrb[153].mxu1 }
 0x4e9   : > { %v4144_v11 = vadd.f32 %v6574_v44, %v4143_v8  ;;  %v4785_v9 = vpop.f32.mrb[154].mxu1 }
 0x4ea   : > { %4393 = vst.msk [vmem:[%s6258_s20 + $0x2d0] sm:$0xff] %vm4302_vm2, %v4152_v6  ;;  %v4155_v45 = vadd.f32 %v6574_v44, %v4785_v9  ;;  %v4146_v13 = vpop.f32.mrb[155].mxu1 }
 0x4eb   : > { %4391 = vst.msk [vmem:[%s6258_s20 + $0x2c0] sm:$0xff] %vm4302_vm2, %v4144_v11  ;;  %v4147_v12 = vadd.f32 %v6574_v44, %v4146_v13 }
 0x4ec   : > { %4394 = vst.msk [vmem:[%s6258_s20 + $0x2d8] sm:$0xff] %vm4302_vm2, %v4155_v45 }
 0x4ed   : > { %4392 = vst.msk [vmem:[%s6258_s20 + $0x2c8] sm:$0xff] %vm4302_vm2, %v4147_v12 }
 0x4f7   : > { %v4788_v48 = vpop.f32.mrb[156].mxu1 }
 0x4f8   : > { %v4168_v3 = vadd.f32 %v6574_v44, %v4788_v48  ;;  %v4159_v49 = vpop.f32.mrb[157].mxu1 }
 0x4f9   : > { %v4160_v15 = vadd.f32 %v6574_v44, %v4159_v49  ;;  %v4789_v19 = vpop.f32.mrb[158].mxu1 }
 0x4fa   : > { %4397 = vst.msk [vmem:[%s6258_s20 + $0x2f0] sm:$0xff] %vm4302_vm2, %v4168_v3  ;;  %v4171_v17 = vadd.f32 %v6574_v44, %v4789_v19  ;;  %v4162_v37 = vpop.f32.mrb[159].mxu1 }
 0x4fb   : > { %4395 = vst.msk [vmem:[%s6258_s20 + $0x2e0] sm:$0xff] %vm4302_vm2, %v4160_v15  ;;  %v4163_v18 = vadd.f32 %v6574_v44, %v4162_v37 }
 0x4fc   : > { %4398 = vst.msk [vmem:[%s6258_s20 + $0x2f8] sm:$0xff] %vm4302_vm2, %v4171_v17 }
 0x4fd   : > { %4396 = vst.msk [vmem:[%s6258_s20 + $0x2e8] sm:$0xff] %vm4302_vm2, %v4163_v18 }
 0x507   : > { %v4792_v21 = vpop.f32.mrb[160].mxu1 }
 0x508   : > { %v4184_v32 = vadd.f32 %v6574_v44, %v4792_v21  ;;  %v4175_v25 = vpop.f32.mrb[161].mxu1 }
 0x509   : > { %v4176_v22 = vadd.f32 %v6574_v44, %v4175_v25  ;;  %v4793_v24 = vpop.f32.mrb[162].mxu1 }
 0x50a   : > { %4401 = vst.msk [vmem:[%s6258_s20 + $0x310] sm:$0xff] %vm4302_vm2, %v4184_v32  ;;  %v4187_v59 = vadd.f32 %v6574_v44, %v4793_v24  ;;  %v4178_v23 = vpop.f32.mrb[163].mxu1 }
 0x50b   : > { %4399 = vst.msk [vmem:[%s6258_s20 + $0x300] sm:$0xff] %vm4302_vm2, %v4176_v22  ;;  %v4179_v31 = vadd.f32 %v6574_v44, %v4178_v23 }
 0x50c   : > { %4402 = vst.msk [vmem:[%s6258_s20 + $0x318] sm:$0xff] %vm4302_vm2, %v4187_v59 }
 0x50d   : > { %4400 = vst.msk [vmem:[%s6258_s20 + $0x308] sm:$0xff] %vm4302_vm2, %v4179_v31 }
 0x517   : > { %v4796_v26 = vpop.f32.mrb[164].mxu1 }
 0x518   : > { %v4200_v27 = vadd.f32 %v6574_v44, %v4796_v26  ;;  %v4191_v33 = vpop.f32.mrb[165].mxu1 }
 0x519   : > { %v4192_v36 = vadd.f32 %v6574_v44, %v4191_v33  ;;  %v4797_v28 = vpop.f32.mrb[166].mxu1 }
 0x51a   : > { %4405 = vst.msk [vmem:[%s6258_s20 + $0x330] sm:$0xff] %vm4302_vm2, %v4200_v27  ;;  %v4203_v29 = vadd.f32 %v6574_v44, %v4797_v28  ;;  %v4194_v2 = vpop.f32.mrb[167].mxu1 }
 0x51b   : > { %4403 = vst.msk [vmem:[%s6258_s20 + $0x320] sm:$0xff] %vm4302_vm2, %v4192_v36  ;;  %v4195_v30 = vadd.f32 %v6574_v44, %v4194_v2 }
 0x51c   : > { %4406 = vst.msk [vmem:[%s6258_s20 + $0x338] sm:$0xff] %vm4302_vm2, %v4203_v29 }
 0x51d   : > { %4404 = vst.msk [vmem:[%s6258_s20 + $0x328] sm:$0xff] %vm4302_vm2, %v4195_v30 }
 0x527   : > { %v4800_v35 = vpop.f32.mrb[168].mxu1 }
 0x528   : > { %v4216_v39 = vadd.f32 %v6574_v44, %v4800_v35  ;;  %v4207_v41 = vpop.f32.mrb[169].mxu1 }
 0x529   : > { %v4208_v47 = vadd.f32 %v6574_v44, %v4207_v41  ;;  %v4801_v53 = vpop.f32.mrb[170].mxu1 }
 0x52a   : > { %4409 = vst.msk [vmem:[%s6258_s20 + $0x350] sm:$0xff] %vm4302_vm2, %v4216_v39  ;;  %v4219_v43 = vadd.f32 %v6574_v44, %v4801_v53  ;;  %v4210_v54 = vpop.f32.mrb[171].mxu1 }
 0x52b   : > { %4407 = vst.msk [vmem:[%s6258_s20 + $0x340] sm:$0xff] %vm4302_vm2, %v4208_v47  ;;  %v4211_v52 = vadd.f32 %v6574_v44, %v4210_v54 }
 0x52c   : > { %4410 = vst.msk [vmem:[%s6258_s20 + $0x358] sm:$0xff] %vm4302_vm2, %v4219_v43 }
 0x52d   : > { %4408 = vst.msk [vmem:[%s6258_s20 + $0x348] sm:$0xff] %vm4302_vm2, %v4211_v52 }
 0x537   : > { %v4804_v16 = vpop.f32.mrb[172].mxu1 }
 0x538   : > { %v4232_v42 = vadd.f32 %v6574_v44, %v4804_v16  ;;  %v4223_v34 = vpop.f32.mrb[173].mxu1 }
 0x539   : > { %v4224_v10 = vadd.f32 %v6574_v44, %v4223_v34  ;;  %v4805_v51 = vpop.f32.mrb[174].mxu1 }
 0x53a   : > { %4413 = vst.msk [vmem:[%s6258_s20 + $0x370] sm:$0xff] %vm4302_vm2, %v4232_v42  ;;  %v4235_v20 = vadd.f32 %v6574_v44, %v4805_v51  ;;  %v4226_v55 = vpop.f32.mrb[175].mxu1 }
 0x53b   : > { %4411 = vst.msk [vmem:[%s6258_s20 + $0x360] sm:$0xff] %vm4302_vm2, %v4224_v10  ;;  %v4227_v50 = vadd.f32 %v6574_v44, %v4226_v55 }
 0x53c   : > { %4414 = vst.msk [vmem:[%s6258_s20 + $0x378] sm:$0xff] %vm4302_vm2, %v4235_v20 }
 0x53d   : > { %4412 = vst.msk [vmem:[%s6258_s20 + $0x368] sm:$0xff] %vm4302_vm2, %v4227_v50 }
 0x547   : > { %v4808_v5 = vpop.f32.mrb[176].mxu1 }
 0x548   : > { %v4248_v56 = vadd.f32 %v6574_v44, %v4808_v5  ;;  %v4239_v57 = vpop.f32.mrb[177].mxu1 }
 0x549   : > { %v4240_v58 = vadd.f32 %v6574_v44, %v4239_v57  ;;  %v4809_v0 = vpop.f32.mrb[178].mxu1 }
 0x54a   : > { %4417 = vst.msk [vmem:[%s6258_s20 + $0x390] sm:$0xff] %vm4302_vm2, %v4248_v56  ;;  %v4251_v60 = vadd.f32 %v6574_v44, %v4809_v0  ;;  %v4242_v14 = vpop.f32.mrb[179].mxu1 }
 0x54b   : > { %4415 = vst.msk [vmem:[%s6258_s20 + $0x380] sm:$0xff] %vm4302_vm2, %v4240_v58  ;;  %v4243_v7 = vadd.f32 %v6574_v44, %v4242_v14 }
 0x54c   : > { %4418 = vst.msk [vmem:[%s6258_s20 + $0x398] sm:$0xff] %vm4302_vm2, %v4251_v60 }
 0x54d   : > { %4416 = vst.msk [vmem:[%s6258_s20 + $0x388] sm:$0xff] %vm4302_vm2, %v4243_v7 }
 0x557   : > { %v4812_v1 = vpop.f32.mrb[180].mxu1 }
 0x558   : > { %v4264_v38 = vadd.f32 %v6574_v44, %v4812_v1  ;;  %v4255_v4 = vpop.f32.mrb[181].mxu1 }
 0x559   : > { %v4256_v61 = vadd.f32 %v6574_v44, %v4255_v4  ;;  %v4813_v62 = vpop.f32.mrb[182].mxu1 }
 0x55a   : > { %4421 = vst.msk [vmem:[%s6258_s20 + $0x3b0] sm:$0xff] %vm4302_vm2, %v4264_v38  ;;  %v4267_v40 = vadd.f32 %v6574_v44, %v4813_v62  ;;  %v4258_v63 = vpop.f32.mrb[183].mxu1 }
 0x55b   : > { %4419 = vst.msk [vmem:[%s6258_s20 + $0x3a0] sm:$0xff] %vm4302_vm2, %v4256_v61  ;;  %v4259_v46 = vadd.f32 %v6574_v44, %v4258_v63 }
 0x55c   : > { %4422 = vst.msk [vmem:[%s6258_s20 + $0x3b8] sm:$0xff] %vm4302_vm2, %v4267_v40 }
 0x55d   : > { %4420 = vst.msk [vmem:[%s6258_s20 + $0x3a8] sm:$0xff] %vm4302_vm2, %v4259_v46 }
 0x567   : > { %v4816_v6 = vpop.f32.mrb[184].mxu1 }
 0x568   : > { %v4280_v8 = vadd.f32 %v6574_v44, %v4816_v6  ;;  %v4271_v11 = vpop.f32.mrb[185].mxu1 }
 0x569   : > { %v4272_v9 = vadd.f32 %v6574_v44, %v4271_v11  ;;  %v4817_v45 = vpop.f32.mrb[186].mxu1 }
 0x56a   : > { %4425 = vst.msk [vmem:[%s6258_s20 + $0x3d0] sm:$0xff] %vm4302_vm2, %v4280_v8  ;;  %v4283_v13 = vadd.f32 %v6574_v44, %v4817_v45  ;;  %v4274_v12 = vpop.f32.mrb[187].mxu1 }
 0x56b   : > { %4423 = vst.msk [vmem:[%s6258_s20 + $0x3c0] sm:$0xff] %vm4302_vm2, %v4272_v9  ;;  %v4275_v48 = vadd.f32 %v6574_v44, %v4274_v12 }
 0x56c   : > { %4426 = vst.msk [vmem:[%s6258_s20 + $0x3d8] sm:$0xff] %vm4302_vm2, %v4283_v13 }
 0x56d   : > { %4424 = vst.msk [vmem:[%s6258_s20 + $0x3c8] sm:$0xff] %vm4302_vm2, %v4275_v48 }
 0x577   : > { %v4820_v3 = vpop.f32.mrb[188].mxu1 }
 0x578   : > { %v4296_v49 = vadd.f32 %v6574_v44, %v4820_v3  ;;  %v4287_v15 = vpop.f32.mrb[189].mxu1 }
 0x579   : > { %v4288_v19 = vadd.f32 %v6574_v44, %v4287_v15  ;;  %v4821_v17 = vpop.f32.mrb[190].mxu1 }
 0x57a   : > { %4429 = vst.msk [vmem:[%s6258_s20 + $0x3f0] sm:$0xff] %vm4302_vm2, %v4296_v49  ;;  %v4299_v37 = vadd.f32 %v6574_v44, %v4821_v17  ;;  %v4290_v18 = vpop.f32.mrb[191].mxu1 }
 0x57b   : > { %4427 = vst.msk [vmem:[%s6258_s20 + $0x3e0] sm:$0xff] %vm4302_vm2, %v4288_v19  ;;  %v4291_v21 = vadd.f32 %v6574_v44, %v4290_v18 }
 0x57c   : > { %4430 = vst.msk [vmem:[%s6258_s20 + $0x3f8] sm:$0xff] %vm4302_vm2, %v4299_v37 }
 0x57d   : > { %4428 = vst.msk [vmem:[%s6258_s20 + $0x3e8] sm:$0xff] %vm4302_vm2, %v4291_v21 }
 0x57e PF: > { %s19_s30 = sadd.s32 1, %s4898_s30  }
 0x57f   : > { %p16_p4 = scmp.ge.s32.totalorder %s19_s30, 6  }
 0x581   :  { %18 = sbr.rel (!%p16_p4) target bundleno = 1 (0x1), region = 86 }

</bundles_post_ra>
